<compile_context>
chip_gen: v6e
topology: v6e:2x2x1
jax: 0.10.0
libtpu: 0.0.40
codegen_flags: <defaults>
</compile_context>

<pallas_src>
import numpy as np
import jax
import jax.numpy as jnp
from jax.experimental import pallas as pl
from jax.experimental.pallas import tpu as pltpu

ROT = 0.785          # rotation_factor from QLayer
INV_ROT = 1.0 / ROT
N_WIRES = 4
DIM = 1 << N_WIRES   # 16
TARGET_BLK = 8192    # patches (lanes) per grid step (well under VMEM limits)


def _round_up(a, m):
    return ((a + m - 1) // m) * m


def _num_tensorcores():
    """Best-effort TensorCore-per-chip count (v7x = 2); falls back to 1."""
    try:
        info = pltpu.get_tpu_info()
        for attr in ("num_cores", "tensorcores_per_chip", "tensor_cores_per_chip",
                     "num_tensorcores", "cores_per_chip", "core_count"):
            v = getattr(info, attr, None)
            if isinstance(v, int) and v > 0:
                return int(v)
    except Exception:
        pass
    return 1


_NUM_TC = _num_tensorcores()


def _choose_block(n):
    """Pick (blk, n_pad). Single step for small n on 1-TC chips; step count a
    multiple of the TC count on multi-core chips (megacore load balance)."""
    steps = max(1, pl.cdiv(n, TARGET_BLK))
    if _NUM_TC > 1:
        steps = _round_up(max(steps, _NUM_TC), _NUM_TC)
    blk = max(128, min(TARGET_BLK, _round_up(pl.cdiv(n, steps), 128)))
    n_pad = _round_up(n, blk)
    return blk, n_pad


# ----------------------------------------------------------------------------
# Weight-independent constants (numpy, built once at import).
# Basis convention: index z in [0,16), bit i of z is wire i (wire 0 = LSB).
# ----------------------------------------------------------------------------
def _np_constants():
    bits = (np.arange(DIM)[:, None] >> np.arange(N_WIRES)[None, :]) & 1
    signs = 1.0 - 2.0 * bits                                    # (16, 4)
    A = (0.5 * ROT * signs).astype(np.float32)                  # L = A @ x

    I2 = np.eye(2)
    X1 = np.array([[0.0, 1.0], [1.0, 0.0]])

    def on(gate, wire):                                         # wire 0 = LSB
        full = np.eye(1)
        for q in range(N_WIRES - 1, -1, -1):
            full = np.kron(full, gate if q == wire else I2)
        return full

    Xfull = np.stack([on(X1, i) for i in range(N_WIRES)], 0)    # (4, 16, 16)

    def cnot(c, t):
        M = np.zeros((DIM, DIM))
        for z in range(DIM):
            M[z ^ (((z >> c) & 1) << t), z] = 1.0
        return M

    Cpost = np.eye(DIM)
    for i in range(N_WIRES - 1):
        Cpost = cnot(i, i + 1) @ Cpost
    Cpost = cnot(N_WIRES - 1, 0) @ Cpost                        # (16, 16) permutation

    Zs = 1.0 - 2.0 * ((np.arange(DIM)[None, :] >> np.arange(N_WIRES)[:, None]) & 1)
    Zp = np.zeros((8, 2 * DIM), dtype=np.float32)               # padded to 8 sublanes
    Zp[:N_WIRES, :DIM] = Zs
    Zp[:N_WIRES, DIM:] = Zs
    return (A, Xfull.astype(np.float32), Cpost.astype(np.float32), Zp)


_A_NP, _XFULL_NP, _CPOST_NP, _ZP_NP = _np_constants()


# ----------------------------------------------------------------------------
# Weight-dependent constants (jnp, traceable / jit-able).
# ----------------------------------------------------------------------------
def _build_unitary_mats(weights):
    """Wc, Ws (32, 16) float32 such that [re; im] = Wc @ cos(phi) + Ws @ sin(phi)
    (1/4 state amplitude folded in)."""
    w = jnp.reshape(weights, (-1,)).astype(jnp.float32)[:N_WIRES]
    c = jnp.cos(0.5 * w)
    s = jnp.sin(0.5 * w)
    eye = jnp.eye(DIM, dtype=jnp.float32)
    Xf = jnp.asarray(_XFULL_NP)
    hp = jax.lax.Precision.HIGHEST   # tiny 16x16 matmuls; keep them exact-ish

    # U = CNOT_chain @ RX(w3) @ RX(w2) @ RX(w1) @ RX(w0), kept as (Ure, Uim).
    Ure = eye
    Uim = jnp.zeros((DIM, DIM), jnp.float32)
    for i in range(N_WIRES):
        Rre = c[i] * eye             # RX_i = cos(w/2) I - i sin(w/2) X_i
        Rim = -s[i] * Xf[i]
        new_re = jnp.matmul(Rre, Ure, precision=hp) - jnp.matmul(Rim, Uim, precision=hp)
        new_im = jnp.matmul(Rre, Uim, precision=hp) + jnp.matmul(Rim, Ure, precision=hp)
        Ure, Uim = new_re, new_im
    Cp = jnp.asarray(_CPOST_NP)
    Ure = jnp.matmul(Cp, Ure, precision=hp)
    Uim = jnp.matmul(Cp, Uim, precision=hp)

    # re = 0.25*(Ure@cos + Uim@sin) ; im = 0.25*(Uim@cos - Ure@sin)
    Wc = 0.25 * jnp.concatenate([Ure, Uim], axis=0)
    Ws = 0.25 * jnp.concatenate([Uim, -Ure], axis=0)
    return Wc, Ws


# ----------------------------------------------------------------------------
# Pallas kernel: one lane-dense block of patches per grid step.
# ----------------------------------------------------------------------------
def quanv_kernel(x_ref, a_ref, wc_ref, ws_ref, z_ref, o_ref):
    x = x_ref[...]                                                      # (4, BLK)

    # Per-basis-state phase (global-phase term dropped).
    L = jnp.dot(a_ref[...], x, preferred_element_type=jnp.float32)     # (16, BLK)
    phi = L + INV_ROT * (L * L)

    # Complex 16x16 unitary as two real half-width dots (no concat temp).
    cphi = jnp.cos(phi)
    sphi = jnp.sin(phi)
    amp = (jnp.dot(wc_ref[...], cphi, preferred_element_type=jnp.float32)
           + jnp.dot(ws_ref[...], sphi, preferred_element_type=jnp.float32))  # (32, BLK)

    # <Z_c> = Zp @ (re^2 ++ im^2); Zp padded to 8 rows for full-vreg stores.
    o_ref[...] = jnp.dot(z_ref[...], amp * amp,
                         preferred_element_type=jnp.float32)            # (8, BLK)


# ----------------------------------------------------------------------------
# Wrapper: patch extraction + pallas_call + NCHW reassembly (one jit dispatch).
# ----------------------------------------------------------------------------
@jax.jit
def q_conv_layer_forward(image, weights):
    """image: (B, 1, 28, 28) float32 NCHW; weights: (1, 4). Returns (B, 4, 14, 14)."""
    B, C, H, W_ = image.shape
    assert C == 1 and H == 28 and W_ == 28, "only the 28x28 branch is implemented"
    n = B * 14 * 14

    # (4, B*196) patch slab in a single transpose:
    #   rows  = [x(j,k), x(j,k+1), x(j+1,k), x(j+1,k+1)]  (matches torch forward)
    #   lanes = patch index b*196 + j*14 + k
    p = image[:, 0].astype(jnp.float32).reshape(B, 14, 2, 14, 2)
    x = jnp.transpose(p, (2, 4, 0, 1, 3)).reshape(4, n)

    blk, n_pad = _choose_block(n)
    if n_pad != n:
        x = jnp.pad(x, ((0, 0), (0, n_pad - n)))

    Wc, Ws = _build_unitary_mats(weights)
    A = jnp.asarray(_A_NP)
    Zp = jnp.asarray(_ZP_NP)

    flops = 2 * n_pad * (DIM * N_WIRES + 2 * 2 * DIM * DIM + 8 * 2 * DIM) + 6 * DIM * n_pad
    out = pl.pallas_call(
        quanv_kernel,
        out_shape=jax.ShapeDtypeStruct((8, n_pad), jnp.float32),
        grid_spec=pltpu.PrefetchScalarGridSpec(
            num_scalar_prefetch=0,
            grid=(n_pad // blk,),
            in_specs=[
                pl.BlockSpec((4, blk), lambda i: (0, i)),              # patch pixels
                pl.BlockSpec((DIM, N_WIRES), lambda i: (0, 0)),        # phase sign matrix
                pl.BlockSpec((2 * DIM, DIM), lambda i: (0, 0)),        # cos half of unitary
                pl.BlockSpec((2 * DIM, DIM), lambda i: (0, 0)),        # sin half of unitary
                pl.BlockSpec((8, 2 * DIM), lambda i: (0, 0)),          # padded Z-sign matrix
            ],
            out_specs=pl.BlockSpec((8, blk), lambda i: (0, i)),
        ),
        compiler_params=pltpu.CompilerParams(
            dimension_semantics=("parallel",)),
        cost_estimate=pl.CostEstimate(
            flops=int(flops),
            transcendentals=int(2 * DIM * n_pad),
            bytes_accessed=int(4 * (4 + 8) * n_pad)),
    )(x, A, Wc, Ws, Zp)

    out = out[:4, :n].reshape(4, B, 14, 14)
    return jnp.transpose(out, (1, 0, 2, 3)).astype(jnp.float32)        # (B, 4, 14, 14)


# ----------------------------------------------------------------------------
# Host reference: direct statevector simulation of one patch (correctness check).
# ----------------------------------------------------------------------------
def _reference_patch(xvals, weights):
    H1 = np.array([[1.0, 1.0], [1.0, -1.0]], dtype=np.complex128) / np.sqrt(2.0)
    X1 = np.array([[0.0, 1.0], [1.0, 0.0]], dtype=np.complex128)
    I2 = np.eye(2, dtype=np.complex128)

    def on(gate, wire):
        full = np.eye(1, dtype=np.complex128)
        for q in range(N_WIRES - 1, -1, -1):       # wire 0 = LSB
            full = np.kron(full, gate if q == wire else I2)
        return full

    def rz(t):
        return np.diag([np.exp(-1j * t / 2.0), np.exp(1j * t / 2.0)])

    def rx(t):
        return np.cos(t / 2.0) * I2 - 1j * np.sin(t / 2.0) * X1

    def cnot(c, t):
        M = np.zeros((DIM, DIM), dtype=np.complex128)
        for z in range(DIM):
            M[z ^ (((z >> c) & 1) << t), z] = 1.0
        return M

    w = np.asarray(weights, dtype=np.float64).reshape(-1)[:N_WIRES]
    psi = np.zeros(DIM, dtype=np.complex128)
    psi[0] = 1.0
    for i in range(N_WIRES):
        psi = on(H1, i) @ psi
        psi = on(rz(ROT * xvals[i]), i) @ psi
    for i in range(N_WIRES - 1):
        for j in range(i + 1, N_WIRES):
            psi = cnot(i, j) @ psi
            psi = on(rz(ROT * xvals[i] * xvals[j]), j) @ psi
            psi = cnot(i, j) @ psi
    for i in range(N_WIRES):
        psi = on(rx(w[i]), i) @ psi
    for i in range(N_WIRES - 1):
        psi = cnot(i, i + 1) @ psi
    psi = cnot(N_WIRES - 1, 0) @ psi

    probs = np.abs(psi) ** 2
    zsign = 1.0 - 2.0 * ((np.arange(DIM)[None, :] >> np.arange(N_WIRES)[:, None]) & 1)
    return zsign @ probs                           # (4,): <Z_wire_c>


if __name__ == "__main__":
    key = jax.random.PRNGKey(0)
    k_img, k_w = jax.random.split(key)
    # Small deterministic inputs consistent with the module's forward path.
    image = jax.random.uniform(k_img, (2, 1, 28, 28), dtype=jnp.float32)
    # weights_dict['qcnn.0.torch_qlayer.weights'] -> used as weights[0][i], i<4
    weights = jax.random.normal(k_w, (1, 4), dtype=jnp.float32)

    out = q_conv_layer_forward(image, weights)
    out = jax.block_until_ready(out)

    assert out.shape == (2, 4, 14, 14) and out.dtype == jnp.float32
    assert bool(jnp.all(jnp.isfinite(out)))

    # Spot-check two patches against a direct gate-level statevector simulation.
    img_np = np.asarray(image, dtype=np.float64)
    w_np = np.asarray(weights)
    for (b, j, k) in [(0, 0, 0), (1, 3, 5)]:
        xv = [img_np[b, 0, 2 * j, 2 * k], img_np[b, 0, 2 * j, 2 * k + 1],
              img_np[b, 0, 2 * j + 1, 2 * k], img_np[b, 0, 2 * j + 1, 2 * k + 1]]
        ref = _reference_patch(xv, w_np)
        got = np.asarray(out[b, :, j, k], dtype=np.float64)
        np.testing.assert_allclose(got, ref, atol=2e-3, rtol=0)

    print("KERNEL_OK")
</pallas_src>

<mosaic_0001>
module attributes {stable_mosaic.version = 11 : i64} {
  func.func @quanv_kernel(%arg0: i32, %arg1: memref<4x512xf32, #tpu.memory_space<vmem>>, %arg2: memref<16x4xf32, #tpu.memory_space<vmem>>, %arg3: memref<32x16xf32, #tpu.memory_space<vmem>>, %arg4: memref<32x16xf32, #tpu.memory_space<vmem>>, %arg5: memref<8x32xf32, #tpu.memory_space<vmem>>, %arg6: memref<8x512xf32, #tpu.memory_space<vmem>>) attributes {dimension_semantics = [#tpu.dimension_semantics<parallel>], iteration_bounds = array<i64: 1>, scalar_prefetch = 0 : i64, scratch_operands = 0 : i64, tpu.core_type = #tpu.core_type<tc>, window_params = [{transform_indices = @transform_0, window_bounds = array<i64: 4, 512>}, {pipeline_mode = #tpu.pipeline_mode<synchronous>, transform_indices = @transform_1, window_bounds = array<i64: 16, 4>}, {pipeline_mode = #tpu.pipeline_mode<synchronous>, transform_indices = @transform_2, window_bounds = array<i64: 32, 16>}, {pipeline_mode = #tpu.pipeline_mode<synchronous>, transform_indices = @transform_3, window_bounds = array<i64: 32, 16>}, {pipeline_mode = #tpu.pipeline_mode<synchronous>, transform_indices = @transform_4, window_bounds = array<i64: 8, 32>}, {transform_indices = @transform_5, window_bounds = array<i64: 8, 512>}]} {
    %c0 = arith.constant 0 : index
    %c0_0 = arith.constant 0 : index
    %0 = vector.load %arg1[%c0, %c0_0] : memref<4x512xf32, #tpu.memory_space<vmem>>, vector<4x512xf32>
    %c0_1 = arith.constant 0 : index
    %c0_2 = arith.constant 0 : index
    %1 = vector.load %arg2[%c0_1, %c0_2] : memref<16x4xf32, #tpu.memory_space<vmem>>, vector<16x4xf32>
    %cst = arith.constant dense<0.000000e+00> : vector<16x512xf32>
    %2 = tpu.matmul %1, %0, %cst {dimension_numbers = #tpu.dot_dimension_numbers<[1], [0], [0], [1], [0, 0, 1, 1], [], []>} : vector<16x4xf32>, vector<4x512xf32>, vector<16x512xf32> -> vector<16x512xf32>
    %3 = arith.mulf %2, %2 : vector<16x512xf32>
    %cst_3 = arith.constant 1.27388537 : f32
    %4 = vector.broadcast %cst_3 : f32 to vector<16x512xf32>
    %5 = arith.mulf %4, %3 : vector<16x512xf32>
    %6 = arith.addf %2, %5 : vector<16x512xf32>
    %7 = math.cos %6 : vector<16x512xf32>
    %8 = math.sin %6 : vector<16x512xf32>
    %c0_4 = arith.constant 0 : index
    %c0_5 = arith.constant 0 : index
    %9 = vector.load %arg3[%c0_4, %c0_5] : memref<32x16xf32, #tpu.memory_space<vmem>>, vector<32x16xf32>
    %cst_6 = arith.constant dense<0.000000e+00> : vector<32x512xf32>
    %10 = tpu.matmul %9, %7, %cst_6 {dimension_numbers = #tpu.dot_dimension_numbers<[1], [0], [0], [1], [0, 0, 1, 1], [], []>} : vector<32x16xf32>, vector<16x512xf32>, vector<32x512xf32> -> vector<32x512xf32>
    %c0_7 = arith.constant 0 : index
    %c0_8 = arith.constant 0 : index
    %11 = vector.load %arg4[%c0_7, %c0_8] : memref<32x16xf32, #tpu.memory_space<vmem>>, vector<32x16xf32>
    %cst_9 = arith.constant dense<0.000000e+00> : vector<32x512xf32>
    %12 = tpu.matmul %11, %8, %cst_9 {dimension_numbers = #tpu.dot_dimension_numbers<[1], [0], [0], [1], [0, 0, 1, 1], [], []>} : vector<32x16xf32>, vector<16x512xf32>, vector<32x512xf32> -> vector<32x512xf32>
    %13 = arith.addf %10, %12 : vector<32x512xf32>
    %c0_10 = arith.constant 0 : index
    %c0_11 = arith.constant 0 : index
    %14 = vector.load %arg5[%c0_10, %c0_11] : memref<8x32xf32, #tpu.memory_space<vmem>>, vector<8x32xf32>
    %15 = arith.mulf %13, %13 : vector<32x512xf32>
    %cst_12 = arith.constant dense<0.000000e+00> : vector<8x512xf32>
    %16 = tpu.matmul %14, %15, %cst_12 {dimension_numbers = #tpu.dot_dimension_numbers<[1], [0], [0], [1], [0, 0, 1, 1], [], []>} : vector<8x32xf32>, vector<32x512xf32>, vector<8x512xf32> -> vector<8x512xf32>
    %c0_13 = arith.constant 0 : index
    %c0_14 = arith.constant 0 : index
    %17 = vector.load %arg6[%c0_13, %c0_14] : memref<8x512xf32, #tpu.memory_space<vmem>>, vector<8x512xf32>
    tpu.vector_store %arg6[%c0_13, %c0_14], %16 {strides = array<i32>} : memref<8x512xf32, #tpu.memory_space<vmem>>, vector<8x512xf32>,
    return
  }
  func.func @transform_0(%arg0: i32) -> (i32, i32) {
    %c0_i32 = arith.constant 0 : i32
    %c0_i32_0 = arith.constant 0 : i32
    return %c0_i32, %arg0 : i32, i32
  }
  func.func @transform_1(%arg0: i32) -> (i32, i32) {
    %c0_i32 = arith.constant 0 : i32
    %c0_i32_0 = arith.constant 0 : i32
    %c0_i32_1 = arith.constant 0 : i32
    return %c0_i32, %c0_i32_0 : i32, i32
  }
  func.func @transform_2(%arg0: i32) -> (i32, i32) {
    %c0_i32 = arith.constant 0 : i32
    %c0_i32_0 = arith.constant 0 : i32
    %c0_i32_1 = arith.constant 0 : i32
    return %c0_i32, %c0_i32_0 : i32, i32
  }
  func.func @transform_3(%arg0: i32) -> (i32, i32) {
    %c0_i32 = arith.constant 0 : i32
    %c0_i32_0 = arith.constant 0 : i32
    %c0_i32_1 = arith.constant 0 : i32
    return %c0_i32, %c0_i32_0 : i32, i32
  }
  func.func @transform_4(%arg0: i32) -> (i32, i32) {
    %c0_i32 = arith.constant 0 : i32
    %c0_i32_0 = arith.constant 0 : i32
    %c0_i32_1 = arith.constant 0 : i32
    return %c0_i32, %c0_i32_0 : i32, i32
  }
  func.func @transform_5(%arg0: i32) -> (i32, i32) {
    %c0_i32 = arith.constant 0 : i32
    %c0_i32_0 = arith.constant 0 : i32
    return %c0_i32, %arg0 : i32, i32
  }
}

</mosaic_0001>

<bundles_post_ra>
// kernel: squeeze.9
= control target key start
LH: loop header
LB: loop body
LE: loop exit
PB: predicated region body
PF: predicated region fallthrough
CT: control target
= control target key end

     0   :  { %vm282_vm0 = vcmask 1047556   ;;  %s2270_s27 = smov 126   ;;  %s2272_s5 = smov 122   ;;  %vm142_vm1 = vcmask 15360   ;;  %s4092_s0 = inlined_call_operand.vmem [shape: f32[2,1,28,28], index: 0, kind: input, shape index: {}]   ;;  %s4093_s1 = inlined_call_operand.vmem [shape: f32[2,14,2,14,2], index: 1, kind: output, shape index: {}]  }
   0x1   :  { %v1863_v0 = vld [vmem:[%s4092_s0 + $0x6] sm:$0x3]  ;;  %v1864_v1 = vld [vmem:[%s4092_s0 + $0x4] sm:$0x3]  ;;  %v1865_v2 = vld [vmem:[%s4092_s0 + $0x2] sm:$0x3] }
   0x2   :  { %129 = vst [vmem:[#allocation0 + $0x18] sm:$0x3] %v1863_v0  ;;  %134 = vst [vmem:[#allocation0 + $0x10] sm:$0x3] %v1864_v1  ;;  %v139_v3 = vld [vmem:[%s4092_s0] sm:$0x3] }
   0x3   :  { %138 = vst [vmem:[#allocation0 + $0x8] sm:$0x3] %v1865_v2  ;;  %v1859_v4 = vld [vmem:[%s4092_s0 + $0xe] sm:$0x3]  ;;  %140 = vst [vmem:[#allocation0] sm:$0x3] %v139_v3 }
   0x4   :  { %109 = vst [vmem:[#allocation0 + $0x38] sm:$0x3] %v1859_v4  ;;  %v1860_v5 = vld [vmem:[%s4092_s0 + $0xc] sm:$0x3]  ;;  %v1861_v6 = vld [vmem:[%s4092_s0 + $0xa] sm:$0x3] }
   0x5   :  { %v1862_v7 = vld [vmem:[%s4092_s0 + $0x8] sm:$0x3]  ;;  %114 = vst [vmem:[#allocation0 + $0x30] sm:$0x3] %v1860_v5  ;;  %119 = vst [vmem:[#allocation0 + $0x28] sm:$0x3] %v1861_v6 }
   0x6   :  { %124 = vst [vmem:[#allocation0 + $0x20] sm:$0x3] %v1862_v7  ;;  %v1855_v8 = vld [vmem:[%s4092_s0 + $0x16] sm:$0x3]  ;;  %v1856_v9 = vld [vmem:[%s4092_s0 + $0x14] sm:$0x3] }
   0x7   :  { %v1857_v10 = vld [vmem:[%s4092_s0 + $0x12] sm:$0x3]  ;;  %89 = vst [vmem:[#allocation0 + $0x58] sm:$0x3] %v1855_v8  ;;  %94 = vst [vmem:[#allocation0 + $0x50] sm:$0x3] %v1856_v9 }
   0x8   :  { %99 = vst [vmem:[#allocation0 + $0x48] sm:$0x3] %v1857_v10  ;;  %v1858_v11 = vld [vmem:[%s4092_s0 + $0x10] sm:$0x3]  ;;  %v1851_v12 = vld [vmem:[%s4092_s0 + $0x1e] sm:$0x3] }
   0x9   :  { %v1852_v13 = vld [vmem:[%s4092_s0 + $0x1c] sm:$0x3]  ;;  %104 = vst [vmem:[#allocation0 + $0x40] sm:$0x3] %v1858_v11  ;;  %69 = vst [vmem:[#allocation0 + $0x78] sm:$0x3] %v1851_v12 }
   0xa   :  { %74 = vst [vmem:[#allocation0 + $0x70] sm:$0x3] %v1852_v13  ;;  %v1853_v14 = vld [vmem:[%s4092_s0 + $0x1a] sm:$0x3]  ;;  %v1854_v15 = vld [vmem:[%s4092_s0 + $0x18] sm:$0x3] }
   0xb   :  { %v1847_v16 = vld [vmem:[%s4092_s0 + $0x26] sm:$0x3]  ;;  %79 = vst [vmem:[#allocation0 + $0x68] sm:$0x3] %v1853_v14  ;;  %84 = vst [vmem:[#allocation0 + $0x60] sm:$0x3] %v1854_v15 }
   0xc   :  { %49 = vst [vmem:[#allocation0 + $0x98] sm:$0x3] %v1847_v16  ;;  %v1848_v17 = vld [vmem:[%s4092_s0 + $0x24] sm:$0x3]  ;;  %v1849_v18 = vld [vmem:[%s4092_s0 + $0x22] sm:$0x3] }
   0xd   :  { %v1850_v19 = vld [vmem:[%s4092_s0 + $0x20] sm:$0x3]  ;;  %54 = vst [vmem:[#allocation0 + $0x90] sm:$0x3] %v1848_v17  ;;  %59 = vst [vmem:[#allocation0 + $0x88] sm:$0x3] %v1849_v18 }
   0xe   :  { %64 = vst [vmem:[#allocation0 + $0x80] sm:$0x3] %v1850_v19  ;;  %v1843_v20 = vld [vmem:[%s4092_s0 + $0x2e] sm:$0x3]  ;;  %v1844_v21 = vld [vmem:[%s4092_s0 + $0x2c] sm:$0x3] }
   0xf   :  { %v1845_v22 = vld [vmem:[%s4092_s0 + $0x2a] sm:$0x3]  ;;  %v281_v23 = vld.sshfl [vmem:[#allocation0 + $0x10] sm:$0xff pattern:$0x98100000]   ;;  %s2273_s6 = smov 120  }
  0x10   :  { %29 = vst [vmem:[#allocation0 + $0xb8] sm:$0x3] %v1843_v20  ;;  %34 = vst [vmem:[#allocation0 + $0xb0] sm:$0x3] %v1844_v21  ;;  %v1846_v24 = vld [vmem:[%s4092_s0 + $0x28] sm:$0x3] }
  0x11   :  { %39 = vst [vmem:[#allocation0 + $0xa8] sm:$0x3] %v1845_v22  ;;  %v279_v25 = vld.sshfl [vmem:[#allocation0] sm:$0xff pattern:$0x99999810]   ;;  %s2274_s7 = smov 118  }
  0x12   :  { %44 = vst [vmem:[#allocation0 + $0xa0] sm:$0x3] %v1846_v24  ;;  %v1839_v26 = vld [vmem:[%s4092_s0 + $0x36] sm:$0x3]  ;;  %v2369_v27 = vsel %vm282_vm0, %v281_v23, %v279_v25  ;;  %v1840_v31 = vld [vmem:[%s4092_s0 + $0x34] sm:$0x3] }
  0x13   :  { %v296_v28 = vld.sshfl [vmem:[#allocation0 + $0x20] sm:$0xff pattern:$0x99999810]   ;;  %v298_v29 = vld.sshfl [vmem:[#allocation0 + $0x30] sm:$0xff pattern:$0x98100000]   ;;  %284 = vrot.lane.b32.xlu0 %v2369_v27, %s2270_s27 }
  0x14   :  { %9 = vst [vmem:[#allocation0 + $0xd8] sm:$0x3] %v1839_v26  ;;  %v315_v30 = vld.sshfl [vmem:[#allocation0 + $0x50] sm:$0xff pattern:$0x98100000]   ;;  %v2376_v32 = vsel %vm282_vm0, %v298_v29, %v296_v28  ;;  %s2275_s8 = smov 116  }
  0x15   :  { %v313_v33 = vld.sshfl [vmem:[#allocation0 + $0x40] sm:$0xff pattern:$0x99999810]   ;;  %v332_v34 = vld.sshfl [vmem:[#allocation0 + $0x70] sm:$0xff pattern:$0x98100000]  }
  0x16   :  { %14 = vst [vmem:[#allocation0 + $0xd0] sm:$0x3] %v1840_v31  ;;  %v2379_v35 = vsel %vm282_vm0, %v315_v30, %v313_v33  ;;  %v330_v36 = vld.sshfl [vmem:[#allocation0 + $0x60] sm:$0xff pattern:$0x99999810]   ;;  %s2276_s9 = smov 114  }
  0x17   :  { %v1841_v37 = vld [vmem:[%s4092_s0 + $0x32] sm:$0x3]  ;;  %318 = vrot.lane.b32.xlu1 %v2379_v35, %s2270_s27  ;;  %v347_v38 = vld.sshfl [vmem:[#allocation0 + $0x80] sm:$0xff pattern:$0x99999810]   ;;  %301 = vrot.lane.b32.xlu0 %v2376_v32, %s2270_s27  ;;  %v2387_v40 = vsel %vm282_vm0, %v332_v34, %v330_v36  ;;  %s2277_s10 = smov 112  }
  0x18   :  { %v349_v39 = vld.sshfl [vmem:[#allocation0 + $0x90] sm:$0xff pattern:$0x98100000]   ;;  %19 = vst [vmem:[#allocation0 + $0xc8] sm:$0x3] %v1841_v37  ;;  %s2278_s11 = smov 110  }
  0x19   :  { %v1842_v41 = vld [vmem:[%s4092_s0 + $0x30] sm:$0x3]  ;;  %v2393_v42 = vsel %vm282_vm0, %v349_v39, %v347_v38  ;;  %v364_v43 = vld.sshfl [vmem:[#allocation0 + $0xa0] sm:$0xff pattern:$0x99999810]   ;;  %s2271_s0 = smov 124  }
  0x1a   :  { %v366_v44 = vld.sshfl [vmem:[#allocation0 + $0xb0] sm:$0xff pattern:$0x98100000]   ;;  %24 = vst [vmem:[#allocation0 + $0xc0] sm:$0x3] %v1842_v41  ;;  %s2279_s30 = smov 108  }
  0x1b   :  { %335 = vrot.lane.b32.xlu1 %v2387_v40, %s2270_s27  ;;  %352 = vrot.lane.b32.xlu0 %v2393_v42, %s2270_s27  ;;  %v2398_v45 = vsel %vm282_vm0, %v366_v44, %v364_v43  ;;  %s2281_s24 = smov 104   ;;  %v1695_v9 = vld.sshfl [vmem:[#allocation0] sm:$0xff pattern:$0x99999810]   ;;  %v150_v24 = vld [vmem:[#allocation0 + $0x10] sm:$0x3]  }
  0x1c   :  { %v1697_v11 = vld.sshfl [vmem:[#allocation0 + $0x10] sm:$0xff pattern:$0x98100000]   ;;  %v1712_v13 = vld.sshfl [vmem:[#allocation0 + $0x20] sm:$0xff pattern:$0x99999810]  }
  0x1d   :  { %v383_v46 = vld.sshfl [vmem:[#allocation0 + $0xd0] sm:$0xff pattern:$0x98100000]   ;;  %v1729_v15 = vld.sshfl [vmem:[#allocation0 + $0x40] sm:$0xff pattern:$0x99999810]   ;;  %v1699_v17 = vsel %vm282_vm0, %v1697_v11, %v1695_v9 }
  0x1e   :  { %v1714_v14 = vld.sshfl [vmem:[#allocation0 + $0x30] sm:$0xff pattern:$0x98100000]   ;;  %v1746_v18 = vld.sshfl [vmem:[#allocation0 + $0x60] sm:$0xff pattern:$0x99999810]  }
  0x1f   :  { %369 = vrot.lane.b32.xlu1 %v2398_v45, %s2270_s27  ;;  %v1731_v16 = vld.sshfl [vmem:[#allocation0 + $0x50] sm:$0xff pattern:$0x98100000]   ;;  %v1716_v21 = vsel %vm282_vm0, %v1714_v14, %v1712_v13  ;;  %v141_v22 = vld [vmem:[#allocation0] sm:$0x3]   ;;  %s2282_s29 = smov 102  }
  0x20   :  { %v1748_v19 = vld.sshfl [vmem:[#allocation0 + $0x70] sm:$0xff pattern:$0x98100000]   ;;  %v145_v23 = vld [vmem:[#allocation0 + $0x8] sm:$0x3]   ;;  %v1733_v34 = vsel %vm282_vm0, %v1731_v16, %v1729_v15 }
  0x21   :  { %v381_v47 = vld.sshfl [vmem:[#allocation0 + $0xc0] sm:$0xff pattern:$0x99999810]   ;;  %143 = vst.msk [vmem:[%s4093_s1] ss:$16 sm:$0x3] %vm142_vm1, %v141_v22   ;;  %v1750_v41 = vsel %vm282_vm0, %v1748_v19, %v1746_v18 }
  0x22   :  { %v2402_v48 = vsel %vm282_vm0, %v383_v46, %v381_v47  ;;  %1866 = vst.msk [vmem:[%s4093_s1 + $0x20] ss:$16 sm:$0x3] %vm142_vm1, %v145_v23   ;;  %1867 = vst.msk [vmem:[%s4093_s1 + $0x40] ss:$16 sm:$0x3] %vm142_vm1, %v150_v24  }
  0x23   :  { %386 = vrot.lane.b32.xlu0 %v2402_v48, %s2270_s27  ;;  %402 = vrot.lane.b32.xlu1 %v2369_v27, %s2271_s0  ;;  %s2280_s27 = smov 106   ;;  %v155_v26 = vld [vmem:[#allocation0 + $0x18] sm:$0x3]   ;;  %v165_v28 = vld [vmem:[#allocation0 + $0x28] sm:$0x3]  }
  0x24   :  { %v1763_v29 = vld.sshfl [vmem:[#allocation0 + $0x80] sm:$0xff pattern:$0x99999810]   ;;  %v1765_v30 = vld.sshfl [vmem:[#allocation0 + $0x90] sm:$0xff pattern:$0x98100000]  }
  0x25   :  { %1868 = vst.msk [vmem:[%s4093_s1 + $0x60] ss:$16 sm:$0x3] %vm142_vm1, %v155_v26   ;;  %1870 = vst.msk [vmem:[%s4093_s1 + $0xa0] ss:$16 sm:$0x3] %vm142_vm1, %v165_v28  }
  0x26   :  { %v170_v31 = vld [vmem:[#allocation0 + $0x30] sm:$0x3]   ;;  %v180_v33 = vld [vmem:[#allocation0 + $0x40] sm:$0x3]   ;;  %v185_v37 = vld [vmem:[#allocation0 + $0x48] sm:$0x3]  }
  0x27   :  { %419 = vrot.lane.b32.xlu0 %v2376_v32, %s2271_s0  ;;  %436 = vrot.lane.b32.xlu1 %v2379_v35, %s2271_s0  ;;  %v1782_v36 = vld.sshfl [vmem:[#allocation0 + $0xb0] sm:$0xff pattern:$0x98100000]   ;;  %1871 = vst.msk [vmem:[%s4093_s1 + $0xc0] ss:$16 sm:$0x3] %vm142_vm1, %v170_v31  }
  0x28   :  { %1873 = vst.msk [vmem:[%s4093_s1 + $0x100] ss:$16 sm:$0x3] %vm142_vm1, %v180_v33   ;;  %v190_v38 = vld [vmem:[#allocation0 + $0x50] sm:$0x3]  }
  0x29   :  { %v195_v39 = vld [vmem:[#allocation0 + $0x58] sm:$0x3]   ;;  %1874 = vst.msk [vmem:[%s4093_s1 + $0x120] ss:$16 sm:$0x3] %vm142_vm1, %v185_v37  }
  0x2a   :  { %1875 = vst.msk [vmem:[%s4093_s1 + $0x140] ss:$16 sm:$0x3] %vm142_vm1, %v190_v38   ;;  %1876 = vst.msk [vmem:[%s4093_s1 + $0x160] ss:$16 sm:$0x3] %vm142_vm1, %v195_v39  }
  0x2b   :  { %453 = vrot.lane.b32.xlu0 %v2387_v40, %s2271_s0  ;;  %470 = vrot.lane.b32.xlu1 %v2393_v42, %s2271_s0  ;;  %v205_v43 = vld [vmem:[#allocation0 + $0x68] sm:$0x3]   ;;  %v210_v44 = vld [vmem:[#allocation0 + $0x70] sm:$0x3]   ;;  %v215_v46 = vld [vmem:[#allocation0 + $0x78] sm:$0x3]  }
  0x2c   :  { %1878 = vst.msk [vmem:[%s4093_s1 + $0x1a0] ss:$16 sm:$0x3] %vm142_vm1, %v205_v43   ;;  %1879 = vst.msk [vmem:[%s4093_s1 + $0x1c0] ss:$16 sm:$0x3] %vm142_vm1, %v210_v44  }
  0x2d   :  { %v220_v47 = vld [vmem:[#allocation0 + $0x80] sm:$0x3]   ;;  %1880 = vst.msk [vmem:[%s4093_s1 + $0x1e0] ss:$16 sm:$0x3] %vm142_vm1, %v215_v46  }
  0x2e   :  { %1881 = vst.msk [vmem:[%s4093_s1 + $0x200] ss:$16 sm:$0x3] %vm142_vm1, %v220_v47  }
  0x2f   :  { %487 = vrot.lane.b32.xlu0 %v2398_v45, %s2271_s0  ;;  %504 = vrot.lane.b32.xlu1 %v2402_v48, %s2271_s0 }
  0x33   :  { %520 = vrot.lane.b32.xlu0 %v2369_v27, %s2272_s5  ;;  %537 = vrot.lane.b32.xlu1 %v2376_v32, %s2272_s5 }
  0x37   :  { %554 = vrot.lane.b32.xlu0 %v2379_v35, %s2272_s5  ;;  %571 = vrot.lane.b32.xlu1 %v2387_v40, %s2272_s5 }
  0x3b   :  { %588 = vrot.lane.b32.xlu0 %v2393_v42, %s2272_s5  ;;  %605 = vrot.lane.b32.xlu1 %v2398_v45, %s2272_s5 }
  0x3f   :  { %622 = vrot.lane.b32.xlu0 %v2402_v48, %s2272_s5  ;;  %638 = vrot.lane.b32.xlu1 %v2369_v27, %s2273_s6 }
  0x43   :  { %655 = vrot.lane.b32.xlu0 %v2376_v32, %s2273_s6  ;;  %672 = vrot.lane.b32.xlu1 %v2379_v35, %s2273_s6 }
  0x47   :  { %689 = vrot.lane.b32.xlu0 %v2387_v40, %s2273_s6  ;;  %706 = vrot.lane.b32.xlu1 %v2393_v42, %s2273_s6 }
  0x4b   :  { %723 = vrot.lane.b32.xlu0 %v2398_v45, %s2273_s6  ;;  %740 = vrot.lane.b32.xlu1 %v2402_v48, %s2273_s6 }
  0x4f   :  { %756 = vrot.lane.b32.xlu0 %v2369_v27, %s2274_s7  ;;  %773 = vrot.lane.b32.xlu1 %v2376_v32, %s2274_s7 }
  0x53   :  { %790 = vrot.lane.b32.xlu0 %v2379_v35, %s2274_s7  ;;  %807 = vrot.lane.b32.xlu1 %v2387_v40, %s2274_s7 }
  0x57   :  { %824 = vrot.lane.b32.xlu0 %v2393_v42, %s2274_s7  ;;  %841 = vrot.lane.b32.xlu1 %v2398_v45, %s2274_s7 }
  0x5b   :  { %858 = vrot.lane.b32.xlu0 %v2402_v48, %s2274_s7  ;;  %874 = vrot.lane.b32.xlu1 %v2369_v27, %s2275_s8 }
  0x5f   :  { %891 = vrot.lane.b32.xlu0 %v2376_v32, %s2275_s8  ;;  %908 = vrot.lane.b32.xlu1 %v2379_v35, %s2275_s8 }
  0x63   :  { %925 = vrot.lane.b32.xlu0 %v2387_v40, %s2275_s8  ;;  %942 = vrot.lane.b32.xlu1 %v2393_v42, %s2275_s8 }
  0x67   :  { %959 = vrot.lane.b32.xlu0 %v2398_v45, %s2275_s8  ;;  %976 = vrot.lane.b32.xlu1 %v2402_v48, %s2275_s8 }
  0x6b   :  { %992 = vrot.lane.b32.xlu0 %v2369_v27, %s2276_s9  ;;  %1009 = vrot.lane.b32.xlu1 %v2376_v32, %s2276_s9 }
  0x6f   :  { %1026 = vrot.lane.b32.xlu0 %v2379_v35, %s2276_s9  ;;  %1043 = vrot.lane.b32.xlu1 %v2387_v40, %s2276_s9 }
  0x73   :  { %1060 = vrot.lane.b32.xlu0 %v2393_v42, %s2276_s9  ;;  %1077 = vrot.lane.b32.xlu1 %v2398_v45, %s2276_s9 }
  0x77   :  { %1094 = vrot.lane.b32.xlu0 %v2402_v48, %s2276_s9  ;;  %1110 = vrot.lane.b32.xlu1 %v2369_v27, %s2277_s10 }
  0x7b   :  { %1127 = vrot.lane.b32.xlu0 %v2376_v32, %s2277_s10  ;;  %1144 = vrot.lane.b32.xlu1 %v2379_v35, %s2277_s10 }
  0x7f   :  { %1161 = vrot.lane.b32.xlu0 %v2387_v40, %s2277_s10  ;;  %1178 = vrot.lane.b32.xlu1 %v2393_v42, %s2277_s10 }
  0x83   :  { %1195 = vrot.lane.b32.xlu0 %v2398_v45, %s2277_s10  ;;  %1212 = vrot.lane.b32.xlu1 %v2402_v48, %s2277_s10 }
  0x85   :  { %v285_v49 = vpop.permute.xlu0 %284  }
  0x86   :  { %1893 = vst.msk [vmem:[%s4093_s1 + $0x1] ss:$16 sm:$0x3] %vm142_vm1, %v285_v49   ;;  %1894 = vst.msk [vmem:[%s4093_s1 + $0x1] ss:$16 sm:$0xc] %vm142_vm1, %v285_v49  }
  0x87   :  { %1228 = vrot.lane.b32.xlu0 %v2369_v27, %s2278_s11  ;;  %1895 = vst.msk [vmem:[%s4093_s1 + $0x1] ss:$16 sm:$0x30] %vm142_vm1, %v285_v49   ;;  %1896 = vst.msk [vmem:[%s4093_s1 + $0x1] ss:$16 sm:$0xc0] %vm142_vm1, %v285_v49   ;;  %1245 = vrot.lane.b32.xlu1 %v2376_v32, %s2278_s11 }
  0x88   :  { %v1797_v49 = vld.sshfl [vmem:[#allocation0 + $0xc0] sm:$0xff pattern:$0x99999810]  }
  0x89   :  { %v319_v50 = vpop.permute.xlu1 %318   ;;  %v302_v51 = vpop.permute.xlu0 %301  }
  0x8a   :  { %1901 = vst.msk [vmem:[%s4093_s1 + $0x101] ss:$16 sm:$0x3] %vm142_vm1, %v319_v50   ;;  %1902 = vst.msk [vmem:[%s4093_s1 + $0x101] ss:$16 sm:$0xc] %vm142_vm1, %v319_v50  }
  0x8b   :  { %1262 = vrot.lane.b32.xlu0 %v2379_v35, %s2278_s11  ;;  %1903 = vst.msk [vmem:[%s4093_s1 + $0x101] ss:$16 sm:$0x30] %vm142_vm1, %v319_v50   ;;  %1904 = vst.msk [vmem:[%s4093_s1 + $0x101] ss:$16 sm:$0xc0] %vm142_vm1, %v319_v50   ;;  %1279 = vrot.lane.b32.xlu1 %v2387_v40, %s2278_s11 }
  0x8c   :  { %1897 = vst.msk [vmem:[%s4093_s1 + $0x81] ss:$16 sm:$0x3] %vm142_vm1, %v302_v51   ;;  %1898 = vst.msk [vmem:[%s4093_s1 + $0x81] ss:$16 sm:$0xc] %vm142_vm1, %v302_v51  }
  0x8d   :  { %1899 = vst.msk [vmem:[%s4093_s1 + $0x81] ss:$16 sm:$0x30] %vm142_vm1, %v302_v51   ;;  %1900 = vst.msk [vmem:[%s4093_s1 + $0x81] ss:$16 sm:$0xc0] %vm142_vm1, %v302_v51   ;;  %v336_v52 = vpop.permute.xlu1 %335   ;;  %v353_v53 = vpop.permute.xlu0 %352  }
  0x8e   :  { %1905 = vst.msk [vmem:[%s4093_s1 + $0x181] ss:$16 sm:$0x3] %vm142_vm1, %v336_v52   ;;  %1906 = vst.msk [vmem:[%s4093_s1 + $0x181] ss:$16 sm:$0xc] %vm142_vm1, %v336_v52  }
  0x8f   :  { %1296 = vrot.lane.b32.xlu0 %v2393_v42, %s2278_s11  ;;  %1907 = vst.msk [vmem:[%s4093_s1 + $0x181] ss:$16 sm:$0x30] %vm142_vm1, %v336_v52   ;;  %1908 = vst.msk [vmem:[%s4093_s1 + $0x181] ss:$16 sm:$0xc0] %vm142_vm1, %v336_v52   ;;  %1313 = vrot.lane.b32.xlu1 %v2398_v45, %s2278_s11 }
  0x90   :  { %1909 = vst.msk [vmem:[%s4093_s1 + $0x201] ss:$16 sm:$0x3] %vm142_vm1, %v353_v53   ;;  %1910 = vst.msk [vmem:[%s4093_s1 + $0x201] ss:$16 sm:$0xc] %vm142_vm1, %v353_v53  }
  0x91   :  { %1911 = vst.msk [vmem:[%s4093_s1 + $0x201] ss:$16 sm:$0x30] %vm142_vm1, %v353_v53   ;;  %1912 = vst.msk [vmem:[%s4093_s1 + $0x201] ss:$16 sm:$0xc0] %vm142_vm1, %v353_v53   ;;  %v370_v54 = vpop.permute.xlu1 %369  }
  0x92   :  { %1913 = vst.msk [vmem:[%s4093_s1 + $0x281] ss:$16 sm:$0x3] %vm142_vm1, %v370_v54   ;;  %1914 = vst.msk [vmem:[%s4093_s1 + $0x281] ss:$16 sm:$0xc] %vm142_vm1, %v370_v54  }
  0x93   :  { %1330 = vrot.lane.b32.xlu0 %v2402_v48, %s2278_s11  ;;  %1915 = vst.msk [vmem:[%s4093_s1 + $0x281] ss:$16 sm:$0x30] %vm142_vm1, %v370_v54   ;;  %1916 = vst.msk [vmem:[%s4093_s1 + $0x281] ss:$16 sm:$0xc0] %vm142_vm1, %v370_v54   ;;  %1346 = vrot.lane.b32.xlu1 %v2369_v27, %s2279_s30  ;;  %v1767_v54 = vsel %vm282_vm0, %v1765_v30, %v1763_v29 }
  0x94   :  { %v1799_v50 = vld.sshfl [vmem:[#allocation0 + $0xd0] sm:$0xff pattern:$0x98100000]   ;;  %v240_v53 = vld [vmem:[#allocation0 + $0xa0] sm:$0x3]  }
  0x95   :  { %v387_v55 = vpop.permute.xlu0 %386   ;;  %v403_v56 = vpop.permute.xlu1 %402   ;;  %v230_v51 = vld [vmem:[#allocation0 + $0x90] sm:$0x3]   ;;  %v235_v52 = vld [vmem:[#allocation0 + $0x98] sm:$0x3]  }
  0x96   :  { %1917 = vst.msk [vmem:[%s4093_s1 + $0x301] ss:$16 sm:$0x3] %vm142_vm1, %v387_v55   ;;  %1918 = vst.msk [vmem:[%s4093_s1 + $0x301] ss:$16 sm:$0xc] %vm142_vm1, %v387_v55  }
  0x97   :  { %1919 = vst.msk [vmem:[%s4093_s1 + $0x301] ss:$16 sm:$0x30] %vm142_vm1, %v387_v55   ;;  %1920 = vst.msk [vmem:[%s4093_s1 + $0x301] ss:$16 sm:$0xc0] %vm142_vm1, %v387_v55   ;;  %1363 = vrot.lane.b32.xlu0 %v2376_v32, %s2279_s30  ;;  %1380 = vrot.lane.b32.xlu1 %v2379_v35, %s2279_s30 }
  0x98   :  { %1921 = vst.msk [vmem:[%s4093_s1 + $0x2] ss:$16 sm:$0x3] %vm142_vm1, %v403_v56   ;;  %1922 = vst.msk [vmem:[%s4093_s1 + $0x2] ss:$16 sm:$0xc] %vm142_vm1, %v403_v56  }
  0x99   :  { %1923 = vst.msk [vmem:[%s4093_s1 + $0x2] ss:$16 sm:$0x30] %vm142_vm1, %v403_v56   ;;  %1924 = vst.msk [vmem:[%s4093_s1 + $0x2] ss:$16 sm:$0xc0] %vm142_vm1, %v403_v56   ;;  %v420_v57 = vpop.permute.xlu0 %419   ;;  %v437_v58 = vpop.permute.xlu1 %436  }
  0x9a   :  { %1925 = vst.msk [vmem:[%s4093_s1 + $0x82] ss:$16 sm:$0x3] %vm142_vm1, %v420_v57   ;;  %1926 = vst.msk [vmem:[%s4093_s1 + $0x82] ss:$16 sm:$0xc] %vm142_vm1, %v420_v57  }
  0x9b   :  { %1927 = vst.msk [vmem:[%s4093_s1 + $0x82] ss:$16 sm:$0x30] %vm142_vm1, %v420_v57   ;;  %1928 = vst.msk [vmem:[%s4093_s1 + $0x82] ss:$16 sm:$0xc0] %vm142_vm1, %v420_v57   ;;  %1397 = vrot.lane.b32.xlu0 %v2387_v40, %s2279_s30  ;;  %1414 = vrot.lane.b32.xlu1 %v2393_v42, %s2279_s30 }
  0x9c   :  { %1929 = vst.msk [vmem:[%s4093_s1 + $0x102] ss:$16 sm:$0x3] %vm142_vm1, %v437_v58   ;;  %1930 = vst.msk [vmem:[%s4093_s1 + $0x102] ss:$16 sm:$0xc] %vm142_vm1, %v437_v58  }
  0x9d   :  { %1931 = vst.msk [vmem:[%s4093_s1 + $0x102] ss:$16 sm:$0x30] %vm142_vm1, %v437_v58   ;;  %1932 = vst.msk [vmem:[%s4093_s1 + $0x102] ss:$16 sm:$0xc0] %vm142_vm1, %v437_v58   ;;  %v454_v59 = vpop.permute.xlu0 %453   ;;  %v471_v60 = vpop.permute.xlu1 %470  }
  0x9e   :  { %1933 = vst.msk [vmem:[%s4093_s1 + $0x182] ss:$16 sm:$0x3] %vm142_vm1, %v454_v59   ;;  %1934 = vst.msk [vmem:[%s4093_s1 + $0x182] ss:$16 sm:$0xc] %vm142_vm1, %v454_v59  }
  0x9f   :  { %1935 = vst.msk [vmem:[%s4093_s1 + $0x182] ss:$16 sm:$0x30] %vm142_vm1, %v454_v59   ;;  %1936 = vst.msk [vmem:[%s4093_s1 + $0x182] ss:$16 sm:$0xc0] %vm142_vm1, %v454_v59   ;;  %1431 = vrot.lane.b32.xlu0 %v2398_v45, %s2279_s30  ;;  %1448 = vrot.lane.b32.xlu1 %v2402_v48, %s2279_s30 }
  0xa0   :  { %1937 = vst.msk [vmem:[%s4093_s1 + $0x202] ss:$16 sm:$0x3] %vm142_vm1, %v471_v60   ;;  %1938 = vst.msk [vmem:[%s4093_s1 + $0x202] ss:$16 sm:$0xc] %vm142_vm1, %v471_v60  }
  0xa1   :  { %1939 = vst.msk [vmem:[%s4093_s1 + $0x202] ss:$16 sm:$0x30] %vm142_vm1, %v471_v60   ;;  %1940 = vst.msk [vmem:[%s4093_s1 + $0x202] ss:$16 sm:$0xc0] %vm142_vm1, %v471_v60   ;;  %v488_v61 = vpop.permute.xlu0 %487   ;;  %v505_v62 = vpop.permute.xlu1 %504  }
  0xa2   :  { %1941 = vst.msk [vmem:[%s4093_s1 + $0x282] ss:$16 sm:$0x3] %vm142_vm1, %v488_v61   ;;  %1942 = vst.msk [vmem:[%s4093_s1 + $0x282] ss:$16 sm:$0xc] %vm142_vm1, %v488_v61  }
  0xa3   :  { %1943 = vst.msk [vmem:[%s4093_s1 + $0x282] ss:$16 sm:$0x30] %vm142_vm1, %v488_v61   ;;  %1944 = vst.msk [vmem:[%s4093_s1 + $0x282] ss:$16 sm:$0xc0] %vm142_vm1, %v488_v61   ;;  %1464 = vrot.lane.b32.xlu0 %v2369_v27, %s2280_s27  ;;  %1481 = vrot.lane.b32.xlu1 %v2376_v32, %s2280_s27 }
  0xa4   :  { %1945 = vst.msk [vmem:[%s4093_s1 + $0x302] ss:$16 sm:$0x3] %vm142_vm1, %v505_v62   ;;  %1946 = vst.msk [vmem:[%s4093_s1 + $0x302] ss:$16 sm:$0xc] %vm142_vm1, %v505_v62  }
  0xa5   :  { %1947 = vst.msk [vmem:[%s4093_s1 + $0x302] ss:$16 sm:$0x30] %vm142_vm1, %v505_v62   ;;  %1948 = vst.msk [vmem:[%s4093_s1 + $0x302] ss:$16 sm:$0xc0] %vm142_vm1, %v505_v62   ;;  %v521_v63 = vpop.permute.xlu0 %520   ;;  %v538_v0 = vpop.permute.xlu1 %537  }
  0xa6   :  { %1949 = vst.msk [vmem:[%s4093_s1 + $0x3] ss:$16 sm:$0x3] %vm142_vm1, %v521_v63   ;;  %1950 = vst.msk [vmem:[%s4093_s1 + $0x3] ss:$16 sm:$0xc] %vm142_vm1, %v521_v63  }
  0xa7   :  { %1951 = vst.msk [vmem:[%s4093_s1 + $0x3] ss:$16 sm:$0x30] %vm142_vm1, %v521_v63   ;;  %1952 = vst.msk [vmem:[%s4093_s1 + $0x3] ss:$16 sm:$0xc0] %vm142_vm1, %v521_v63   ;;  %1498 = vrot.lane.b32.xlu0 %v2379_v35, %s2280_s27  ;;  %1515 = vrot.lane.b32.xlu1 %v2387_v40, %s2280_s27 }
  0xa8   :  { %1953 = vst.msk [vmem:[%s4093_s1 + $0x83] ss:$16 sm:$0x3] %vm142_vm1, %v538_v0   ;;  %1954 = vst.msk [vmem:[%s4093_s1 + $0x83] ss:$16 sm:$0xc] %vm142_vm1, %v538_v0  }
  0xa9   :  { %1955 = vst.msk [vmem:[%s4093_s1 + $0x83] ss:$16 sm:$0x30] %vm142_vm1, %v538_v0   ;;  %1956 = vst.msk [vmem:[%s4093_s1 + $0x83] ss:$16 sm:$0xc0] %vm142_vm1, %v538_v0   ;;  %v555_v1 = vpop.permute.xlu0 %554   ;;  %v572_v2 = vpop.permute.xlu1 %571  }
  0xaa   :  { %1957 = vst.msk [vmem:[%s4093_s1 + $0x103] ss:$16 sm:$0x3] %vm142_vm1, %v555_v1   ;;  %1958 = vst.msk [vmem:[%s4093_s1 + $0x103] ss:$16 sm:$0xc] %vm142_vm1, %v555_v1  }
  0xab   :  { %1959 = vst.msk [vmem:[%s4093_s1 + $0x103] ss:$16 sm:$0x30] %vm142_vm1, %v555_v1   ;;  %1960 = vst.msk [vmem:[%s4093_s1 + $0x103] ss:$16 sm:$0xc0] %vm142_vm1, %v555_v1   ;;  %1532 = vrot.lane.b32.xlu0 %v2393_v42, %s2280_s27  ;;  %1549 = vrot.lane.b32.xlu1 %v2398_v45, %s2280_s27  ;;  %v1801_v1 = vsel %vm282_vm0, %v1799_v50, %v1797_v49 }
  0xac   :  { %1961 = vst.msk [vmem:[%s4093_s1 + $0x183] ss:$16 sm:$0x3] %vm142_vm1, %v572_v2   ;;  %1962 = vst.msk [vmem:[%s4093_s1 + $0x183] ss:$16 sm:$0xc] %vm142_vm1, %v572_v2  }
  0xad   :  { %1963 = vst.msk [vmem:[%s4093_s1 + $0x183] ss:$16 sm:$0x30] %vm142_vm1, %v572_v2   ;;  %1964 = vst.msk [vmem:[%s4093_s1 + $0x183] ss:$16 sm:$0xc0] %vm142_vm1, %v572_v2   ;;  %v589_v3 = vpop.permute.xlu0 %588   ;;  %v606_v4 = vpop.permute.xlu1 %605  }
  0xae   :  { %1965 = vst.msk [vmem:[%s4093_s1 + $0x203] ss:$16 sm:$0x3] %vm142_vm1, %v589_v3   ;;  %1966 = vst.msk [vmem:[%s4093_s1 + $0x203] ss:$16 sm:$0xc] %vm142_vm1, %v589_v3  }
  0xaf   :  { %1967 = vst.msk [vmem:[%s4093_s1 + $0x203] ss:$16 sm:$0x30] %vm142_vm1, %v589_v3   ;;  %1968 = vst.msk [vmem:[%s4093_s1 + $0x203] ss:$16 sm:$0xc0] %vm142_vm1, %v589_v3   ;;  %1566 = vrot.lane.b32.xlu0 %v2402_v48, %s2280_s27  ;;  %1582 = vrot.lane.b32.xlu1 %v2369_v27, %s2281_s24 }
  0xb0   :  { %1969 = vst.msk [vmem:[%s4093_s1 + $0x283] ss:$16 sm:$0x3] %vm142_vm1, %v606_v4   ;;  %1970 = vst.msk [vmem:[%s4093_s1 + $0x283] ss:$16 sm:$0xc] %vm142_vm1, %v606_v4  }
  0xb1   :  { %1971 = vst.msk [vmem:[%s4093_s1 + $0x283] ss:$16 sm:$0x30] %vm142_vm1, %v606_v4   ;;  %1972 = vst.msk [vmem:[%s4093_s1 + $0x283] ss:$16 sm:$0xc0] %vm142_vm1, %v606_v4   ;;  %v623_v5 = vpop.permute.xlu0 %622   ;;  %v639_v6 = vpop.permute.xlu1 %638  }
  0xb2   :  { %1973 = vst.msk [vmem:[%s4093_s1 + $0x303] ss:$16 sm:$0x3] %vm142_vm1, %v623_v5   ;;  %1974 = vst.msk [vmem:[%s4093_s1 + $0x303] ss:$16 sm:$0xc] %vm142_vm1, %v623_v5  }
  0xb3   :  { %1975 = vst.msk [vmem:[%s4093_s1 + $0x303] ss:$16 sm:$0x30] %vm142_vm1, %v623_v5   ;;  %1976 = vst.msk [vmem:[%s4093_s1 + $0x303] ss:$16 sm:$0xc0] %vm142_vm1, %v623_v5   ;;  %1599 = vrot.lane.b32.xlu0 %v2376_v32, %s2281_s24  ;;  %1616 = vrot.lane.b32.xlu1 %v2379_v35, %s2281_s24 }
  0xb4   :  { %1977 = vst.msk [vmem:[%s4093_s1 + $0x4] ss:$16 sm:$0x3] %vm142_vm1, %v639_v6   ;;  %1978 = vst.msk [vmem:[%s4093_s1 + $0x4] ss:$16 sm:$0xc] %vm142_vm1, %v639_v6  }
  0xb5   :  { %1979 = vst.msk [vmem:[%s4093_s1 + $0x4] ss:$16 sm:$0x30] %vm142_vm1, %v639_v6   ;;  %1980 = vst.msk [vmem:[%s4093_s1 + $0x4] ss:$16 sm:$0xc0] %vm142_vm1, %v639_v6   ;;  %v656_v7 = vpop.permute.xlu0 %655   ;;  %v673_v8 = vpop.permute.xlu1 %672  }
  0xb6   :  { %1981 = vst.msk [vmem:[%s4093_s1 + $0x84] ss:$16 sm:$0x3] %vm142_vm1, %v656_v7   ;;  %1982 = vst.msk [vmem:[%s4093_s1 + $0x84] ss:$16 sm:$0xc] %vm142_vm1, %v656_v7  }
  0xb7   :  { %1983 = vst.msk [vmem:[%s4093_s1 + $0x84] ss:$16 sm:$0x30] %vm142_vm1, %v656_v7   ;;  %1984 = vst.msk [vmem:[%s4093_s1 + $0x84] ss:$16 sm:$0xc0] %vm142_vm1, %v656_v7   ;;  %1633 = vrot.lane.b32.xlu0 %v2387_v40, %s2281_s24  ;;  %1650 = vrot.lane.b32.xlu1 %v2393_v42, %s2281_s24 }
  0xb8   :  { %1985 = vst.msk [vmem:[%s4093_s1 + $0x104] ss:$16 sm:$0x3] %vm142_vm1, %v673_v8   ;;  %1986 = vst.msk [vmem:[%s4093_s1 + $0x104] ss:$16 sm:$0xc] %vm142_vm1, %v673_v8  }
  0xb9   :  { %1987 = vst.msk [vmem:[%s4093_s1 + $0x104] ss:$16 sm:$0x30] %vm142_vm1, %v673_v8   ;;  %1988 = vst.msk [vmem:[%s4093_s1 + $0x104] ss:$16 sm:$0xc0] %vm142_vm1, %v673_v8   ;;  %v690_v10 = vpop.permute.xlu0 %689   ;;  %v707_v12 = vpop.permute.xlu1 %706  }
  0xba   :  { %1989 = vst.msk [vmem:[%s4093_s1 + $0x184] ss:$16 sm:$0x3] %vm142_vm1, %v690_v10   ;;  %1990 = vst.msk [vmem:[%s4093_s1 + $0x184] ss:$16 sm:$0xc] %vm142_vm1, %v690_v10  }
  0xbb   :  { %1991 = vst.msk [vmem:[%s4093_s1 + $0x184] ss:$16 sm:$0x30] %vm142_vm1, %v690_v10   ;;  %1992 = vst.msk [vmem:[%s4093_s1 + $0x184] ss:$16 sm:$0xc0] %vm142_vm1, %v690_v10   ;;  %1667 = vrot.lane.b32.xlu0 %v2398_v45, %s2281_s24  ;;  %1684 = vrot.lane.b32.xlu1 %v2402_v48, %s2281_s24 }
  0xbc   :  { %1993 = vst.msk [vmem:[%s4093_s1 + $0x204] ss:$16 sm:$0x3] %vm142_vm1, %v707_v12   ;;  %1994 = vst.msk [vmem:[%s4093_s1 + $0x204] ss:$16 sm:$0xc] %vm142_vm1, %v707_v12  }
  0xbd   :  { %1995 = vst.msk [vmem:[%s4093_s1 + $0x204] ss:$16 sm:$0x30] %vm142_vm1, %v707_v12   ;;  %1996 = vst.msk [vmem:[%s4093_s1 + $0x204] ss:$16 sm:$0xc0] %vm142_vm1, %v707_v12   ;;  %v724_v20 = vpop.permute.xlu0 %723   ;;  %v741_v25 = vpop.permute.xlu1 %740  }
  0xbe   :  { %1997 = vst.msk [vmem:[%s4093_s1 + $0x284] ss:$16 sm:$0x3] %vm142_vm1, %v724_v20   ;;  %1998 = vst.msk [vmem:[%s4093_s1 + $0x284] ss:$16 sm:$0xc] %vm142_vm1, %v724_v20  }
  0xbf   :  { %1999 = vst.msk [vmem:[%s4093_s1 + $0x284] ss:$16 sm:$0x30] %vm142_vm1, %v724_v20   ;;  %2000 = vst.msk [vmem:[%s4093_s1 + $0x284] ss:$16 sm:$0xc0] %vm142_vm1, %v724_v20   ;;  %1700 = vrot.lane.b32.xlu0 %v1699_v17, %s2282_s29  ;;  %1717 = vrot.lane.b32.xlu1 %v1716_v21, %s2282_s29 }
  0xc0   :  { %v160_v27 = vld [vmem:[#allocation0 + $0x20] sm:$0x3]   ;;  %2001 = vst.msk [vmem:[%s4093_s1 + $0x304] ss:$16 sm:$0x3] %vm142_vm1, %v741_v25  }
  0xc1   :  { %2002 = vst.msk [vmem:[%s4093_s1 + $0x304] ss:$16 sm:$0xc] %vm142_vm1, %v741_v25   ;;  %2003 = vst.msk [vmem:[%s4093_s1 + $0x304] ss:$16 sm:$0x30] %vm142_vm1, %v741_v25   ;;  %v757_v40 = vpop.permute.xlu0 %756   ;;  %v774_v45 = vpop.permute.xlu1 %773  }
  0xc2   :  { %2004 = vst.msk [vmem:[%s4093_s1 + $0x304] ss:$16 sm:$0xc0] %vm142_vm1, %v741_v25   ;;  %1869 = vst.msk [vmem:[%s4093_s1 + $0x80] ss:$16 sm:$0x3] %vm142_vm1, %v160_v27  }
  0xc3   :  { %v175_v32 = vld [vmem:[#allocation0 + $0x38] sm:$0x3]   ;;  %v1780_v35 = vld.sshfl [vmem:[#allocation0 + $0xa0] sm:$0xff pattern:$0x99999810]   ;;  %1734 = vrot.lane.b32.xlu0 %v1733_v34, %s2282_s29  ;;  %1751 = vrot.lane.b32.xlu1 %v1750_v41, %s2282_s29 }
  0xc4   :  { %1872 = vst.msk [vmem:[%s4093_s1 + $0xe0] ss:$16 sm:$0x3] %vm142_vm1, %v175_v32   ;;  %v200_v42 = vld [vmem:[#allocation0 + $0x60] sm:$0x3]   ;;  %v1784_v59 = vsel %vm282_vm0, %v1782_v36, %v1780_v35 }
  0xc5   :  { %2005 = vst.msk [vmem:[%s4093_s1 + $0x5] ss:$16 sm:$0x3] %vm142_vm1, %v757_v40   ;;  %2006 = vst.msk [vmem:[%s4093_s1 + $0x5] ss:$16 sm:$0xc] %vm142_vm1, %v757_v40   ;;  %v791_v58 = vpop.permute.xlu0 %790   ;;  %v808_v63 = vpop.permute.xlu1 %807  }
  0xc6   :  { %2007 = vst.msk [vmem:[%s4093_s1 + $0x5] ss:$16 sm:$0x30] %vm142_vm1, %v757_v40   ;;  %2008 = vst.msk [vmem:[%s4093_s1 + $0x5] ss:$16 sm:$0xc0] %vm142_vm1, %v757_v40  }
  0xc7   :  { %1877 = vst.msk [vmem:[%s4093_s1 + $0x180] ss:$16 sm:$0x3] %vm142_vm1, %v200_v42   ;;  %v225_v48 = vld [vmem:[#allocation0 + $0x88] sm:$0x3]   ;;  %1768 = vrot.lane.b32.xlu0 %v1767_v54, %s2282_s29  ;;  %1785 = vrot.lane.b32.xlu1 %v1784_v59, %s2282_s29 }
  0xc8   :  { %2009 = vst.msk [vmem:[%s4093_s1 + $0x85] ss:$16 sm:$0x3] %vm142_vm1, %v774_v45   ;;  %2010 = vst.msk [vmem:[%s4093_s1 + $0x85] ss:$16 sm:$0xc] %vm142_vm1, %v774_v45  }
  0xc9   :  { %2011 = vst.msk [vmem:[%s4093_s1 + $0x85] ss:$16 sm:$0x30] %vm142_vm1, %v774_v45   ;;  %2012 = vst.msk [vmem:[%s4093_s1 + $0x85] ss:$16 sm:$0xc0] %vm142_vm1, %v774_v45   ;;  %v825_v2 = vpop.permute.xlu0 %824   ;;  %v842_v3 = vpop.permute.xlu1 %841  }
  0xca   :  { %1882 = vst.msk [vmem:[%s4093_s1 + $0x220] ss:$16 sm:$0x3] %vm142_vm1, %v225_v48   ;;  %1883 = vst.msk [vmem:[%s4093_s1 + $0x240] ss:$16 sm:$0x3] %vm142_vm1, %v230_v51  }
  0xcb   :  { %1884 = vst.msk [vmem:[%s4093_s1 + $0x260] ss:$16 sm:$0x3] %vm142_vm1, %v235_v52   ;;  %1885 = vst.msk [vmem:[%s4093_s1 + $0x280] ss:$16 sm:$0x3] %vm142_vm1, %v240_v53   ;;  %1802 = vrot.lane.b32.xlu0 %v1801_v1, %s2282_s29 }
  0xcc   :  { %v245_v55 = vld [vmem:[#allocation0 + $0xa8] sm:$0x3]   ;;  %v250_v56 = vld [vmem:[#allocation0 + $0xb0] sm:$0x3]   ;;  %v255_v57 = vld [vmem:[#allocation0 + $0xb8] sm:$0x3]  }
  0xcd   :  { %1886 = vst.msk [vmem:[%s4093_s1 + $0x2a0] ss:$16 sm:$0x3] %vm142_vm1, %v245_v55   ;;  %1887 = vst.msk [vmem:[%s4093_s1 + $0x2c0] ss:$16 sm:$0x3] %vm142_vm1, %v250_v56   ;;  %v859_v4 = vpop.permute.xlu0 %858   ;;  %v875_v5 = vpop.permute.xlu1 %874  }
  0xce   :  { %1888 = vst.msk [vmem:[%s4093_s1 + $0x2e0] ss:$16 sm:$0x3] %vm142_vm1, %v255_v57   ;;  %v260_v60 = vld [vmem:[#allocation0 + $0xc0] sm:$0x3]  }
  0xcf   :  { %v265_v61 = vld [vmem:[#allocation0 + $0xc8] sm:$0x3]   ;;  %v270_v62 = vld [vmem:[#allocation0 + $0xd0] sm:$0x3]   ;;  %v275_v0 = vld [vmem:[#allocation0 + $0xd8] sm:$0x3]  }
  0xd0   :  { %2013 = vst.msk [vmem:[%s4093_s1 + $0x105] ss:$16 sm:$0x3] %vm142_vm1, %v791_v58   ;;  %2014 = vst.msk [vmem:[%s4093_s1 + $0x105] ss:$16 sm:$0xc] %vm142_vm1, %v791_v58  }
  0xd1   :  { %2015 = vst.msk [vmem:[%s4093_s1 + $0x105] ss:$16 sm:$0x30] %vm142_vm1, %v791_v58   ;;  %2016 = vst.msk [vmem:[%s4093_s1 + $0x105] ss:$16 sm:$0xc0] %vm142_vm1, %v791_v58   ;;  %v892_v6 = vpop.permute.xlu0 %891   ;;  %v909_v7 = vpop.permute.xlu1 %908  }
  0xd2   :  { %1889 = vst.msk [vmem:[%s4093_s1 + $0x300] ss:$16 sm:$0x3] %vm142_vm1, %v260_v60   ;;  %1890 = vst.msk [vmem:[%s4093_s1 + $0x320] ss:$16 sm:$0x3] %vm142_vm1, %v265_v61  }
  0xd3   :  { %1891 = vst.msk [vmem:[%s4093_s1 + $0x340] ss:$16 sm:$0x3] %vm142_vm1, %v270_v62   ;;  %2017 = vst.msk [vmem:[%s4093_s1 + $0x185] ss:$16 sm:$0x3] %vm142_vm1, %v808_v63  }
  0xd4   :  { %2018 = vst.msk [vmem:[%s4093_s1 + $0x185] ss:$16 sm:$0xc] %vm142_vm1, %v808_v63   ;;  %2019 = vst.msk [vmem:[%s4093_s1 + $0x185] ss:$16 sm:$0x30] %vm142_vm1, %v808_v63  }
  0xd5   :  { %2020 = vst.msk [vmem:[%s4093_s1 + $0x185] ss:$16 sm:$0xc0] %vm142_vm1, %v808_v63   ;;  %1892 = vst.msk [vmem:[%s4093_s1 + $0x360] ss:$16 sm:$0x3] %vm142_vm1, %v275_v0   ;;  %v926_v8 = vpop.permute.xlu0 %925   ;;  %v943_v9 = vpop.permute.xlu1 %942  }
  0xd6   :  { %2021 = vst.msk [vmem:[%s4093_s1 + $0x205] ss:$16 sm:$0x3] %vm142_vm1, %v825_v2   ;;  %2022 = vst.msk [vmem:[%s4093_s1 + $0x205] ss:$16 sm:$0xc] %vm142_vm1, %v825_v2  }
  0xd7   :  { %2023 = vst.msk [vmem:[%s4093_s1 + $0x205] ss:$16 sm:$0x30] %vm142_vm1, %v825_v2   ;;  %2024 = vst.msk [vmem:[%s4093_s1 + $0x205] ss:$16 sm:$0xc0] %vm142_vm1, %v825_v2  }
  0xd8   :  { %2025 = vst.msk [vmem:[%s4093_s1 + $0x285] ss:$16 sm:$0x3] %vm142_vm1, %v842_v3   ;;  %2026 = vst.msk [vmem:[%s4093_s1 + $0x285] ss:$16 sm:$0xc] %vm142_vm1, %v842_v3  }
  0xd9   :  { %2027 = vst.msk [vmem:[%s4093_s1 + $0x285] ss:$16 sm:$0x30] %vm142_vm1, %v842_v3   ;;  %2028 = vst.msk [vmem:[%s4093_s1 + $0x285] ss:$16 sm:$0xc0] %vm142_vm1, %v842_v3   ;;  %v960_v10 = vpop.permute.xlu0 %959   ;;  %v977_v11 = vpop.permute.xlu1 %976  }
  0xda   :  { %2029 = vst.msk [vmem:[%s4093_s1 + $0x305] ss:$16 sm:$0x3] %vm142_vm1, %v859_v4   ;;  %2030 = vst.msk [vmem:[%s4093_s1 + $0x305] ss:$16 sm:$0xc] %vm142_vm1, %v859_v4  }
  0xdb   :  { %2031 = vst.msk [vmem:[%s4093_s1 + $0x305] ss:$16 sm:$0x30] %vm142_vm1, %v859_v4   ;;  %2032 = vst.msk [vmem:[%s4093_s1 + $0x305] ss:$16 sm:$0xc0] %vm142_vm1, %v859_v4  }
  0xdc   :  { %2033 = vst.msk [vmem:[%s4093_s1 + $0x6] ss:$16 sm:$0x3] %vm142_vm1, %v875_v5   ;;  %2034 = vst.msk [vmem:[%s4093_s1 + $0x6] ss:$16 sm:$0xc] %vm142_vm1, %v875_v5  }
  0xdd   :  { %2035 = vst.msk [vmem:[%s4093_s1 + $0x6] ss:$16 sm:$0x30] %vm142_vm1, %v875_v5   ;;  %2036 = vst.msk [vmem:[%s4093_s1 + $0x6] ss:$16 sm:$0xc0] %vm142_vm1, %v875_v5   ;;  %v993_v12 = vpop.permute.xlu0 %992   ;;  %v1010_v13 = vpop.permute.xlu1 %1009  }
  0xde   :  { %2037 = vst.msk [vmem:[%s4093_s1 + $0x86] ss:$16 sm:$0x3] %vm142_vm1, %v892_v6   ;;  %2038 = vst.msk [vmem:[%s4093_s1 + $0x86] ss:$16 sm:$0xc] %vm142_vm1, %v892_v6  }
  0xdf   :  { %2039 = vst.msk [vmem:[%s4093_s1 + $0x86] ss:$16 sm:$0x30] %vm142_vm1, %v892_v6   ;;  %2040 = vst.msk [vmem:[%s4093_s1 + $0x86] ss:$16 sm:$0xc0] %vm142_vm1, %v892_v6  }
  0xe0   :  { %2041 = vst.msk [vmem:[%s4093_s1 + $0x106] ss:$16 sm:$0x3] %vm142_vm1, %v909_v7   ;;  %2042 = vst.msk [vmem:[%s4093_s1 + $0x106] ss:$16 sm:$0xc] %vm142_vm1, %v909_v7  }
  0xe1   :  { %2043 = vst.msk [vmem:[%s4093_s1 + $0x106] ss:$16 sm:$0x30] %vm142_vm1, %v909_v7   ;;  %2044 = vst.msk [vmem:[%s4093_s1 + $0x106] ss:$16 sm:$0xc0] %vm142_vm1, %v909_v7   ;;  %v1027_v14 = vpop.permute.xlu0 %1026   ;;  %v1044_v15 = vpop.permute.xlu1 %1043  }
  0xe2   :  { %2045 = vst.msk [vmem:[%s4093_s1 + $0x186] ss:$16 sm:$0x3] %vm142_vm1, %v926_v8   ;;  %2046 = vst.msk [vmem:[%s4093_s1 + $0x186] ss:$16 sm:$0xc] %vm142_vm1, %v926_v8  }
  0xe3   :  { %2047 = vst.msk [vmem:[%s4093_s1 + $0x186] ss:$16 sm:$0x30] %vm142_vm1, %v926_v8   ;;  %2048 = vst.msk [vmem:[%s4093_s1 + $0x186] ss:$16 sm:$0xc0] %vm142_vm1, %v926_v8  }
  0xe4   :  { %2049 = vst.msk [vmem:[%s4093_s1 + $0x206] ss:$16 sm:$0x3] %vm142_vm1, %v943_v9   ;;  %2050 = vst.msk [vmem:[%s4093_s1 + $0x206] ss:$16 sm:$0xc] %vm142_vm1, %v943_v9  }
  0xe5   :  { %2051 = vst.msk [vmem:[%s4093_s1 + $0x206] ss:$16 sm:$0x30] %vm142_vm1, %v943_v9   ;;  %2052 = vst.msk [vmem:[%s4093_s1 + $0x206] ss:$16 sm:$0xc0] %vm142_vm1, %v943_v9   ;;  %v1061_v16 = vpop.permute.xlu0 %1060   ;;  %v1078_v17 = vpop.permute.xlu1 %1077  }
  0xe6   :  { %2053 = vst.msk [vmem:[%s4093_s1 + $0x286] ss:$16 sm:$0x3] %vm142_vm1, %v960_v10   ;;  %2054 = vst.msk [vmem:[%s4093_s1 + $0x286] ss:$16 sm:$0xc] %vm142_vm1, %v960_v10  }
  0xe7   :  { %2055 = vst.msk [vmem:[%s4093_s1 + $0x286] ss:$16 sm:$0x30] %vm142_vm1, %v960_v10   ;;  %2056 = vst.msk [vmem:[%s4093_s1 + $0x286] ss:$16 sm:$0xc0] %vm142_vm1, %v960_v10  }
  0xe8   :  { %2057 = vst.msk [vmem:[%s4093_s1 + $0x306] ss:$16 sm:$0x3] %vm142_vm1, %v977_v11   ;;  %2058 = vst.msk [vmem:[%s4093_s1 + $0x306] ss:$16 sm:$0xc] %vm142_vm1, %v977_v11  }
  0xe9   :  { %2059 = vst.msk [vmem:[%s4093_s1 + $0x306] ss:$16 sm:$0x30] %vm142_vm1, %v977_v11   ;;  %2060 = vst.msk [vmem:[%s4093_s1 + $0x306] ss:$16 sm:$0xc0] %vm142_vm1, %v977_v11   ;;  %v1095_v18 = vpop.permute.xlu0 %1094   ;;  %v1111_v19 = vpop.permute.xlu1 %1110  }
  0xea   :  { %2061 = vst.msk [vmem:[%s4093_s1 + $0x7] ss:$16 sm:$0x3] %vm142_vm1, %v993_v12   ;;  %2062 = vst.msk [vmem:[%s4093_s1 + $0x7] ss:$16 sm:$0xc] %vm142_vm1, %v993_v12  }
  0xeb   :  { %2063 = vst.msk [vmem:[%s4093_s1 + $0x7] ss:$16 sm:$0x30] %vm142_vm1, %v993_v12   ;;  %2064 = vst.msk [vmem:[%s4093_s1 + $0x7] ss:$16 sm:$0xc0] %vm142_vm1, %v993_v12  }
  0xec   :  { %2065 = vst.msk [vmem:[%s4093_s1 + $0x87] ss:$16 sm:$0x3] %vm142_vm1, %v1010_v13   ;;  %2066 = vst.msk [vmem:[%s4093_s1 + $0x87] ss:$16 sm:$0xc] %vm142_vm1, %v1010_v13  }
  0xed   :  { %2067 = vst.msk [vmem:[%s4093_s1 + $0x87] ss:$16 sm:$0x30] %vm142_vm1, %v1010_v13   ;;  %2068 = vst.msk [vmem:[%s4093_s1 + $0x87] ss:$16 sm:$0xc0] %vm142_vm1, %v1010_v13   ;;  %v1128_v20 = vpop.permute.xlu0 %1127   ;;  %v1145_v21 = vpop.permute.xlu1 %1144  }
  0xee   :  { %2069 = vst.msk [vmem:[%s4093_s1 + $0x107] ss:$16 sm:$0x3] %vm142_vm1, %v1027_v14   ;;  %2070 = vst.msk [vmem:[%s4093_s1 + $0x107] ss:$16 sm:$0xc] %vm142_vm1, %v1027_v14  }
  0xef   :  { %2071 = vst.msk [vmem:[%s4093_s1 + $0x107] ss:$16 sm:$0x30] %vm142_vm1, %v1027_v14   ;;  %2072 = vst.msk [vmem:[%s4093_s1 + $0x107] ss:$16 sm:$0xc0] %vm142_vm1, %v1027_v14  }
  0xf0   :  { %2073 = vst.msk [vmem:[%s4093_s1 + $0x187] ss:$16 sm:$0x3] %vm142_vm1, %v1044_v15   ;;  %2074 = vst.msk [vmem:[%s4093_s1 + $0x187] ss:$16 sm:$0xc] %vm142_vm1, %v1044_v15  }
  0xf1   :  { %2075 = vst.msk [vmem:[%s4093_s1 + $0x187] ss:$16 sm:$0x30] %vm142_vm1, %v1044_v15   ;;  %2076 = vst.msk [vmem:[%s4093_s1 + $0x187] ss:$16 sm:$0xc0] %vm142_vm1, %v1044_v15   ;;  %v1162_v22 = vpop.permute.xlu0 %1161   ;;  %v1179_v23 = vpop.permute.xlu1 %1178  }
  0xf2   :  { %2077 = vst.msk [vmem:[%s4093_s1 + $0x207] ss:$16 sm:$0x3] %vm142_vm1, %v1061_v16   ;;  %2078 = vst.msk [vmem:[%s4093_s1 + $0x207] ss:$16 sm:$0xc] %vm142_vm1, %v1061_v16  }
  0xf3   :  { %2079 = vst.msk [vmem:[%s4093_s1 + $0x207] ss:$16 sm:$0x30] %vm142_vm1, %v1061_v16   ;;  %2080 = vst.msk [vmem:[%s4093_s1 + $0x207] ss:$16 sm:$0xc0] %vm142_vm1, %v1061_v16  }
  0xf4   :  { %2081 = vst.msk [vmem:[%s4093_s1 + $0x287] ss:$16 sm:$0x3] %vm142_vm1, %v1078_v17   ;;  %2082 = vst.msk [vmem:[%s4093_s1 + $0x287] ss:$16 sm:$0xc] %vm142_vm1, %v1078_v17  }
  0xf5   :  { %2083 = vst.msk [vmem:[%s4093_s1 + $0x287] ss:$16 sm:$0x30] %vm142_vm1, %v1078_v17   ;;  %2084 = vst.msk [vmem:[%s4093_s1 + $0x287] ss:$16 sm:$0xc0] %vm142_vm1, %v1078_v17   ;;  %v1196_v24 = vpop.permute.xlu0 %1195   ;;  %v1213_v25 = vpop.permute.xlu1 %1212  }
  0xf6   :  { %2085 = vst.msk [vmem:[%s4093_s1 + $0x307] ss:$16 sm:$0x3] %vm142_vm1, %v1095_v18   ;;  %2086 = vst.msk [vmem:[%s4093_s1 + $0x307] ss:$16 sm:$0xc] %vm142_vm1, %v1095_v18  }
  0xf7   :  { %2087 = vst.msk [vmem:[%s4093_s1 + $0x307] ss:$16 sm:$0x30] %vm142_vm1, %v1095_v18   ;;  %2088 = vst.msk [vmem:[%s4093_s1 + $0x307] ss:$16 sm:$0xc0] %vm142_vm1, %v1095_v18  }
  0xf8   :  { %2089 = vst.msk [vmem:[%s4093_s1 + $0x8] ss:$16 sm:$0x3] %vm142_vm1, %v1111_v19   ;;  %2090 = vst.msk [vmem:[%s4093_s1 + $0x8] ss:$16 sm:$0xc] %vm142_vm1, %v1111_v19  }
  0xf9   :  { %2091 = vst.msk [vmem:[%s4093_s1 + $0x8] ss:$16 sm:$0x30] %vm142_vm1, %v1111_v19   ;;  %2092 = vst.msk [vmem:[%s4093_s1 + $0x8] ss:$16 sm:$0xc0] %vm142_vm1, %v1111_v19   ;;  %v1229_v26 = vpop.permute.xlu0 %1228   ;;  %v1246_v27 = vpop.permute.xlu1 %1245  }
  0xfa   :  { %2093 = vst.msk [vmem:[%s4093_s1 + $0x88] ss:$16 sm:$0x3] %vm142_vm1, %v1128_v20   ;;  %2094 = vst.msk [vmem:[%s4093_s1 + $0x88] ss:$16 sm:$0xc] %vm142_vm1, %v1128_v20  }
  0xfb   :  { %2095 = vst.msk [vmem:[%s4093_s1 + $0x88] ss:$16 sm:$0x30] %vm142_vm1, %v1128_v20   ;;  %2096 = vst.msk [vmem:[%s4093_s1 + $0x88] ss:$16 sm:$0xc0] %vm142_vm1, %v1128_v20  }
  0xfc   :  { %2097 = vst.msk [vmem:[%s4093_s1 + $0x108] ss:$16 sm:$0x3] %vm142_vm1, %v1145_v21   ;;  %2098 = vst.msk [vmem:[%s4093_s1 + $0x108] ss:$16 sm:$0xc] %vm142_vm1, %v1145_v21  }
  0xfd   :  { %2099 = vst.msk [vmem:[%s4093_s1 + $0x108] ss:$16 sm:$0x30] %vm142_vm1, %v1145_v21   ;;  %2100 = vst.msk [vmem:[%s4093_s1 + $0x108] ss:$16 sm:$0xc0] %vm142_vm1, %v1145_v21   ;;  %v1263_v28 = vpop.permute.xlu0 %1262   ;;  %v1280_v29 = vpop.permute.xlu1 %1279  }
  0xfe   :  { %2101 = vst.msk [vmem:[%s4093_s1 + $0x188] ss:$16 sm:$0x3] %vm142_vm1, %v1162_v22   ;;  %2102 = vst.msk [vmem:[%s4093_s1 + $0x188] ss:$16 sm:$0xc] %vm142_vm1, %v1162_v22  }
  0xff   :  { %2103 = vst.msk [vmem:[%s4093_s1 + $0x188] ss:$16 sm:$0x30] %vm142_vm1, %v1162_v22   ;;  %2104 = vst.msk [vmem:[%s4093_s1 + $0x188] ss:$16 sm:$0xc0] %vm142_vm1, %v1162_v22  }
 0x100   :  { %2105 = vst.msk [vmem:[%s4093_s1 + $0x208] ss:$16 sm:$0x3] %vm142_vm1, %v1179_v23   ;;  %2106 = vst.msk [vmem:[%s4093_s1 + $0x208] ss:$16 sm:$0xc] %vm142_vm1, %v1179_v23  }
 0x101   :  { %2107 = vst.msk [vmem:[%s4093_s1 + $0x208] ss:$16 sm:$0x30] %vm142_vm1, %v1179_v23   ;;  %2108 = vst.msk [vmem:[%s4093_s1 + $0x208] ss:$16 sm:$0xc0] %vm142_vm1, %v1179_v23   ;;  %v1297_v30 = vpop.permute.xlu0 %1296   ;;  %v1314_v31 = vpop.permute.xlu1 %1313  }
 0x102   :  { %2109 = vst.msk [vmem:[%s4093_s1 + $0x288] ss:$16 sm:$0x3] %vm142_vm1, %v1196_v24   ;;  %2110 = vst.msk [vmem:[%s4093_s1 + $0x288] ss:$16 sm:$0xc] %vm142_vm1, %v1196_v24  }
 0x103   :  { %2111 = vst.msk [vmem:[%s4093_s1 + $0x288] ss:$16 sm:$0x30] %vm142_vm1, %v1196_v24   ;;  %2112 = vst.msk [vmem:[%s4093_s1 + $0x288] ss:$16 sm:$0xc0] %vm142_vm1, %v1196_v24  }
 0x104   :  { %2113 = vst.msk [vmem:[%s4093_s1 + $0x308] ss:$16 sm:$0x3] %vm142_vm1, %v1213_v25   ;;  %2114 = vst.msk [vmem:[%s4093_s1 + $0x308] ss:$16 sm:$0xc] %vm142_vm1, %v1213_v25  }
 0x105   :  { %2115 = vst.msk [vmem:[%s4093_s1 + $0x308] ss:$16 sm:$0x30] %vm142_vm1, %v1213_v25   ;;  %2116 = vst.msk [vmem:[%s4093_s1 + $0x308] ss:$16 sm:$0xc0] %vm142_vm1, %v1213_v25   ;;  %v1331_v32 = vpop.permute.xlu0 %1330   ;;  %v1347_v33 = vpop.permute.xlu1 %1346  }
 0x106   :  { %2117 = vst.msk [vmem:[%s4093_s1 + $0x9] ss:$16 sm:$0x3] %vm142_vm1, %v1229_v26   ;;  %2118 = vst.msk [vmem:[%s4093_s1 + $0x9] ss:$16 sm:$0xc] %vm142_vm1, %v1229_v26  }
 0x107   :  { %2119 = vst.msk [vmem:[%s4093_s1 + $0x9] ss:$16 sm:$0x30] %vm142_vm1, %v1229_v26   ;;  %2120 = vst.msk [vmem:[%s4093_s1 + $0x9] ss:$16 sm:$0xc0] %vm142_vm1, %v1229_v26  }
 0x108   :  { %2121 = vst.msk [vmem:[%s4093_s1 + $0x89] ss:$16 sm:$0x3] %vm142_vm1, %v1246_v27   ;;  %2122 = vst.msk [vmem:[%s4093_s1 + $0x89] ss:$16 sm:$0xc] %vm142_vm1, %v1246_v27  }
 0x109   :  { %2123 = vst.msk [vmem:[%s4093_s1 + $0x89] ss:$16 sm:$0x30] %vm142_vm1, %v1246_v27   ;;  %2124 = vst.msk [vmem:[%s4093_s1 + $0x89] ss:$16 sm:$0xc0] %vm142_vm1, %v1246_v27   ;;  %v1364_v34 = vpop.permute.xlu0 %1363   ;;  %v1381_v35 = vpop.permute.xlu1 %1380  }
 0x10a   :  { %2125 = vst.msk [vmem:[%s4093_s1 + $0x109] ss:$16 sm:$0x3] %vm142_vm1, %v1263_v28   ;;  %2126 = vst.msk [vmem:[%s4093_s1 + $0x109] ss:$16 sm:$0xc] %vm142_vm1, %v1263_v28  }
 0x10b   :  { %2127 = vst.msk [vmem:[%s4093_s1 + $0x109] ss:$16 sm:$0x30] %vm142_vm1, %v1263_v28   ;;  %2128 = vst.msk [vmem:[%s4093_s1 + $0x109] ss:$16 sm:$0xc0] %vm142_vm1, %v1263_v28  }
 0x10c   :  { %2129 = vst.msk [vmem:[%s4093_s1 + $0x189] ss:$16 sm:$0x3] %vm142_vm1, %v1280_v29   ;;  %2130 = vst.msk [vmem:[%s4093_s1 + $0x189] ss:$16 sm:$0xc] %vm142_vm1, %v1280_v29  }
 0x10d   :  { %2131 = vst.msk [vmem:[%s4093_s1 + $0x189] ss:$16 sm:$0x30] %vm142_vm1, %v1280_v29   ;;  %2132 = vst.msk [vmem:[%s4093_s1 + $0x189] ss:$16 sm:$0xc0] %vm142_vm1, %v1280_v29   ;;  %v1398_v36 = vpop.permute.xlu0 %1397   ;;  %v1415_v37 = vpop.permute.xlu1 %1414  }
 0x10e   :  { %2133 = vst.msk [vmem:[%s4093_s1 + $0x209] ss:$16 sm:$0x3] %vm142_vm1, %v1297_v30   ;;  %2134 = vst.msk [vmem:[%s4093_s1 + $0x209] ss:$16 sm:$0xc] %vm142_vm1, %v1297_v30  }
 0x10f   :  { %2135 = vst.msk [vmem:[%s4093_s1 + $0x209] ss:$16 sm:$0x30] %vm142_vm1, %v1297_v30   ;;  %2136 = vst.msk [vmem:[%s4093_s1 + $0x209] ss:$16 sm:$0xc0] %vm142_vm1, %v1297_v30  }
 0x110   :  { %2137 = vst.msk [vmem:[%s4093_s1 + $0x289] ss:$16 sm:$0x3] %vm142_vm1, %v1314_v31   ;;  %2138 = vst.msk [vmem:[%s4093_s1 + $0x289] ss:$16 sm:$0xc] %vm142_vm1, %v1314_v31  }
 0x111   :  { %2139 = vst.msk [vmem:[%s4093_s1 + $0x289] ss:$16 sm:$0x30] %vm142_vm1, %v1314_v31   ;;  %2140 = vst.msk [vmem:[%s4093_s1 + $0x289] ss:$16 sm:$0xc0] %vm142_vm1, %v1314_v31   ;;  %v1432_v38 = vpop.permute.xlu0 %1431   ;;  %v1449_v39 = vpop.permute.xlu1 %1448  }
 0x112   :  { %2141 = vst.msk [vmem:[%s4093_s1 + $0x309] ss:$16 sm:$0x3] %vm142_vm1, %v1331_v32   ;;  %2142 = vst.msk [vmem:[%s4093_s1 + $0x309] ss:$16 sm:$0xc] %vm142_vm1, %v1331_v32  }
 0x113   :  { %2143 = vst.msk [vmem:[%s4093_s1 + $0x309] ss:$16 sm:$0x30] %vm142_vm1, %v1331_v32   ;;  %2144 = vst.msk [vmem:[%s4093_s1 + $0x309] ss:$16 sm:$0xc0] %vm142_vm1, %v1331_v32  }
 0x114   :  { %2145 = vst.msk [vmem:[%s4093_s1 + $0xa] ss:$16 sm:$0x3] %vm142_vm1, %v1347_v33   ;;  %2146 = vst.msk [vmem:[%s4093_s1 + $0xa] ss:$16 sm:$0xc] %vm142_vm1, %v1347_v33  }
 0x115   :  { %2147 = vst.msk [vmem:[%s4093_s1 + $0xa] ss:$16 sm:$0x30] %vm142_vm1, %v1347_v33   ;;  %2148 = vst.msk [vmem:[%s4093_s1 + $0xa] ss:$16 sm:$0xc0] %vm142_vm1, %v1347_v33   ;;  %v1465_v40 = vpop.permute.xlu0 %1464   ;;  %v1482_v41 = vpop.permute.xlu1 %1481  }
 0x116   :  { %2149 = vst.msk [vmem:[%s4093_s1 + $0x8a] ss:$16 sm:$0x3] %vm142_vm1, %v1364_v34   ;;  %2150 = vst.msk [vmem:[%s4093_s1 + $0x8a] ss:$16 sm:$0xc] %vm142_vm1, %v1364_v34  }
 0x117   :  { %2151 = vst.msk [vmem:[%s4093_s1 + $0x8a] ss:$16 sm:$0x30] %vm142_vm1, %v1364_v34   ;;  %2152 = vst.msk [vmem:[%s4093_s1 + $0x8a] ss:$16 sm:$0xc0] %vm142_vm1, %v1364_v34  }
 0x118   :  { %2153 = vst.msk [vmem:[%s4093_s1 + $0x10a] ss:$16 sm:$0x3] %vm142_vm1, %v1381_v35   ;;  %2154 = vst.msk [vmem:[%s4093_s1 + $0x10a] ss:$16 sm:$0xc] %vm142_vm1, %v1381_v35  }
 0x119   :  { %2155 = vst.msk [vmem:[%s4093_s1 + $0x10a] ss:$16 sm:$0x30] %vm142_vm1, %v1381_v35   ;;  %2156 = vst.msk [vmem:[%s4093_s1 + $0x10a] ss:$16 sm:$0xc0] %vm142_vm1, %v1381_v35   ;;  %v1499_v42 = vpop.permute.xlu0 %1498   ;;  %v1516_v43 = vpop.permute.xlu1 %1515  }
 0x11a   :  { %2157 = vst.msk [vmem:[%s4093_s1 + $0x18a] ss:$16 sm:$0x3] %vm142_vm1, %v1398_v36   ;;  %2158 = vst.msk [vmem:[%s4093_s1 + $0x18a] ss:$16 sm:$0xc] %vm142_vm1, %v1398_v36  }
 0x11b   :  { %2159 = vst.msk [vmem:[%s4093_s1 + $0x18a] ss:$16 sm:$0x30] %vm142_vm1, %v1398_v36   ;;  %2160 = vst.msk [vmem:[%s4093_s1 + $0x18a] ss:$16 sm:$0xc0] %vm142_vm1, %v1398_v36  }
 0x11c   :  { %2161 = vst.msk [vmem:[%s4093_s1 + $0x20a] ss:$16 sm:$0x3] %vm142_vm1, %v1415_v37   ;;  %2162 = vst.msk [vmem:[%s4093_s1 + $0x20a] ss:$16 sm:$0xc] %vm142_vm1, %v1415_v37  }
 0x11d   :  { %2163 = vst.msk [vmem:[%s4093_s1 + $0x20a] ss:$16 sm:$0x30] %vm142_vm1, %v1415_v37   ;;  %2164 = vst.msk [vmem:[%s4093_s1 + $0x20a] ss:$16 sm:$0xc0] %vm142_vm1, %v1415_v37   ;;  %v1533_v44 = vpop.permute.xlu0 %1532   ;;  %v1550_v45 = vpop.permute.xlu1 %1549  }
 0x11e   :  { %2165 = vst.msk [vmem:[%s4093_s1 + $0x28a] ss:$16 sm:$0x3] %vm142_vm1, %v1432_v38   ;;  %2166 = vst.msk [vmem:[%s4093_s1 + $0x28a] ss:$16 sm:$0xc] %vm142_vm1, %v1432_v38  }
 0x11f   :  { %2167 = vst.msk [vmem:[%s4093_s1 + $0x28a] ss:$16 sm:$0x30] %vm142_vm1, %v1432_v38   ;;  %2168 = vst.msk [vmem:[%s4093_s1 + $0x28a] ss:$16 sm:$0xc0] %vm142_vm1, %v1432_v38  }
 0x120   :  { %2169 = vst.msk [vmem:[%s4093_s1 + $0x30a] ss:$16 sm:$0x3] %vm142_vm1, %v1449_v39   ;;  %2170 = vst.msk [vmem:[%s4093_s1 + $0x30a] ss:$16 sm:$0xc] %vm142_vm1, %v1449_v39  }
 0x121   :  { %2171 = vst.msk [vmem:[%s4093_s1 + $0x30a] ss:$16 sm:$0x30] %vm142_vm1, %v1449_v39   ;;  %2172 = vst.msk [vmem:[%s4093_s1 + $0x30a] ss:$16 sm:$0xc0] %vm142_vm1, %v1449_v39   ;;  %v1567_v46 = vpop.permute.xlu0 %1566   ;;  %v1583_v47 = vpop.permute.xlu1 %1582  }
 0x122   :  { %2173 = vst.msk [vmem:[%s4093_s1 + $0xb] ss:$16 sm:$0x3] %vm142_vm1, %v1465_v40   ;;  %2174 = vst.msk [vmem:[%s4093_s1 + $0xb] ss:$16 sm:$0xc] %vm142_vm1, %v1465_v40  }
 0x123   :  { %2175 = vst.msk [vmem:[%s4093_s1 + $0xb] ss:$16 sm:$0x30] %vm142_vm1, %v1465_v40   ;;  %2176 = vst.msk [vmem:[%s4093_s1 + $0xb] ss:$16 sm:$0xc0] %vm142_vm1, %v1465_v40  }
 0x124   :  { %2177 = vst.msk [vmem:[%s4093_s1 + $0x8b] ss:$16 sm:$0x3] %vm142_vm1, %v1482_v41   ;;  %2178 = vst.msk [vmem:[%s4093_s1 + $0x8b] ss:$16 sm:$0xc] %vm142_vm1, %v1482_v41  }
 0x125   :  { %2179 = vst.msk [vmem:[%s4093_s1 + $0x8b] ss:$16 sm:$0x30] %vm142_vm1, %v1482_v41   ;;  %2180 = vst.msk [vmem:[%s4093_s1 + $0x8b] ss:$16 sm:$0xc0] %vm142_vm1, %v1482_v41   ;;  %v1600_v48 = vpop.permute.xlu0 %1599   ;;  %v1617_v49 = vpop.permute.xlu1 %1616  }
 0x126   :  { %2181 = vst.msk [vmem:[%s4093_s1 + $0x10b] ss:$16 sm:$0x3] %vm142_vm1, %v1499_v42   ;;  %2182 = vst.msk [vmem:[%s4093_s1 + $0x10b] ss:$16 sm:$0xc] %vm142_vm1, %v1499_v42  }
 0x127   :  { %2183 = vst.msk [vmem:[%s4093_s1 + $0x10b] ss:$16 sm:$0x30] %vm142_vm1, %v1499_v42   ;;  %2184 = vst.msk [vmem:[%s4093_s1 + $0x10b] ss:$16 sm:$0xc0] %vm142_vm1, %v1499_v42  }
 0x128   :  { %2185 = vst.msk [vmem:[%s4093_s1 + $0x18b] ss:$16 sm:$0x3] %vm142_vm1, %v1516_v43   ;;  %2186 = vst.msk [vmem:[%s4093_s1 + $0x18b] ss:$16 sm:$0xc] %vm142_vm1, %v1516_v43  }
 0x129   :  { %2187 = vst.msk [vmem:[%s4093_s1 + $0x18b] ss:$16 sm:$0x30] %vm142_vm1, %v1516_v43   ;;  %2188 = vst.msk [vmem:[%s4093_s1 + $0x18b] ss:$16 sm:$0xc0] %vm142_vm1, %v1516_v43   ;;  %v1634_v50 = vpop.permute.xlu0 %1633   ;;  %v1651_v51 = vpop.permute.xlu1 %1650  }
 0x12a   :  { %2189 = vst.msk [vmem:[%s4093_s1 + $0x20b] ss:$16 sm:$0x3] %vm142_vm1, %v1533_v44   ;;  %2190 = vst.msk [vmem:[%s4093_s1 + $0x20b] ss:$16 sm:$0xc] %vm142_vm1, %v1533_v44  }
 0x12b   :  { %2191 = vst.msk [vmem:[%s4093_s1 + $0x20b] ss:$16 sm:$0x30] %vm142_vm1, %v1533_v44   ;;  %2192 = vst.msk [vmem:[%s4093_s1 + $0x20b] ss:$16 sm:$0xc0] %vm142_vm1, %v1533_v44  }
 0x12c   :  { %2193 = vst.msk [vmem:[%s4093_s1 + $0x28b] ss:$16 sm:$0x3] %vm142_vm1, %v1550_v45   ;;  %2194 = vst.msk [vmem:[%s4093_s1 + $0x28b] ss:$16 sm:$0xc] %vm142_vm1, %v1550_v45  }
 0x12d   :  { %2195 = vst.msk [vmem:[%s4093_s1 + $0x28b] ss:$16 sm:$0x30] %vm142_vm1, %v1550_v45   ;;  %2196 = vst.msk [vmem:[%s4093_s1 + $0x28b] ss:$16 sm:$0xc0] %vm142_vm1, %v1550_v45   ;;  %v1668_v52 = vpop.permute.xlu0 %1667   ;;  %v1685_v53 = vpop.permute.xlu1 %1684  }
 0x12e   :  { %2197 = vst.msk [vmem:[%s4093_s1 + $0x30b] ss:$16 sm:$0x3] %vm142_vm1, %v1567_v46   ;;  %2198 = vst.msk [vmem:[%s4093_s1 + $0x30b] ss:$16 sm:$0xc] %vm142_vm1, %v1567_v46  }
 0x12f   :  { %2199 = vst.msk [vmem:[%s4093_s1 + $0x30b] ss:$16 sm:$0x30] %vm142_vm1, %v1567_v46   ;;  %2200 = vst.msk [vmem:[%s4093_s1 + $0x30b] ss:$16 sm:$0xc0] %vm142_vm1, %v1567_v46  }
 0x130   :  { %2201 = vst.msk [vmem:[%s4093_s1 + $0xc] ss:$16 sm:$0x3] %vm142_vm1, %v1583_v47   ;;  %2202 = vst.msk [vmem:[%s4093_s1 + $0xc] ss:$16 sm:$0xc] %vm142_vm1, %v1583_v47  }
 0x131   :  { %2203 = vst.msk [vmem:[%s4093_s1 + $0xc] ss:$16 sm:$0x30] %vm142_vm1, %v1583_v47   ;;  %2204 = vst.msk [vmem:[%s4093_s1 + $0xc] ss:$16 sm:$0xc0] %vm142_vm1, %v1583_v47   ;;  %v1701_v54 = vpop.permute.xlu0 %1700   ;;  %v1718_v55 = vpop.permute.xlu1 %1717  }
 0x132   :  { %2205 = vst.msk [vmem:[%s4093_s1 + $0x8c] ss:$16 sm:$0x3] %vm142_vm1, %v1600_v48   ;;  %2206 = vst.msk [vmem:[%s4093_s1 + $0x8c] ss:$16 sm:$0xc] %vm142_vm1, %v1600_v48  }
 0x133   :  { %2207 = vst.msk [vmem:[%s4093_s1 + $0x8c] ss:$16 sm:$0x30] %vm142_vm1, %v1600_v48   ;;  %2208 = vst.msk [vmem:[%s4093_s1 + $0x8c] ss:$16 sm:$0xc0] %vm142_vm1, %v1600_v48  }
 0x134   :  { %2209 = vst.msk [vmem:[%s4093_s1 + $0x10c] ss:$16 sm:$0x3] %vm142_vm1, %v1617_v49   ;;  %2210 = vst.msk [vmem:[%s4093_s1 + $0x10c] ss:$16 sm:$0xc] %vm142_vm1, %v1617_v49  }
 0x135   :  { %2211 = vst.msk [vmem:[%s4093_s1 + $0x10c] ss:$16 sm:$0x30] %vm142_vm1, %v1617_v49   ;;  %2212 = vst.msk [vmem:[%s4093_s1 + $0x10c] ss:$16 sm:$0xc0] %vm142_vm1, %v1617_v49   ;;  %v1735_v56 = vpop.permute.xlu0 %1734   ;;  %v1752_v57 = vpop.permute.xlu1 %1751  }
 0x136   :  { %2213 = vst.msk [vmem:[%s4093_s1 + $0x18c] ss:$16 sm:$0x3] %vm142_vm1, %v1634_v50   ;;  %2214 = vst.msk [vmem:[%s4093_s1 + $0x18c] ss:$16 sm:$0xc] %vm142_vm1, %v1634_v50  }
 0x137   :  { %2215 = vst.msk [vmem:[%s4093_s1 + $0x18c] ss:$16 sm:$0x30] %vm142_vm1, %v1634_v50   ;;  %2216 = vst.msk [vmem:[%s4093_s1 + $0x18c] ss:$16 sm:$0xc0] %vm142_vm1, %v1634_v50  }
 0x138   :  { %2217 = vst.msk [vmem:[%s4093_s1 + $0x20c] ss:$16 sm:$0x3] %vm142_vm1, %v1651_v51   ;;  %2218 = vst.msk [vmem:[%s4093_s1 + $0x20c] ss:$16 sm:$0xc] %vm142_vm1, %v1651_v51  }
 0x139   :  { %2219 = vst.msk [vmem:[%s4093_s1 + $0x20c] ss:$16 sm:$0x30] %vm142_vm1, %v1651_v51   ;;  %2220 = vst.msk [vmem:[%s4093_s1 + $0x20c] ss:$16 sm:$0xc0] %vm142_vm1, %v1651_v51   ;;  %v1769_v58 = vpop.permute.xlu0 %1768   ;;  %v1786_v59 = vpop.permute.xlu1 %1785  }
 0x13a   :  { %2221 = vst.msk [vmem:[%s4093_s1 + $0x28c] ss:$16 sm:$0x3] %vm142_vm1, %v1668_v52   ;;  %2222 = vst.msk [vmem:[%s4093_s1 + $0x28c] ss:$16 sm:$0xc] %vm142_vm1, %v1668_v52  }
 0x13b   :  { %2223 = vst.msk [vmem:[%s4093_s1 + $0x28c] ss:$16 sm:$0x30] %vm142_vm1, %v1668_v52   ;;  %2224 = vst.msk [vmem:[%s4093_s1 + $0x28c] ss:$16 sm:$0xc0] %vm142_vm1, %v1668_v52  }
 0x13c   :  { %2225 = vst.msk [vmem:[%s4093_s1 + $0x30c] ss:$16 sm:$0x3] %vm142_vm1, %v1685_v53   ;;  %2226 = vst.msk [vmem:[%s4093_s1 + $0x30c] ss:$16 sm:$0xc] %vm142_vm1, %v1685_v53  }
 0x13d   :  { %2227 = vst.msk [vmem:[%s4093_s1 + $0x30c] ss:$16 sm:$0x30] %vm142_vm1, %v1685_v53   ;;  %2228 = vst.msk [vmem:[%s4093_s1 + $0x30c] ss:$16 sm:$0xc0] %vm142_vm1, %v1685_v53   ;;  %v1803_v60 = vpop.permute.xlu0 %1802  }
 0x13e   :  { %2229 = vst.msk [vmem:[%s4093_s1 + $0xd] ss:$16 sm:$0x3] %vm142_vm1, %v1701_v54   ;;  %2230 = vst.msk [vmem:[%s4093_s1 + $0xd] ss:$16 sm:$0xc] %vm142_vm1, %v1701_v54  }
 0x13f   :  { %2231 = vst.msk [vmem:[%s4093_s1 + $0xd] ss:$16 sm:$0x30] %vm142_vm1, %v1701_v54   ;;  %2232 = vst.msk [vmem:[%s4093_s1 + $0xd] ss:$16 sm:$0xc0] %vm142_vm1, %v1701_v54  }
 0x140   :  { %2233 = vst.msk [vmem:[%s4093_s1 + $0x8d] ss:$16 sm:$0x3] %vm142_vm1, %v1718_v55   ;;  %2234 = vst.msk [vmem:[%s4093_s1 + $0x8d] ss:$16 sm:$0xc] %vm142_vm1, %v1718_v55  }
 0x141   :  { %2235 = vst.msk [vmem:[%s4093_s1 + $0x8d] ss:$16 sm:$0x30] %vm142_vm1, %v1718_v55   ;;  %2236 = vst.msk [vmem:[%s4093_s1 + $0x8d] ss:$16 sm:$0xc0] %vm142_vm1, %v1718_v55  }
 0x142   :  { %2237 = vst.msk [vmem:[%s4093_s1 + $0x10d] ss:$16 sm:$0x3] %vm142_vm1, %v1735_v56   ;;  %2238 = vst.msk [vmem:[%s4093_s1 + $0x10d] ss:$16 sm:$0xc] %vm142_vm1, %v1735_v56  }
 0x143   :  { %2239 = vst.msk [vmem:[%s4093_s1 + $0x10d] ss:$16 sm:$0x30] %vm142_vm1, %v1735_v56   ;;  %2240 = vst.msk [vmem:[%s4093_s1 + $0x10d] ss:$16 sm:$0xc0] %vm142_vm1, %v1735_v56  }
 0x144   :  { %2241 = vst.msk [vmem:[%s4093_s1 + $0x18d] ss:$16 sm:$0x3] %vm142_vm1, %v1752_v57   ;;  %2242 = vst.msk [vmem:[%s4093_s1 + $0x18d] ss:$16 sm:$0xc] %vm142_vm1, %v1752_v57  }
 0x145   :  { %2243 = vst.msk [vmem:[%s4093_s1 + $0x18d] ss:$16 sm:$0x30] %vm142_vm1, %v1752_v57   ;;  %2244 = vst.msk [vmem:[%s4093_s1 + $0x18d] ss:$16 sm:$0xc0] %vm142_vm1, %v1752_v57  }
 0x146   :  { %2245 = vst.msk [vmem:[%s4093_s1 + $0x20d] ss:$16 sm:$0x3] %vm142_vm1, %v1769_v58   ;;  %2246 = vst.msk [vmem:[%s4093_s1 + $0x20d] ss:$16 sm:$0xc] %vm142_vm1, %v1769_v58  }
 0x147   :  { %2247 = vst.msk [vmem:[%s4093_s1 + $0x20d] ss:$16 sm:$0x30] %vm142_vm1, %v1769_v58   ;;  %2248 = vst.msk [vmem:[%s4093_s1 + $0x20d] ss:$16 sm:$0xc0] %vm142_vm1, %v1769_v58  }
 0x148   :  { %2249 = vst.msk [vmem:[%s4093_s1 + $0x28d] ss:$16 sm:$0x3] %vm142_vm1, %v1786_v59   ;;  %2250 = vst.msk [vmem:[%s4093_s1 + $0x28d] ss:$16 sm:$0xc] %vm142_vm1, %v1786_v59  }
 0x149   :  { %2251 = vst.msk [vmem:[%s4093_s1 + $0x28d] ss:$16 sm:$0x30] %vm142_vm1, %v1786_v59   ;;  %2252 = vst.msk [vmem:[%s4093_s1 + $0x28d] ss:$16 sm:$0xc0] %vm142_vm1, %v1786_v59  }
 0x14a   :  { %2253 = vst.msk [vmem:[%s4093_s1 + $0x30d] ss:$16 sm:$0x3] %vm142_vm1, %v1803_v60   ;;  %2254 = vst.msk [vmem:[%s4093_s1 + $0x30d] ss:$16 sm:$0xc] %vm142_vm1, %v1803_v60  }
 0x14b   :  { %2255 = vst.msk [vmem:[%s4093_s1 + $0x30d] ss:$16 sm:$0x30] %vm142_vm1, %v1803_v60   ;;  %2256 = vst.msk [vmem:[%s4093_s1 + $0x30d] ss:$16 sm:$0xc0] %vm142_vm1, %v1803_v60  }

// kernel: q_conv_layer_forward.1
= control target key start
LH: loop header
LB: loop body
LE: loop exit
PB: predicated region body
PF: predicated region fallthrough
CT: control target
= control target key end

     0   :  { %vm35_vm0 = vcmask 1043456   ;;  %v3678_v2 = vmov 0.0   ;;  %vm28_vm1 = vcmask 31744   ;;  %v3689_v51 = vmov 683565275   ;;  %s3672_s0 = inlined_call_operand.vmem [shape: f32[4,512], index: 0, kind: input, shape index: {}]   ;;  %s3673_s1 = inlined_call_operand.vmem [shape: f32[16,4], index: 1, kind: input, shape index: {}]   ;;  %s3674_s3 = inlined_call_operand.vmem [shape: f32[32,16], index: 3, kind: input, shape index: {}]   ;;  %s3675_s2 = inlined_call_operand.vmem [shape: f32[32,16], index: 2, kind: input, shape index: {}]   ;;  %s3676_s4 = inlined_call_operand.vmem [shape: f32[8,32], index: 4, kind: input, shape index: {}]   ;;  %s3677_s5 = inlined_call_operand.vmem [shape: f32[8,512], index: 5, kind: output, shape index: {}]  }
   0x1   :  { %v20_v0 = vld [vmem:[%s3672_s0] sm:$0xff]  ;;  %v21_v1 = vld [vmem:[%s3672_s0 + $0x8] sm:$0xff]  ;;  %108 = vmatprep.mubr.f32.mxu0 %v3678_v2  ;;  %185 = vmatprep.mubr.f32.mxu1 %v3678_v2  ;;  %v3701_v55 = vmov 2475754826   ;;  %v3684_v57 = vmov 2131351028  }
   0x2   :  { %v26_v3 = vcombine.high %v20_v0, %v20_v0  ;;  %v27_v4 = vcombine.high %v21_v1, %v21_v1  ;;  %v22_v5 = vld [vmem:[%s3673_s1] sm:$0xff]  ;;  %v23_v6 = vld [vmem:[%s3673_s1 + $0x8] sm:$0xff]  ;;  %v3691_v59 = vmov 2102212464   ;;  %v2606_v61 = vmov 920167782  }
   0x4   :  { %2438 = vmatprep.subr.msk.mxu0 %vm35_vm0, %v26_v3  ;;  %2442 = vmatprep.subr.msk.mxu1 %vm35_vm0, %v27_v4 }
   0x5   :  { %2439 = vmatpush1.msk.msra.mxu0 %vm35_vm0, %v20_v0  ;;  %2443 = vmatpush1.msk.msra.mxu1 %vm35_vm0, %v21_v1 }
   0x6   :  { %2440 = vmatmul.mubr.msk.f32.vlgmr.msra.gmra.mxu0 %vm28_vm1, %v22_v5  ;;  %2444 = vmatmul.mubr.msk.f32.vlgmr.msra.gmra.mxu1 %vm28_vm1, %v22_v5  ;;  %v3687_v5 = vmov 1326507024  }
   0x7   :  { %114 = vmatprep.mubr.f32.mxu0 %v3678_v2  ;;  %191 = vmatprep.mubr.f32.mxu1 %v3678_v2 }
   0xa   :  { %2441 = vmatmul.mubr.msk.f32.gmra.mxu0 %vm28_vm1, %v23_v6  ;;  %2445 = vmatmul.mubr.msk.f32.gmra.mxu1 %vm28_vm1, %v23_v6 }
   0xb   :  { %1963 = vmatprep.mubr.f32.mxu0 %v3678_v2  ;;  %2052 = vmatprep.mubr.f32.mxu1 %v3678_v2 }
  0xc6   :  { %v110_v7 = vpop.f32.mrf.mxu0  ;;  %v187_v8 = vpop.f32.mrf.mxu1 }
  0xc7   :  { %v198_v9 = vmul.f32 %v110_v7, %v110_v7  ;;  %v200_v10 = vmul.f32 %v187_v8, %v187_v8 }
  0xc8   :  { %v112_v11 = vpop.f32.mrf.mxu0  ;;  %v189_v12 = vpop.f32.mrf.mxu1 }
  0xc9   :  { %v206_v13 = vmul.f32 1.2738854, %v198_v9  ;;  %v208_v14 = vmul.f32 1.2738854, %v200_v10  ;;  %v199_v15 = vmul.f32 %v112_v11, %v112_v11  ;;  %v201_v16 = vmul.f32 %v189_v12, %v189_v12 }
  0xca   :  { %v116_v23 = vpop.f32.mrf.mxu0 }
  0xcb   :  { %v2656_v17 = vadd.f32 %v206_v13, %v110_v7  ;;  %v2658_v18 = vadd.f32 %v208_v14, %v187_v8  ;;  %v207_v19 = vmul.f32 1.2738854, %v199_v15  ;;  %v209_v20 = vmul.f32 1.2738854, %v201_v16 }
  0xcc   :  { %v202_v31 = vmul.f32 %v116_v23, %v116_v23 }
  0xcd   :  { %3709 = vst [vmem:[#allocation2_spill] sm:$0xff] %v2656_v17  ;;  %3710 = vst [vmem:[#allocation3_spill] sm:$0xff] %v2658_v18  ;;  %v3681_v21 = vand.u32 2147483647, %v2656_v17  ;;  %v225_v22 = vand.u32 2139095040, %v2656_v17  ;;  %v431_v24 = vand.u32 2139095040, %v2658_v18  ;;  %v2664_v27 = vadd.f32 %v207_v19, %v112_v11 }
  0xce   :  { %v3680_v26 = vand.u32 2147483647, %v2658_v18  ;;  %v2668_v30 = vadd.f32 %v209_v20, %v189_v12  ;;  %v210_v40 = vmul.f32 1.2738854, %v202_v31 }
  0xcf   :  { %v226_v25 = vshrl.u32 %v225_v22, 23  ;;  %v229_v28 = vand.u32 8388607, %v3681_v21  ;;  %v432_v29 = vshrl.u32 %v431_v24, 23  ;;  %v328_v36 = vand.u32 2139095040, %v2664_v27 }
  0xd0   :  { %3711 = vst [vmem:[#allocation4_spill] sm:$0xff] %v2668_v30  ;;  %v2672_v35 = vand.u32 8388607, %v3680_v26  ;;  %v534_v39 = vand.u32 2139095040, %v2668_v30  ;;  %v2683_v49 = vadd.f32 %v210_v40, %v116_v23 }
  0xd1   :  { %v2446_v32 = vadd.s32 4294967169, %v226_v25  ;;  %v2454_v33 = vadd.s32 4294967169, %v432_v29  ;;  %v230_v37 = vor.u32 8388608, %v229_v28  ;;  %v2679_v47 = vshrl.u32 %v328_v36, 23 }
  0xd2   :  { %v436_v44 = vor.u32 8388608, %v2672_v35  ;;  %v2681_v48 = vshrl.u32 %v534_v39, 23 }
  0xd3   :  { %v232_v34 = vadd.s32 1, %v2446_v32  ;;  %v438_v38 = vadd.s32 1, %v2454_v33  ;;  %v2677_v46 = vshll.u32 %v230_v37, 8 }
  0xd5   :  { %vm233_vm2 = vcmp.gt.s32.totalorder %v232_v34, 0  ;;  %vm439_vm3 = vcmp.gt.s32.totalorder %v438_v38, 0 }
  0xd6   :  { %v234_v41 = vsel %vm233_vm2, %v232_v34, 0  ;;  %v440_v45 = vsel %vm439_vm3, %v438_v38, 0 }
  0xd7   :  { %v235_v42 = vshrl.u32 %v234_v41, 5  ;;  %v236_v43 = vand.u32 31, %v234_v41  ;;  %v2686_v53 = vshrl.u32 %v440_v45, 5  ;;  %v442_v54 = vand.u32 31, %v440_v45 }
  0xd9   :  { %v237_v50 = vsub.s32 32, %v236_v43  ;;  %v239_v52 = vshll.u32 %v3689_v51, %v236_v43  ;;  %v242_v56 = vshll.u32 %v3701_v55, %v236_v43  ;;  %v245_v58 = vshll.u32 %v3684_v57, %v236_v43 }
  0xda   :  { %v248_v60 = vshll.u32 %v3691_v59, %v236_v43  ;;  %v251_v62 = vshll.u32 %v2606_v61, %v236_v43  ;;  %vm254_vm4 = vcmp.lt.s32.totalorder %v235_v42, 1  ;;  %vm255_vm5 = vcmp.lt.s32.totalorder %v235_v42, 2 }
  0xdb   :  { %v240_v63 = vshrl.u32 %v3701_v55, %v237_v50  ;;  %v243_v0 = vshrl.u32 %v3684_v57, %v237_v50  ;;  %v246_v1 = vshrl.u32 %v3691_v59, %v237_v50  ;;  %v238_v3 = vshrl.u32 %v3689_v51, %v237_v50 }
  0xdc   :  { %v249_v4 = vshrl.u32 %v2606_v61, %v237_v50  ;;  %v252_v6 = vshrl.u32 %v3687_v5, %v237_v50  ;;  %v443_v10 = vsub.s32 32, %v442_v54  ;;  %vm256_vm6 = vcmp.lt.s32.totalorder %v235_v42, 3 }
  0xdd   :  { %v241_v7 = vor.u32 %v240_v63, %v239_v52  ;;  %v244_v8 = vor.u32 %v243_v0, %v242_v56  ;;  %v247_v9 = vor.u32 %v246_v1, %v245_v58  ;;  %vm257_vm7 = vcmp.lt.s32.totalorder %v235_v42, 4 }
  0xde   :  { %v250_v11 = vor.u32 %v249_v4, %v248_v60  ;;  %v253_v12 = vor.u32 %v252_v6, %v251_v62  ;;  %v445_v23 = vshll.u32 %v3689_v51, %v442_v54  ;;  %v446_v28 = vshrl.u32 %v3701_v55, %v443_v10 }
  0xdf   :  { %v258_v13 = vsel %vm254_vm4, %v238_v3, %v241_v7  ;;  %v259_v14 = vsel %vm257_vm7, %v247_v9, 2102212464  ;;  %v262_v15 = vsel %vm254_vm4, %v241_v7, %v244_v8  ;;  %v266_v16 = vsel %vm254_vm4, %v244_v8, %v247_v9 }
  0xe0   :  { %v260_v19 = vsel %vm256_vm6, %v244_v8, %v259_v14  ;;  %v263_v20 = vsel %vm257_vm7, %v250_v11, 920167782  ;;  %v267_v22 = vsel %vm257_vm7, %v253_v12, 1326507024  ;;  %v448_v29 = vshll.u32 %v3701_v55, %v442_v54 }
  0xe1   :  { %v264_v24 = vsel %vm256_vm6, %v247_v9, %v263_v20  ;;  %v268_v25 = vsel %vm256_vm6, %v250_v11, %v267_v22  ;;  %v261_v31 = vsel %vm255_vm5, %v258_v13, %v260_v19  ;;  %v449_v34 = vshrl.u32 %v3684_v57, %v443_v10 }
  0xe2   :  { %v265_v32 = vsel %vm255_vm5, %v262_v15, %v264_v24  ;;  %v269_v33 = vsel %vm255_vm5, %v266_v16, %v268_v25  ;;  %v447_v40 = vor.u32 %v446_v28, %v445_v23  ;;  %v451_v43 = vshll.u32 %v3684_v57, %v442_v54  ;;  %v193_v25 = vpop.f32.mrf.mxu1 }
  0xe3   :  { %v2709_v36 = vmul.u32.u64.low %v2677_v46, %v269_v33  ;;  %v2710_v37 = vmul.u32.u64.high %v2677_v46, %v269_v33, %v2709_v36  ;;  %v2713_v38 = vmul.u32.u64.low %v2677_v46, %v265_v32  ;;  %v2714_v39 = vmul.u32.u64.high %v2677_v46, %v265_v32, %v2713_v38 }
  0xe4   :  { %v450_v41 = vor.u32 %v449_v34, %v448_v29  ;;  %v452_v45 = vshrl.u32 %v3691_v59, %v443_v10  ;;  %v454_v42 = vshll.u32 %v3691_v59, %v442_v54  ;;  %v455_v50 = vshrl.u32 %v2606_v61, %v443_v10 }
  0xe5   :  { %v458_v52 = vshrl.u32 %v3687_v5, %v443_v10  ;;  %v476_v56 = vshll.u32 %v436_v44, 8  ;;  %v277_v58 = vmul.u32 %v2677_v46, %v261_v31  ;;  %v457_v62 = vshll.u32 %v2606_v61, %v442_v54 }
  0xe6   :  { %v453_v60 = vor.u32 %v452_v45, %v451_v43  ;;  %v2450_v63 = vadd.s32 4294967169, %v2679_v47  ;;  %vm279_vm8 = vc.u32 %v2710_v37, %v2713_v38  ;;  %v280_v0 = vadd.s32 1, %v2714_v39 }
  0xe7   :  { %v456_v1 = vor.u32 %v455_v50, %v454_v42  ;;  %vm460_vm9 = vcmp.lt.s32.totalorder %v2686_v53, 1  ;;  %v459_v3 = vor.u32 %v458_v52, %v457_v62  ;;  %vm461_vm10 = vcmp.lt.s32.totalorder %v2686_v53, 2 }
  0xe8   :  { %vm463_vm11 = vcmp.lt.s32.totalorder %v2686_v53, 4  ;;  %v468_v35 = vsel %vm460_vm9, %v447_v40, %v450_v41  ;;  %v281_v44 = vsel %vm279_vm8, %v280_v0, %v2714_v39  ;;  %vm462_vm12 = vcmp.lt.s32.totalorder %v2686_v53, 3 }
  0xe9   :  { %v469_v46 = vsel %vm463_vm11, %v456_v1, 920167782  ;;  %v472_v47 = vsel %vm460_vm9, %v450_v41, %v453_v60  ;;  %v282_v54 = vadd.s32 %v281_v44, %v277_v58  ;;  %v465_v4 = vsel %vm463_vm11, %v453_v60, 2102212464 }
  0xea   :  { %v470_v6 = vsel %vm462_vm12, %v453_v60, %v469_v46  ;;  %v473_v7 = vsel %vm463_vm11, %v459_v3, 1326507024  ;;  %v444_v8 = vshrl.u32 %v3689_v51, %v443_v10  ;;  %v637_v12 = vand.u32 2139095040, %v2683_v49 }
  0xeb   :  { %v471_v9 = vsel %vm461_vm10, %v468_v35, %v470_v6  ;;  %v474_v11 = vsel %vm462_vm12, %v456_v1, %v473_v7  ;;  %v283_v13 = vadd.s32 536870912, %v282_v54  ;;  %v466_v20 = vsel %vm462_vm12, %v450_v41, %v465_v4 }
  0xec   :  { %v475_v14 = vsel %vm461_vm10, %v472_v47, %v474_v11  ;;  %v2745_v15 = vmul.u32.u64.low %v476_v56, %v471_v9  ;;  %v2746_v16 = vmul.u32.u64.high %v476_v56, %v471_v9, %v2745_v15  ;;  %v464_v19 = vsel %vm460_vm9, %v444_v8, %v447_v40 }
  0xed   :  { %v2751_v22 = vmul.u32.u64.low %v476_v56, %v475_v14  ;;  %v2752_v10 = vmul.u32.u64.high %v476_v56, %v475_v14, %v2751_v22  ;;  %v2754_v23 = vshrl.u32 %v283_v13, 30  ;;  %v638_v24 = vshrl.u32 %v637_v12, 23 }
  0xee   :  { %v467_v29 = vsel %vm461_vm10, %v464_v19, %v466_v20  ;;  %v486_v31 = vadd.s32 1, %v2746_v16  ;;  %v2458_v32 = vadd.s32 4294967169, %v2681_v48  ;;  %v335_v33 = vadd.s32 1, %v2450_v63 }
  0xef   :  { %3712 = vst [vmem:[#allocation5_spill] sm:$0xff] %v2754_v23  ;;  %v285_v28 = vshll.u32 %v2754_v23, 30  ;;  %vm485_vm13 = vc.u32 %v2752_v10, %v2745_v15  ;;  %v204_v39 = vmul.f32 %v193_v25, %v193_v25  ;;  %v483_v40 = vmul.u32 %v476_v56, %v467_v29  ;;  %v118_v56 = vpop.f32.mrf.mxu0 }
  0xf0   :  { %v487_v36 = vsel %vm485_vm13, %v486_v31, %v2746_v16  ;;  %v2462_v41 = vadd.s32 4294967169, %v638_v24  ;;  %v541_v43 = vadd.s32 1, %v2458_v32  ;;  %vm336_vm14 = vcmp.gt.s32.totalorder %v335_v33, 0 }
  0xf1   :  { %v2763_v34 = vsub.s32 %v282_v54, %v285_v28  ;;  %v488_v53 = vadd.s32 %v487_v36, %v483_v40  ;;  %v212_v42 = vmul.f32 1.2738854, %v204_v39  ;;  %v337_v52 = vsel %vm336_vm14, %v335_v33, 0  ;;  %v195_v40 = vpop.f32.mrf.mxu1 }
  0xf2   :  { %v644_v50 = vadd.s32 1, %v2462_v41  ;;  %vm542_vm15 = vcmp.gt.s32.totalorder %v541_v43, 0  ;;  %v3683_v48 = vand.u32 2147483647, %v2683_v49  ;;  %v2771_v0 = vand.u32 31, %v337_v52 }
  0xf3   :  { %v288_v45 = vsub.s32 0, %v2763_v34  ;;  %v489_v60 = vadd.s32 536870912, %v488_v53  ;;  %v2769_v63 = vadd.f32 %v212_v42, %v193_v25  ;;  %v543_v1 = vsel %vm542_vm15, %v541_v43, 0 }
  0xf4   :  { %vm645_vm0 = vcmp.gt.s32.totalorder %v644_v50, 0  ;;  %v641_v35 = vand.u32 8388607, %v3683_v48  ;;  %v203_v54 = vmul.f32 %v118_v56, %v118_v56  ;;  %v2779_v4 = vadd.s32 %v2713_v38, %v2710_v37 }
  0xf5   :  { %v2447_v58 = vmin.u32 %v288_v45, %v2763_v34  ;;  %v646_v62 = vsel %vm645_vm0, %v644_v50, 0  ;;  %v2775_v46 = vshrl.u32 %v489_v60, 30  ;;  %v2781_v6 = vshrl.u32 %v337_v52, 5 }
  0xf6   :  { %v648_v3 = vand.u32 31, %v646_v62  ;;  %v2783_v7 = vshrl.u32 %v543_v1, 5  ;;  %v3682_v8 = vand.u32 2147483647, %v2769_v63  ;;  %v2787_v9 = vsub.s32 32, %v2771_v0 }
  0xf7   :  { %v290_v44 = vclz %v2447_v58  ;;  %3713 = vst [vmem:[#allocation6_spill] sm:$0xff] %v2775_v46  ;;  %v2789_v11 = vand.u32 31, %v543_v1  ;;  %v843_v13 = vand.u32 2139095040, %v2769_v63  ;;  %v2795_v14 = vshll.u32 %v3691_v59, %v2771_v0 }
  0xf8   :  { %v649_v47 = vsub.s32 32, %v648_v3  ;;  %v642_v37 = vor.u32 8388608, %v641_v35  ;;  %v491_v20 = vshll.u32 %v2775_v46, 30  ;;  %v651_v22 = vshll.u32 %v3689_v51, %v648_v3 }
  0xf9   :  { %3714 = vst [vmem:[#allocation7_spill] sm:$0xff] %v2789_v11  ;;  %v2448_v19 = vadd.s32 4294967294, %v290_v44  ;;  %v211_v24 = vmul.f32 1.2738854, %v203_v54  ;;  %v654_v25 = vshll.u32 %v3701_v55, %v648_v3  ;;  %v657_v28 = vshll.u32 %v3684_v57, %v648_v3 }
  0xfa   :  { %v652_v12 = vshrl.u32 %v3701_v55, %v649_v47  ;;  %v655_v38 = vshrl.u32 %v3684_v57, %v649_v47  ;;  %v658_v16 = vshrl.u32 %v3691_v59, %v649_v47  ;;  %v660_v29 = vshll.u32 %v3691_v59, %v648_v3 }
  0xfb   :  { %v661_v31 = vshrl.u32 %v2606_v61, %v649_v47  ;;  %v647_v32 = vshrl.u32 %v646_v62, 5  ;;  %v664_v36 = vshrl.u32 %v3687_v5, %v649_v47  ;;  %v844_v39 = vshrl.u32 %v843_v13, 23 }
  0xfc   :  { %v653_v33 = vor.u32 %v652_v12, %v651_v22  ;;  %v656_v41 = vor.u32 %v655_v38, %v654_v25  ;;  %v659_v43 = vor.u32 %v658_v16, %v657_v28  ;;  %v663_v42 = vshll.u32 %v2606_v61, %v648_v3 }
  0xfd   :  { %v662_v45 = vor.u32 %v661_v31, %v660_v29  ;;  %v2809_v50 = vadd.s32 %v2745_v15, %v2752_v10  ;;  %v2813_v52 = vshll.u32 %v2606_v61, %v2771_v0  ;;  %v682_v58 = vshll.u32 %v642_v37, 8 }
  0xfe   :  { %v847_v60 = vand.u32 8388607, %v3682_v8  ;;  %vm2449_vm1 = vcmp.lt.s32.totalorder %v2448_v19, 0  ;;  %v2817_v62 = vsub.s32 %v488_v53, %v491_v20  ;;  %v665_v1 = vor.u32 %v664_v36, %v663_v42 }
  0xff   :  { %v205_v35 = vmul.f32 %v195_v40, %v195_v40  ;;  %vm666_vm2 = vcmp.lt.s32.totalorder %v647_v32, 1  ;;  %vm669_vm3 = vcmp.lt.s32.totalorder %v647_v32, 4  ;;  %v2470_v3 = vadd.s32 4294967169, %v844_v39 }
 0x100   :  { %v2819_v44 = vadd.f32 %v211_v24, %v118_v56  ;;  %vm668_vm4 = vcmp.lt.s32.totalorder %v647_v32, 3  ;;  %v671_v15 = vsel %vm669_vm3, %v659_v43, 2102212464  ;;  %v674_v10 = vsel %vm666_vm2, %v653_v33, %v656_v41 }
 0x101   :  { %v675_v54 = vsel %vm669_vm3, %v662_v45, 920167782  ;;  %v650_v12 = vshrl.u32 %v3689_v51, %v649_v47  ;;  %vm667_vm5 = vcmp.lt.s32.totalorder %v647_v32, 2  ;;  %v678_v37 = vsel %vm666_vm2, %v656_v41, %v659_v43 }
 0x102   :  { %v676_v13 = vsel %vm668_vm4, %v659_v43, %v675_v54  ;;  %v2825_v53 = vsel %vm2449_vm1, 0, %v2448_v19  ;;  %v679_v16 = vsel %vm669_vm3, %v665_v1, 1326507024  ;;  %v213_v20 = vmul.f32 1.2738854, %v205_v35 }
 0x103   :  { %v677_v38 = vsel %vm667_vm5, %v674_v10, %v676_v13  ;;  %v670_v56 = vsel %vm666_vm2, %v650_v12, %v653_v33  ;;  %v672_v22 = vsel %vm668_vm4, %v656_v41, %v671_v15  ;;  %v680_v24 = vsel %vm668_vm4, %v662_v45, %v679_v16 }
 0x104   :  { %v850_v25 = vadd.s32 1, %v2470_v3  ;;  %v494_v28 = vsub.s32 0, %v2817_v62  ;;  %v681_v47 = vsel %vm667_vm5, %v678_v37, %v680_v24  ;;  %v298_v19 = vsub.s32 4294967266, %v2825_v53 }
 0x105   :  { %v2831_v29 = vmul.u32.u64.low %v682_v58, %v677_v38  ;;  %v2832_v31 = vmul.u32.u64.high %v682_v58, %v677_v38, %v2831_v29  ;;  %v2836_v36 = vmul.u32.u64.low %v682_v58, %v681_v47  ;;  %v2837_v39 = vmul.u32.u64.high %v682_v58, %v681_v47, %v2836_v36 }
 0x106   :  { %v848_v43 = vor.u32 8388608, %v847_v60  ;;  %v2840_v42 = vsub.s32 32, %v2789_v11  ;;  %v673_v33 = vsel %vm667_vm5, %v670_v56, %v672_v22  ;;  %vm851_vm6 = vcmp.gt.s32.totalorder %v850_v25, 0 }
 0x107   :  { %v740_v41 = vand.u32 2139095040, %v2819_v44  ;;  %v2846_v45 = vshrl.u32 %v2606_v61, %v2787_v9  ;;  %v2850_v1 = vshrl.u32 %v3687_v5, %v2787_v9  ;;  %v852_v35 = vsel %vm851_vm6, %v850_v25, 0 }
 0x108   :  { %3715 = vst [vmem:[#allocation8_spill] sm:$0xff] %v2840_v42  ;;  %v2852_v3 = vadd.f32 %v213_v20, %v195_v40  ;;  %v2855_v60 = vmin.u32 %v494_v28, %v2817_v62  ;;  %v2859_v32 = vshll.u32 %v3691_v59, %v2789_v11  ;;  %v692_v15 = vadd.s32 1, %v2832_v31 }
 0x109   :  { %v854_v10 = vand.u32 31, %v852_v35  ;;  %v2862_v54 = vadd.s32 127, %v298_v19  ;;  %v689_v12 = vmul.u32 %v682_v58, %v673_v33  ;;  %vm691_vm7 = vc.u32 %v2837_v39, %v2831_v29 }
 0x10a   :  { %v2866_v13 = vshll.u32 %v848_v43, 8  ;;  %v693_v40 = vsel %vm691_vm7, %v692_v15, %v2832_v31  ;;  %v853_v37 = vshrl.u32 %v852_v35, 5  ;;  %v741_v16 = vshrl.u32 %v740_v41, 23 }
 0x10b   :  { %v855_v38 = vsub.s32 32, %v854_v10  ;;  %v694_v20 = vadd.s32 %v693_v40, %v689_v12  ;;  %v857_v56 = vshll.u32 %v3689_v51, %v854_v10  ;;  %v860_v22 = vshll.u32 %v3701_v55, %v854_v10 }
 0x10c   :  { %v946_v24 = vand.u32 2139095040, %v2852_v3  ;;  %v863_v28 = vshll.u32 %v3684_v57, %v854_v10  ;;  %v866_v31 = vshll.u32 %v3691_v59, %v854_v10  ;;  %v869_v43 = vshll.u32 %v2606_v61, %v854_v10 }
 0x10d   :  { %v858_v25 = vshrl.u32 %v3701_v55, %v855_v38  ;;  %v861_v58 = vshrl.u32 %v3684_v57, %v855_v38  ;;  %v864_v47 = vshrl.u32 %v3691_v59, %v855_v38  ;;  %v695_v19 = vadd.s32 536870912, %v694_v20 }
 0x10e   :  { %v867_v36 = vshrl.u32 %v2606_v61, %v855_v38  ;;  %v870_v15 = vshrl.u32 %v3687_v5, %v855_v38  ;;  %v856_v40 = vshrl.u32 %v3689_v51, %v855_v38  ;;  %vm872_vm8 = vcmp.lt.s32.totalorder %v853_v37, 1 }
 0x10f   :  { %v859_v33 = vor.u32 %v858_v25, %v857_v56  ;;  %v862_v41 = vor.u32 %v861_v58, %v860_v22  ;;  %v865_v35 = vor.u32 %v864_v47, %v863_v28  ;;  %v2880_v12 = vshrl.u32 %v695_v19, 30 }
 0x110   :  { %v868_v2 = vor.u32 %v867_v36, %v866_v31  ;;  %v871_v26 = vor.u32 %v870_v15, %v869_v43  ;;  %vm873_vm9 = vcmp.lt.s32.totalorder %v853_v37, 2  ;;  %vm874_vm10 = vcmp.lt.s32.totalorder %v853_v37, 3 }
 0x111   :  { %vm875_vm11 = vcmp.lt.s32.totalorder %v853_v37, 4  ;;  %v697_v21 = vshll.u32 %v2880_v12, 30  ;;  %v880_v48 = vsel %vm872_vm8, %v859_v33, %v862_v41  ;;  %v876_v56 = vsel %vm872_vm8, %v856_v40, %v859_v33 }
 0x112   :  { %v877_v8 = vsel %vm875_vm11, %v865_v35, 2102212464  ;;  %v881_v10 = vsel %vm875_vm11, %v868_v2, 920167782  ;;  %v884_v25 = vsel %vm872_vm8, %v862_v41, %v865_v35  ;;  %v885_v58 = vsel %vm875_vm11, %v871_v26, 1326507024 }
 0x113   :  { %v882_v22 = vsel %vm874_vm10, %v865_v35, %v881_v10  ;;  %v2884_v28 = vsub.s32 %v694_v20, %v697_v21  ;;  %v878_v47 = vsel %vm874_vm10, %v862_v41, %v877_v8  ;;  %v886_v19 = vsel %vm874_vm10, %v868_v2, %v885_v58 }
 0x114   :  { %v883_v38 = vsel %vm873_vm9, %v880_v48, %v882_v22  ;;  %v496_v31 = vclz %v2855_v60  ;;  %v887_v36 = vsel %vm873_vm9, %v884_v25, %v886_v19  ;;  %v2466_v21 = vadd.s32 4294967169, %v741_v16 }
 0x115   :  { %v2890_v43 = vmul.u32.u64.low %v2866_v13, %v883_v38  ;;  %v2891_v15 = vmul.u32.u64.high %v2866_v13, %v883_v38, %v2890_v43  ;;  %v700_v57 = vsub.s32 0, %v2884_v28  ;;  %v2900_v26 = vshrl.u32 %v2606_v61, %v2840_v42 }
 0x116   :  { %v2895_v33 = vmul.u32.u64.low %v2866_v13, %v887_v36  ;;  %v2896_v35 = vmul.u32.u64.high %v2866_v13, %v887_v36, %v2895_v33  ;;  %v879_v2 = vsel %vm873_vm9, %v876_v56, %v878_v47  ;;  %v947_v48 = vshrl.u32 %v946_v24, 23 }
 0x117   :  { %v3686_v8 = vand.u32 2147483647, %v2819_v44  ;;  %v294_v60 = vsub.s32 32, %v2825_v53  ;;  %v2907_v20 = vshll.u32 %v2606_v61, %v2789_v11  ;;  %v2463_v41 = vmin.u32 %v700_v57, %v2884_v28 }
 0x118   :  { %v747_v40 = vadd.s32 1, %v2466_v21  ;;  %v300_v16 = vshll.u32 %v2862_v54, 23  ;;  %v2456_v10 = vadd.s32 4294967294, %v496_v31  ;;  %v898_v22 = vadd.s32 1, %v2891_v15 }
 0x119   :  { %v2474_v25 = vadd.s32 4294967169, %v947_v48  ;;  %v702_v37 = vclz %v2463_v41  ;;  %v895_v24 = vmul.u32 %v2866_v13, %v879_v2  ;;  %vm897_vm12 = vc.u32 %v2896_v35, %v2890_v43 }
 0x11a   :  { %vm748_vm13 = vcmp.gt.s32.totalorder %v747_v40, 0  ;;  %v899_v56 = vsel %vm897_vm12, %v898_v22, %v2891_v15  ;;  %v744_v57 = vand.u32 8388607, %v3686_v8  ;;  %v2919_v54 = vor.u32 %v2846_v45, %v2795_v14 }
 0x11b   :  { %v749_v58 = vsel %vm748_vm13, %v747_v40, 0  ;;  %v953_v47 = vadd.s32 1, %v2474_v25  ;;  %v2464_v38 = vadd.s32 4294967294, %v702_v37  ;;  %v900_v19 = vadd.s32 %v899_v56, %v895_v24 }
 0x11c   :  { %v751_v31 = vand.u32 31, %v749_v58  ;;  %v2924_v36 = vshrl.u32 %v2779_v4, %v294_v60  ;;  %v2928_v15 = vshrl.u32 %v3687_v5, %v2840_v42  ;;  %v2930_v33 = vor.u32 4788187, %v300_v16 }
 0x11d   :  { %vm954_vm14 = vcmp.gt.s32.totalorder %v953_v47, 0  ;;  %vm2465_vm15 = vcmp.lt.s32.totalorder %v2464_v38, 0  ;;  %v901_v21 = vadd.s32 536870912, %v900_v19  ;;  %vm2457_vm0 = vcmp.lt.s32.totalorder %v2456_v10, 0 }
 0x11e   :  { %v752_v14 = vsub.s32 32, %v751_v31  ;;  %v705_v45 = vsel %vm2465_vm15, 0, %v2464_v38  ;;  %v955_v2 = vsel %vm954_vm14, %v953_v47, 0  ;;  %v745_v48 = vor.u32 8388608, %v744_v57 }
 0x11f   :  { %v706_v41 = vsub.s32 32, %v705_v45  ;;  %v710_v40 = vsub.s32 4294967266, %v705_v45  ;;  %v2932_v22 = vshrl.u32 %v901_v21, 30  ;;  %v3688_v4 = vand.u32 2147483647, %v2852_v3 }
 0x120   :  { %v690_v60 = vadd.s32 %v2831_v29, %v2837_v39  ;;  %v2937_v25 = vshrl.u32 %v749_v58, 5  ;;  %v764_v16 = vshrl.u32 %v2606_v61, %v752_v14  ;;  %v2940_v37 = vand.u32 31, %v955_v2 }
 0x121   :  { %v2942_v24 = vsel %vm2457_vm0, 0, %v2456_v10  ;;  %v2945_v56 = vadd.s32 %v2890_v43, %v2896_v35  ;;  %v903_v47 = vshll.u32 %v2932_v22, 30  ;;  %v767_v57 = vshrl.u32 %v3687_v5, %v752_v14 }
 0x122   :  { %v708_v38 = vshrl.u32 %v690_v60, %v706_v41  ;;  %v711_v21 = vadd.s32 127, %v710_v40  ;;  %v763_v8 = vshll.u32 %v3691_v59, %v751_v31  ;;  %v2950_v29 = vshll.u32 %v745_v48, 8 }
 0x123   :  { %v2952_v39 = vsub.s32 %v900_v19, %v903_v47  ;;  %v766_v58 = vshll.u32 %v2606_v61, %v751_v31  ;;  %v2956_v10 = vsub.s32 32, %v2940_v37  ;;  %v2960_v43 = vand.u32 8388607, %v3688_v4 }
 0x124   :  { %v707_v35 = vshll.u32 %v2884_v28, %v705_v45  ;;  %v765_v13 = vor.u32 %v764_v16, %v763_v8  ;;  %vm772_vm1 = vcmp.lt.s32.totalorder %v2937_v25, 4  ;;  %v2964_v41 = vshrl.u32 %v955_v2, 5 }
 0x125   :  { %v906_v48 = vsub.s32 0, %v2952_v39  ;;  %v768_v19 = vor.u32 %v767_v57, %v766_v58  ;;  %v969_v40 = vshll.u32 %v3691_v59, %v2940_v37  ;;  %v753_v60 = vshrl.u32 %v3689_v51, %v752_v14 }
 0x126   :  { %v2970_v47 = vor.u32 %v708_v38, %v707_v35  ;;  %v712_v5 = vshll.u32 %v711_v21, 23  ;;  %v754_v4 = vshll.u32 %v3689_v51, %v751_v31  ;;  %v755_v28 = vshrl.u32 %v3701_v55, %v752_v14 }
 0x127   :  { %v2471_v8 = vmin.u32 %v906_v48, %v2952_v39  ;;  %v970_v45 = vshrl.u32 %v2606_v61, %v2956_v10  ;;  %v757_v2 = vshll.u32 %v3701_v55, %v751_v31  ;;  %v3716_v16 = vmov 2131351028  }
 0x128   :  { %v758_v57 = vshrl.u32 %v3716_v16, %v752_v14  ;;  %v778_v58 = vsel %vm772_vm1, %v765_v13, 920167782  ;;  %v972_v38 = vshll.u32 %v2606_v61, %v2940_v37  ;;  %v3717_v21 = vmov 1326507024  }
 0x129   :  { %v973_v35 = vshrl.u32 %v3717_v21, %v2956_v10  ;;  %v756_v51 = vor.u32 %v755_v28, %v754_v4  ;;  %v908_v59 = vclz %v2471_v8  ;;  %v760_v48 = vshll.u32 %v3716_v16, %v751_v31 }
 0x12a   :  { %v759_v18 = vor.u32 %v758_v57, %v757_v2  ;;  %v3718_v46 = vmov 2102212464   ;;  %v2987_v17 = vor.u32 4788187, %v712_v5  ;;  %v716_v55 = vcvt.s32.f32 %v2970_v47 }
 0x12b   :  { %v761_v23 = vshrl.u32 %v3718_v46, %v752_v14  ;;  %v782_v11 = vsel %vm772_vm1, %v768_v19, 1326507024  ;;  %vm978_vm2 = vcmp.lt.s32.totalorder %v2964_v41, 4  ;;  %v2472_v61 = vadd.s32 4294967294, %v908_v59 }
 0x12c   :  { %v971_v42 = vor.u32 %v970_v45, %v969_v40  ;;  %vm769_vm3 = vcmp.lt.s32.totalorder %v2937_v25, 1  ;;  %v974_v4 = vor.u32 %v973_v35, %v972_v38  ;;  %vm770_vm4 = vcmp.lt.s32.totalorder %v2937_v25, 2 }
 0x12d   :  { %v762_v30 = vor.u32 %v761_v23, %v760_v48  ;;  %vm771_vm5 = vcmp.lt.s32.totalorder %v2937_v25, 3  ;;  %v777_v31 = vsel %vm769_vm3, %v756_v51, %v759_v18  ;;  %vm2473_vm6 = vcmp.lt.s32.totalorder %v2472_v61, 0 }
 0x12e   :  { %v783_v28 = vsel %vm771_vm5, %v765_v13, %v782_v11  ;;  %v714_v19 = vand.u32 2147483647, %v2987_v17  ;;  %v2999_v8 = vsel %vm2473_vm6, 0, %v2472_v61  ;;  %v984_v45 = vsel %vm978_vm2, %v971_v42, 920167782 }
 0x12f   :  { %v774_v5 = vsel %vm772_vm1, %v762_v30, 2102212464  ;;  %v779_v14 = vsel %vm771_vm5, %v762_v30, %v778_v58  ;;  %v781_v23 = vsel %vm769_vm3, %v759_v18, %v762_v30  ;;  %v916_v40 = vsub.s32 4294967266, %v2999_v8 }
 0x130   :  { %v780_v59 = vsel %vm770_vm4, %v777_v31, %v779_v14  ;;  %v773_v2 = vsel %vm769_vm3, %v753_v60, %v756_v51  ;;  %v775_v57 = vsel %vm771_vm5, %v759_v18, %v774_v5  ;;  %v784_v38 = vsel %vm770_vm4, %v781_v23, %v783_v28 }
 0x131   :  { %v3009_v11 = vmul.u32.u64.low %v2950_v29, %v780_v59  ;;  %v3010_v13 = vmul.u32.u64.high %v2950_v29, %v780_v59, %v3009_v11  ;;  %v3719_v17 = vmov 683565275   ;;  %v912_v30 = vsub.s32 32, %v2999_v8 }
 0x132   :  { %v960_v58 = vshll.u32 %v3719_v17, %v2940_v37  ;;  %v917_v21 = vadd.s32 127, %v916_v40  ;;  %v3017_v35 = vmul.u32.u64.low %v2950_v29, %v784_v38  ;;  %v3018_v48 = vmul.u32.u64.high %v2950_v29, %v784_v38, %v3017_v35 }
 0x133   :  { %v776_v18 = vsel %vm770_vm4, %v773_v2, %v775_v57  ;;  %v3720_v51 = vmov 2475754826   ;;  %v964_v31 = vshrl.u32 %v3716_v16, %v2956_v10  ;;  %v988_v5 = vsel %vm978_vm2, %v974_v4, 1326507024 }
 0x134   :  { %v961_v60 = vshrl.u32 %v3720_v51, %v2956_v10  ;;  %v963_v61 = vshll.u32 %v3720_v51, %v2940_v37  ;;  %v951_v14 = vor.u32 8388608, %v2960_v43  ;;  %v959_v28 = vshrl.u32 %v3719_v17, %v2956_v10 }
 0x135   :  { %v967_v25 = vshrl.u32 %v3718_v46, %v2956_v10  ;;  %v795_v59 = vadd.s32 1, %v3010_v13  ;;  %v966_v2 = vshll.u32 %v3716_v16, %v2940_v37  ;;  %v914_v57 = vshrl.u32 %v2945_v56, %v912_v30 }
 0x136   :  { %v962_v23 = vor.u32 %v961_v60, %v960_v58  ;;  %v965_v40 = vor.u32 %v964_v31, %v963_v61  ;;  %v918_v38 = vshll.u32 %v917_v21, 23  ;;  %v792_v4 = vmul.u32 %v2950_v29, %v776_v18 }
 0x137   :  { %vm794_vm7 = vc.u32 %v3018_v48, %v3009_v11  ;;  %v968_v35 = vor.u32 %v967_v25, %v966_v2  ;;  %vm975_vm8 = vcmp.lt.s32.totalorder %v2964_v41, 1  ;;  %vm977_vm9 = vcmp.lt.s32.totalorder %v2964_v41, 3 }
 0x138   :  { %v796_v43 = vsel %vm794_vm7, %v795_v59, %v3010_v13  ;;  %vm976_vm10 = vcmp.lt.s32.totalorder %v2964_v41, 2  ;;  %v983_v58 = vsel %vm975_vm8, %v962_v23, %v965_v40  ;;  %v989_v37 = vsel %vm977_vm9, %v971_v42, %v988_v5 }
 0x139   :  { %v797_v10 = vadd.s32 %v796_v43, %v792_v4  ;;  %v980_v56 = vsel %vm978_vm2, %v968_v35, 2102212464  ;;  %v985_v30 = vsel %vm977_vm9, %v968_v35, %v984_v45  ;;  %v987_v29 = vsel %vm975_vm8, %v965_v40, %v968_v35 }
 0x13a   :  { %v991_v21 = vshll.u32 %v951_v14, 8  ;;  %vm360_vm11 = vcmp.lt.s32.totalorder %v2781_v6, 4  ;;  %v979_v13 = vsel %vm975_vm8, %v959_v28, %v962_v23  ;;  %v981_v60 = vsel %vm977_vm9, %v965_v40, %v980_v56 }
 0x13b   :  { %v798_v18 = vadd.s32 536870912, %v797_v10  ;;  %v986_v61 = vsel %vm976_vm10, %v983_v58, %v985_v30  ;;  %v913_v31 = vshll.u32 %v2952_v39, %v2999_v8  ;;  %v990_v42 = vsel %vm976_vm10, %v987_v29, %v989_v37 }
 0x13c   :  { %v3055_v5 = vmul.u32.u64.low %v991_v21, %v986_v61  ;;  %v3056_v25 = vmul.u32.u64.high %v991_v21, %v986_v61, %v3055_v5  ;;  %v919_v45 = vor.u32 4788187, %v918_v38  ;;  %v3721_v28 = vshll.u32 %v2763_v34, %v2825_v53 }
 0x13d   :  { %v799_v14 = vshrl.u32 %v798_v18, 30  ;;  %v3059_v59 = vmul.u32.u64.low %v991_v21, %v990_v42  ;;  %v3060_v2 = vmul.u32.u64.high %v991_v21, %v990_v42, %v3059_v59  ;;  %v504_v40 = vsub.s32 4294967266, %v2942_v24 }
 0x13e   :  { %v297_v23 = vor.u32 %v2924_v36, %v3721_v28  ;;  %v356_v39 = vor.u32 %v2850_v1, %v2813_v52  ;;  %vm636_vm12 = vcmp.lt.s32.totalorder %v2683_v49, 0  ;;  %v982_v8 = vsel %vm976_vm10, %v979_v13, %v981_v60 }
 0x13f   :  { %v3074_v38 = vor.u32 %v2900_v26, %v2859_v32  ;;  %v717_v4 = vmul.f32 %v716_v55, %v714_v19  ;;  %v915_v34 = vor.u32 %v914_v57, %v913_v31  ;;  %v800_v53 = vshll.u32 %v799_v14, 30 }
 0x140   :  { %v302_v36 = vand.u32 2147483647, %v2930_v33  ;;  %v562_v43 = vor.u32 %v2928_v15, %v2907_v20  ;;  %vm566_vm13 = vcmp.lt.s32.totalorder %v2783_v7, 4  ;;  %v1001_v52 = vadd.s32 1, %v3056_v25 }
 0x141   :  { %v920_v1 = vand.u32 2147483647, %v919_v45  ;;  %v3083_v41 = vsub.s32 %v797_v10, %v800_v53  ;;  %v998_v35 = vmul.u32 %v991_v21, %v982_v8  ;;  %vm1000_vm14 = vc.u32 %v3060_v2, %v3055_v5 }
 0x142   :  { %v304_v32 = vcvt.s32.f32 %v297_v23  ;;  %v500_v55 = vsub.s32 32, %v2942_v24  ;;  %v505_v26 = vadd.s32 127, %v504_v40  ;;  %v1002_v33 = vsel %vm1000_vm14, %v1001_v52, %v3056_v25 }
 0x143   :  { %v718_v47 = vxor.u32 2147483648, %v717_v4  ;;  %v922_v19 = vcvt.s32.f32 %v915_v34  ;;  %v803_v20 = vsub.s32 0, %v3083_v41  ;;  %v1003_v15 = vadd.s32 %v1002_v33, %v998_v35 }
 0x144   :  { %v3093_v57 = vsel %vm360_vm11, %v2919_v54, 920167782  ;;  %v3097_v10 = vsel %vm360_vm11, %v356_v39, 1326507024  ;;  %v823_v58 = vsub.s32 4, %v799_v14  ;;  %v720_v37 = vsub.s32 4, %v2880_v12 }
 0x145   :  { %v3100_v56 = vmul.f32 %v304_v32, %v302_v36  ;;  %v923_v30 = vmul.f32 %v922_v19, %v920_v1  ;;  %v2467_v29 = vmin.u32 %v803_v20, %v3083_v41  ;;  %v1004_v21 = vadd.s32 536870912, %v1003_v15 }
 0x146   :  { %v502_v18 = vshrl.u32 %v2809_v50, %v500_v55  ;;  %v3107_v13 = vsel %vm566_vm13, %v3074_v38, 920167782  ;;  %v3111_v60 = vsel %vm566_vm13, %v562_v43, 1326507024  ;;  %vm842_vm15 = vcmp.lt.s32.totalorder %v2769_v63, 0 }
 0x147   :  { %v506_v61 = vshll.u32 %v505_v26, 23  ;;  %v719_v31 = vsel %vm636_vm12, %v718_v47, %v717_v4  ;;  %vm739_vm0 = vcmp.lt.s32.totalorder %v2819_v44, 0  ;;  %v805_v42 = vclz %v2467_v29 }
 0x148   :  { %v501_v50 = vshll.u32 %v2817_v62, %v2942_v24  ;;  %v824_v25 = vsel %vm739_vm0, %v823_v58, %v799_v14  ;;  %v3121_v45 = vshrl.u32 %v1004_v21, 30  ;;  %v721_v59 = vsel %vm636_vm12, %v720_v37, %v2880_v12 }
 0x149   :  { %v306_v28 = vxor.u32 2147483648, %v3100_v56  ;;  %v924_v23 = vxor.u32 2147483648, %v923_v30  ;;  %v2468_v40 = vadd.s32 4294967294, %v805_v42  ;;  %v3722_v39 = vand.u32 2147483647, %v2683_v49 }
 0x14a   :  { %v3129_v8 = vor.u32 %v502_v18, %v501_v50  ;;  %v3723_v62 = vand.u32 2147483647, %v2819_v44  ;;  %v1006_v14 = vshll.u32 %v3121_v45, 30  ;;  %v3139_v12 = vor.u32 4788187, %v506_v61 }
 0x14b   :  { %vm635_vm1 = vcmp.le.f32.partialorder %v3722_v39, 0.7853982  ;;  %vm2469_vm3 = vcmp.lt.s32.totalorder %v2468_v40, 0  ;;  %v793_v36 = vadd.s32 %v3009_v11, %v3018_v48  ;;  %v926_v1 = vsub.s32 4, %v2932_v22 }
 0x14c   :  { %vm3133_vm2 = vcmp.le.f32.partialorder %v3723_v62, 0.7853982  ;;  %v722_v4 = vsel %vm635_vm1, %v2683_v49, %v719_v31  ;;  %v3145_v53 = vsel %vm635_vm1, 0, %v721_v59  ;;  %v808_v43 = vsel %vm2469_vm3, 0, %v2468_v40 }
 0x14d   :  { %v3143_v34 = vsel %vm3133_vm2, 0, %v824_v25  ;;  %v3149_v52 = vsub.s32 %v1003_v15, %v1006_v14  ;;  %v925_v35 = vsel %vm842_vm15, %v924_v23, %v923_v30  ;;  %v809_v32 = vsub.s32 32, %v808_v43 }
 0x14e   :  { %v813_v55 = vsub.s32 4294967266, %v808_v43  ;;  %2569 = vcosq.f32 %v722_v4  ;;  %v1659_v26 = vadd.s32 3, %v3143_v34  ;;  %v1555_v47 = vadd.s32 3, %v3145_v53 }
 0x14f   :  { %v1009_v33 = vsub.s32 0, %v3149_v52  ;;  %v3726_v19 = vand.u32 2147483647, %v2769_v63  ;;  %v810_v48 = vshll.u32 %v3083_v41, %v808_v43  ;;  %v811_v20 = vshrl.u32 %v793_v36, %v809_v32 }
 0x150   :  { %v814_v15 = vadd.s32 127, %v813_v55  ;;  %v999_v58 = vadd.s32 %v3055_v5, %v3060_v2  ;;  %2571 = vsinq.f32 %v722_v4  ;;  %v927_v30 = vsel %vm842_vm15, %v926_v1, %v2932_v22 }
 0x151   :  { %vm3159_vm4 = vcmp.le.f32.partialorder %v3726_v19, 0.7853982  ;;  %v2475_v37 = vmin.u32 %v1009_v33, %v3149_v52  ;;  %v325_v29 = vand.u32 2147483647, %v2664_v27  ;;  %v812_v21 = vor.u32 %v811_v20, %v810_v48 }
 0x152   :  { %v815_v18 = vshll.u32 %v814_v15, 23  ;;  %v343_v61 = vshrl.u32 %v3720_v51, %v2787_v9  ;;  %v346_v41 = vshrl.u32 %v3716_v16, %v2787_v9  ;;  %v3175_v31 = vand.u32 3, %v1659_v26 }
 0x153   :  { %v1011_v5 = vclz %v2475_v37  ;;  %v3177_v2 = vand.u32 3, %v1555_v47  ;;  %v928_v42 = vsel %vm3159_vm4, %v2769_v63, %v925_v35  ;;  %v3184_v50 = vsel %vm3159_vm4, 0, %v927_v30 }
 0x154   :  { %v816_v22 = vor.u32 4788187, %v815_v18  ;;  %v342_v25 = vshll.u32 %v3719_v17, %v2771_v0  ;;  %v345_v59 = vshll.u32 %v3720_v51, %v2771_v0  ;;  %v332_v40 = vand.u32 8388607, %v325_v29 }
 0x155   :  { %v2476_v23 = vadd.s32 4294967294, %v1011_v5  ;;  %v348_v39 = vshll.u32 %v3716_v16, %v2771_v0  ;;  %v349_v62 = vshrl.u32 %v3718_v46, %v2787_v9  ;;  %v819_v4 = vcvt.s32.f32 %v812_v21 }
 0x156   :  { %v817_v14 = vand.u32 2147483647, %v816_v22  ;;  %v344_v36 = vor.u32 %v343_v61, %v342_v25  ;;  %v347_v43 = vor.u32 %v346_v41, %v345_v59  ;;  %2573 = vcosq.f32 %v928_v42 }
 0x157   :  { %vm2477_vm5 = vcmp.lt.s32.totalorder %v2476_v23, 0  ;;  %v3197_v1 = vadd.s32 3, %v3184_v50  ;;  %v350_v35 = vor.u32 %v349_v62, %v348_v39  ;;  %v1029_v26 = vsub.s32 4, %v3121_v45 }
 0x158   :  { %v820_v32 = vmul.f32 %v819_v4, %v817_v14  ;;  %v1014_v55 = vsel %vm2477_vm5, 0, %v2476_v23  ;;  %v341_v0 = vshrl.u32 %v3719_v17, %v2787_v9  ;;  %vm945_vm6 = vcmp.lt.s32.totalorder %v2852_v3, 0 }
 0x159   :  { %v1015_v33 = vsub.s32 32, %v1014_v55  ;;  %v1019_v47 = vsub.s32 4294967266, %v1014_v55  ;;  %v333_v19 = vor.u32 8388608, %v332_v40  ;;  %vm357_vm7 = vcmp.lt.s32.totalorder %v2781_v6, 1 }
 0x15a   :  { %v821_v11 = vxor.u32 2147483648, %v820_v32  ;;  %vm1561_vm8 = vcmp.eq.s32.totalorder %v3177_v2, 2  ;;  %vm358_vm9 = vcmp.lt.s32.totalorder %v2781_v6, 2  ;;  %v362_v48 = vsel %vm360_vm11, %v350_v35, 2102212464 }
 0x15b   :  { %v365_v20 = vsel %vm357_vm7, %v344_v36, %v347_v43  ;;  %v3210_v15 = vpop.eup %2569  ;;  %v1016_v9 = vshll.u32 %v3149_v52, %v1014_v55  ;;  %v1017_v37 = vshrl.u32 %v999_v58, %v1015_v33  ;;  %v1020_v30 = vadd.s32 127, %v1019_v47  ;;  %v3732_v55 = vld [vmem:[#allocation4_spill] sm:$0xff] }
 0x15c   :  { %vm359_vm10 = vcmp.lt.s32.totalorder %v2781_v6, 3  ;;  %v822_v21 = vsel %vm739_vm0, %v821_v11, %v820_v32  ;;  %v361_v18 = vsel %vm357_vm7, %v341_v0, %v344_v36  ;;  %v369_v59 = vsel %vm357_vm7, %v347_v43, %v350_v35 }
 0x15d   :  { %v363_v61 = vsel %vm359_vm10, %v347_v43, %v362_v48  ;;  %v367_v41 = vsel %vm359_vm10, %v350_v35, %v3093_v57  ;;  %v825_v5 = vsel %vm3133_vm2, %v2819_v44, %v822_v21  ;;  %v1018_v22 = vor.u32 %v1017_v37, %v1016_v9  ;;  %v3224_v58 = vpop.eup %2571  ;;  %v3734_v9 = vld [vmem:[#allocation7_spill] sm:$0xff] }
 0x15e   :  { %v1021_v25 = vshll.u32 %v1020_v30, 23  ;;  %v368_v52 = vsel %vm358_vm9, %v365_v20, %v367_v41  ;;  %2575 = vcosq.f32 %v825_v5  ;;  %v371_v23 = vsel %vm359_vm10, %v2919_v54, %v3097_v10 }
 0x15f   :  { %v373_v40 = vshll.u32 %v333_v19, 8  ;;  %2577 = vsinq.f32 %v825_v5  ;;  %v3729_v57 = vand.u32 2147483647, %v2852_v3  ;;  %v733_v62 = vxor.u32 2147483648, %v3210_v15  ;;  %v3733_v19 = vld [vmem:[#allocation8_spill] sm:$0xff] }
 0x160   :  { %v1022_v39 = vor.u32 4788187, %v1021_v25  ;;  %v372_v14 = vsel %vm358_vm9, %v369_v59, %v371_v23  ;;  %v1025_v10 = vcvt.s32.f32 %v1018_v22  ;;  %v364_v32 = vsel %vm358_vm9, %v361_v18, %v363_v61 }
 0x161   :  { %vm3232_vm11 = vcmp.le.f32.partialorder %v3729_v57, 0.7853982  ;;  %v3239_v4 = vmul.u32.u64.low %v373_v40, %v372_v14  ;;  %v3240_v36 = vmul.u32.u64.high %v373_v40, %v372_v14, %v3239_v4  ;;  %v531_v0 = vand.u32 2147483647, %v3732_v55 }
 0x162   :  { %v3242_v43 = vmul.u32.u64.low %v373_v40, %v368_v52  ;;  %v3243_v35 = vmul.u32.u64.high %v373_v40, %v368_v52, %v3242_v43  ;;  %v1023_v54 = vand.u32 2147483647, %v1022_v39  ;;  %v1030_v33 = vsel %vm945_vm6, %v1029_v26, %v3121_v45 }
 0x163   :  { %v730_v47 = vxor.u32 2147483648, %v3224_v58  ;;  %2579 = vsinq.f32 %v928_v42  ;;  %v549_v11 = vshrl.u32 %v3720_v51, %v3733_v19  ;;  %vm1558_vm12 = vcmp.eq.s32.totalorder %v3177_v2, 0  ;;  %v3265_v26 = vpop.eup %2573 }
 0x164   :  { %v1026_v48 = vmul.f32 %v1025_v10, %v1023_v54  ;;  %v1563_v6 = vsel %vm1561_vm8, %v733_v62, %v3224_v58  ;;  %v538_v20 = vand.u32 8388607, %v531_v0  ;;  %v548_v45 = vshll.u32 %v3719_v17, %v3734_v9 }
 0x165   :  { %v380_v42 = vmul.u32 %v373_v40, %v364_v32  ;;  %vm382_vm14 = vc.u32 %v3240_v36, %v3242_v43  ;;  %v383_v37 = vadd.s32 1, %v3243_v35  ;;  %v547_v30 = vshrl.u32 %v3719_v17, %v3733_v19 }
 0x166   :  { %vm1665_vm15 = vcmp.eq.s32.totalorder %v3175_v31, 2  ;;  %v1027_v21 = vxor.u32 2147483648, %v1026_v48  ;;  %v550_v18 = vor.u32 %v549_v11, %v548_v45  ;;  %v551_v61 = vshll.u32 %v3720_v51, %v3734_v9 }
 0x167   :  { %v552_v41 = vshrl.u32 %v3716_v16, %v3733_v19  ;;  %vm1662_vm0 = vcmp.eq.s32.totalorder %v3175_v31, 0  ;;  %vm1557_vm1 = vcmp.lt.s32.totalorder %v3177_v2, 2  ;;  %v384_v5 = vsel %vm382_vm14, %v383_v37, %v3243_v35 }
 0x168   :  { %v539_v22 = vor.u32 8388608, %v538_v20  ;;  %v554_v17 = vshll.u32 %v3716_v16, %v3734_v9  ;;  %v555_v25 = vshrl.u32 %v3718_v46, %v3733_v19  ;;  %v1028_v52 = vsel %vm945_vm6, %v1027_v21, %v1026_v48 }
 0x169   :  { %v385_v51 = vadd.s32 %v384_v5, %v380_v42  ;;  %v553_v59 = vor.u32 %v552_v41, %v551_v61  ;;  %vm565_vm2 = vcmp.lt.s32.totalorder %v2783_v7, 3  ;;  %vm829_vm3 = vweird.f32 %v2819_v44  ;;  %v3574_v44 = vld [vmem:[%s3674_s3 + $0x8] sm:$0xff] }
 0x16a   :  { %v1031_v23 = vsel %vm3232_vm11, %v2852_v3, %v1028_v52  ;;  %v556_v40 = vor.u32 %v555_v25, %v554_v17  ;;  %vm563_vm4 = vcmp.lt.s32.totalorder %v2783_v7, 1  ;;  %v577_v46 = vsel %vm565_vm2, %v3074_v38, %v3111_v60 }
 0x16b   :  { %2581 = vcosq.f32 %v1031_v23  ;;  %v386_v16 = vadd.s32 536870912, %v385_v51  ;;  %vm564_vm5 = vcmp.lt.s32.totalorder %v2783_v7, 2  ;;  %v571_v57 = vsel %vm563_vm4, %v550_v18, %v553_v59  ;;  %v3304_v35 = vpop.eup %2575 }
 0x16c   :  { %2583 = vsinq.f32 %v1031_v23  ;;  %v573_v39 = vsel %vm565_vm2, %v556_v40, %v3107_v13  ;;  %v575_v14 = vsel %vm563_vm4, %v553_v59, %v556_v40  ;;  %v579_v4 = vshll.u32 %v539_v22, 8  ;;  %v3314_v32 = vpop.eup %2577 }
 0x16d   :  { %v3306_v54 = vshrl.u32 %v386_v16, 30  ;;  %v568_v38 = vsel %vm566_vm13, %v556_v40, 2102212464  ;;  %v574_v60 = vsel %vm564_vm5, %v571_v57, %v573_v39  ;;  %v578_v10 = vsel %vm564_vm5, %v575_v14, %v577_v46 }
 0x16e   :  { %v836_v13 = vxor.u32 2147483648, %v3304_v35  ;;  %v1560_v19 = vsel %vm1558_vm12, %v3210_v15, %v730_v47  ;;  %v3322_v11 = vmul.u32.u64.low %v579_v4, %v578_v10  ;;  %v3323_v48 = vmul.u32.u64.high %v579_v4, %v578_v10, %v3322_v11 }
 0x16f   :  { %v833_v20 = vxor.u32 2147483648, %v3314_v32  ;;  %v3328_v9 = vsel %vm3232_vm11, 0, %v1030_v33  ;;  %v388_v45 = vshll.u32 %v3306_v54, 30  ;;  %v567_v42 = vsel %vm563_vm4, %v547_v30, %v550_v18 }
 0x170   :  { %v1667_v37 = vsel %vm1665_vm15, %v836_v13, %v3314_v32  ;;  %v569_v21 = vsel %vm565_vm2, %v553_v59, %v568_v38  ;;  %v3340_v61 = vmul.u32.u64.low %v579_v4, %v574_v60  ;;  %v3341_v41 = vmul.u32.u64.high %v579_v4, %v574_v60, %v3340_v61  ;;  %v3344_v24 = vpop.eup %2579  ;;  %v3735_v59 = vld [vmem:[#allocation2_spill] sm:$0xff] }
 0x171   :  { %vm1661_vm13 = vcmp.lt.s32.totalorder %v3175_v31, 2  ;;  %v1664_v33 = vsel %vm1662_vm0, %v3304_v35, %v833_v20  ;;  %v1564_v30 = vsel %vm1557_vm1, %v1560_v19, %v1563_v6  ;;  %v3354_v18 = vsub.s32 %v385_v51, %v388_v45 }
 0x172   :  { %v1668_v5 = vsel %vm1661_vm13, %v1664_v33, %v1667_v37  ;;  %v1867_v22 = vadd.s32 3, %v3328_v9  ;;  %vm726_vm6 = vweird.f32 %v2683_v49  ;;  %v1764_v17 = vand.u32 3, %v3197_v1 }
 0x173   :  { %v1669_v25 = vsel %vm829_vm3, nan, %v1668_v5  ;;  %v391_v52 = vsub.s32 0, %v3354_v18  ;;  %v570_v31 = vsel %vm564_vm5, %v567_v42, %v569_v21  ;;  %vm588_vm7 = vc.u32 %v3323_v48, %v3340_v61 }
 0x174   :  { %1927 = vmatprep.subr.mxu0 %v1669_v25  ;;  %v1565_v2 = vsel %vm726_vm6, nan, %v1564_v30  ;;  %v936_v6 = vxor.u32 2147483648, %v3344_v24  ;;  %v939_v51 = vxor.u32 2147483648, %v3265_v26  ;;  %v589_v1 = vadd.s32 1, %v3341_v41 }
 0x175   :  { %vm224_vm8 = vcmp.lt.s32.totalorder %v3735_v59, 0  ;;  %1928 = vmatpush1.msra.mxu0 %v1565_v2  ;;  %v2451_v23 = vmin.u32 %v391_v52, %v3354_v18  ;;  %v1868_v40 = vand.u32 3, %v1867_v22  ;;  %v586_v46 = vmul.u32 %v579_v4, %v570_v31 }
 0x176   :  { %v307_v7 = vsel %vm224_vm8, %v306_v28, %v3100_v56  ;;  %v590_v16 = vsel %vm588_vm7, %v589_v1, %v3341_v41  ;;  %v510_v57 = vcvt.s32.f32 %v3129_v8  ;;  %vm1766_vm9 = vcmp.eq.s32.totalorder %v1764_v17, 0 }
 0x177   :  { %vm1769_vm10 = vcmp.eq.s32.totalorder %v1764_v17, 2  ;;  %v393_v39 = vclz %v2451_v23  ;;  %v508_v38 = vand.u32 2147483647, %v3139_v12  ;;  %v1768_v60 = vsel %vm1766_vm9, %v3265_v26, %v936_v6 }
 0x178   :  { %v3380_v14 = vpop.eup %2581  ;;  %v1771_v56 = vsel %vm1769_vm10, %v939_v51, %v3344_v24  ;;  %v591_v28 = vadd.s32 %v590_v16, %v586_v46  ;;  %vm1035_vm11 = vweird.f32 %v2852_v3  ;;  %vm932_vm12 = vweird.f32 %v2769_v63  ;;  %v1879_v63 = vld [vmem:[%s3675_s2 + $0x8] sm:$0xff] }
 0x179   :  { %v3389_v4 = vpop.eup %2583  ;;  %v1042_v8 = vxor.u32 2147483648, %v3380_v14  ;;  %v2452_v10 = vadd.s32 4294967294, %v393_v39  ;;  %vm1873_vm14 = vcmp.eq.s32.totalorder %v1868_v40, 2  ;;  %vm1765_vm15 = vcmp.lt.s32.totalorder %v1764_v17, 2 }
 0x17a   :  { %v1039_v12 = vxor.u32 2147483648, %v3389_v4  ;;  %v592_v19 = vadd.s32 536870912, %v591_v28  ;;  %vm1870_vm0 = vcmp.eq.s32.totalorder %v1868_v40, 0  ;;  %v1772_v45 = vsel %vm1765_vm15, %v1768_v60, %v1771_v56  ;;  %v3739_v60 = vld [vmem:[#allocation5_spill] sm:$0xff] }
 0x17b   :  { %v1875_v11 = vsel %vm1873_vm14, %v1042_v8, %v3389_v4  ;;  %vm2453_vm1 = vcmp.lt.s32.totalorder %v2452_v10, 0  ;;  %vm1869_vm2 = vcmp.lt.s32.totalorder %v1868_v40, 2  ;;  %v381_v33 = vadd.s32 %v3242_v43, %v3240_v36 }
 0x17c   :  { %v1872_v42 = vsel %vm1870_vm0, %v3380_v14, %v1039_v12  ;;  %v396_v37 = vsel %vm2453_vm1, 0, %v2452_v10  ;;  %v3401_v21 = vshrl.u32 %v592_v19, 30  ;;  %v1773_v17 = vsel %vm932_vm12, nan, %v1772_v45 }
 0x17d   :  { %v1876_v41 = vsel %vm1869_vm2, %v1872_v42, %v1875_v11  ;;  %v397_v30 = vsub.s32 32, %v396_v37  ;;  %v401_v5 = vsub.s32 4294967266, %v396_v37  ;;  %v3736_v52 = vand.u32 2147483647, %v3735_v59 }
 0x17e   :  { %v1877_v22 = vsel %vm1035_vm11, nan, %v1876_v41  ;;  %v594_v25 = vshll.u32 %v3401_v21, 30  ;;  %v398_v2 = vshll.u32 %v3354_v18, %v396_v37  ;;  %v411_v23 = vsub.s32 4, %v3306_v54 }
 0x17f   :  { %vm3412_vm4 = vcmp.le.f32.partialorder %v3736_v52, 0.7853982  ;;  %2016 = vmatprep.subr.mxu1 %v1877_v22  ;;  %v399_v36 = vshrl.u32 %v381_v33, %v397_v30  ;;  %v402_v43 = vadd.s32 127, %v401_v5  ;;  %v511_v46 = vmul.f32 %v510_v57, %v508_v38  ;;  %v3743_v30 = vld [vmem:[#allocation3_spill] sm:$0xff] }
 0x180   :  { %v310_v1 = vsel %vm3412_vm4, %v3735_v59, %v307_v7  ;;  %2017 = vmatpush1.msra.mxu1 %v1773_v17  ;;  %v595_v40 = vsub.s32 %v591_v28, %v594_v25  ;;  %v308_v56 = vsub.s32 4, %v3739_v60  ;;  %vm327_vm5 = vcmp.lt.s32.totalorder %v2664_v27, 0 }
 0x181   :  { %v400_v16 = vor.u32 %v399_v36, %v398_v2  ;;  %v403_v39 = vshll.u32 %v402_v43, 23  ;;  %2585 = vcosq.f32 %v310_v1  ;;  %v412_v19 = vsel %vm327_vm5, %v411_v23, %v3306_v54  ;;  %v3742_v54 = vld [vmem:[#allocation6_spill] sm:$0xff] }
 0x182   :  { %v597_v10 = vsub.s32 0, %v595_v40  ;;  %2587 = vsinq.f32 %v310_v1  ;;  %v512_v11 = vxor.u32 2147483648, %v511_v46  ;;  %v309_v57 = vsel %vm224_vm8, %v308_v56, %v3739_v60 }
 0x183   :  { %v404_v18 = vor.u32 4788187, %v403_v39  ;;  %v407_v42 = vcvt.s32.f32 %v400_v16  ;;  %vm3431_vm13 = vcmp.le.f32.partialorder %v325_v29, 0.7853982  ;;  %v514_v33 = vsub.s32 4, %v3742_v54 }
 0x184   :  { %v2459_v7 = vmin.u32 %v597_v10, %v595_v40  ;;  %v3437_v41 = vsel %vm3431_vm13, 0, %v412_v19  ;;  %vm430_vm7 = vcmp.lt.s32.totalorder %v3743_v30, 0  ;;  %v3443_v22 = vsel %vm3412_vm4, 0, %v309_v57 }
 0x185   :  { %v405_v45 = vand.u32 2147483647, %v404_v18  ;;  %v513_v17 = vsel %vm430_vm7, %v512_v11, %v511_v46  ;;  %v587_v25 = vadd.s32 %v3340_v61, %v3323_v48  ;;  %v1243_v52 = vadd.s32 3, %v3437_v41 }
 0x186   :  { %v599_v28 = vclz %v2459_v7  ;;  %v3744_v2 = vand.u32 2147483647, %v3743_v30  ;;  %v1036_v43 = vand.u32 3, %v3328_v9  ;;  %v1139_v23 = vadd.s32 3, %v3443_v22 }
 0x187   :  { %v408_v37 = vmul.f32 %v407_v42, %v405_v45  ;;  %v515_v46 = vsel %vm430_vm7, %v514_v33, %v3742_v54  ;;  %v933_v60 = vand.u32 3, %v3184_v50  ;;  %v3471_v7 = vand.u32 3, %v1243_v52 }
 0x188   :  { %v2460_v5 = vadd.s32 4294967294, %v599_v28  ;;  %vm3450_vm9 = vcmp.le.f32.partialorder %v3744_v2, 0.7853982  ;;  %vm1038_vm10 = vcmp.eq.s32.totalorder %v1036_v43, 0  ;;  %vm533_vm14 = vcmp.lt.s32.totalorder %v3732_v55, 0 }
 0x189   :  { %v409_v29 = vxor.u32 2147483648, %v408_v37  ;;  %v516_v39 = vsel %vm3450_vm9, %v3743_v30, %v513_v17  ;;  %v1040_v18 = vsel %vm1038_vm10, %v3380_v14, %v1039_v12  ;;  %v3476_v11 = vsel %vm3450_vm9, 0, %v515_v46 }
 0x18a   :  { %vm2461_vm8 = vcmp.lt.s32.totalorder %v2460_v5, 0  ;;  %vm1041_vm15 = vcmp.eq.s32.totalorder %v1036_v43, 2  ;;  %vm3482_vm0 = vcmp.le.f32.partialorder %v531_v0, 0.7853982  ;;  %vm1037_vm1 = vcmp.lt.s32.totalorder %v1036_v43, 2 }
 0x18b   :  { %v410_v31 = vsel %vm327_vm5, %v409_v29, %v408_v37  ;;  %v602_v1 = vsel %vm2461_vm8, 0, %v2460_v5  ;;  %v1043_v42 = vsel %vm1041_vm15, %v1042_v8, %v3389_v4  ;;  %v617_v57 = vsub.s32 4, %v3401_v21 }
 0x18c   :  { %v413_v48 = vsel %vm3431_vm13, %v2664_v27, %v410_v31  ;;  %v603_v61 = vsub.s32 32, %v602_v1  ;;  %v607_v16 = vsub.s32 4294967266, %v602_v1  ;;  %v604_v9 = vshll.u32 %v595_v40, %v602_v1 }
 0x18d   :  { %2589 = vcosq.f32 %v413_v48  ;;  %v1140_v38 = vand.u32 3, %v1139_v23  ;;  %v3490_v28 = vsel %vm1037_vm1, %v1040_v18, %v1043_v42  ;;  %v830_v0 = vand.u32 3, %v3143_v34 }
 0x18e   :  { %2591 = vsinq.f32 %v413_v48  ;;  %v605_v56 = vshrl.u32 %v587_v25, %v603_v61  ;;  %v608_v10 = vadd.s32 127, %v607_v16  ;;  %v3469_v19 = vpop.eup %2585  ;;  %vm935_vm2 = vcmp.eq.s32.totalorder %v933_v60, 0 }
 0x18f   :  { %v3478_v40 = vpop.eup %2587  ;;  %2593 = vcosq.f32 %v516_v39  ;;  %v321_v33 = vxor.u32 2147483648, %v3469_v19  ;;  %v937_v14 = vsel %vm935_vm2, %v3265_v26, %v936_v6  ;;  %vm938_vm4 = vcmp.eq.s32.totalorder %v933_v60, 2 }
 0x190   :  { %v606_v12 = vor.u32 %v605_v56, %v604_v9  ;;  %v609_v45 = vshll.u32 %v608_v10, 23  ;;  %2595 = vsinq.f32 %v516_v39  ;;  %v318_v54 = vxor.u32 2147483648, %v3478_v40 }
 0x191   :  { %vm934_vm5 = vcmp.lt.s32.totalorder %v933_v60, 2  ;;  %v940_v5 = vsel %vm938_vm4, %v939_v51, %v3344_v24  ;;  %vm1246_vm13 = vcmp.eq.s32.totalorder %v3471_v7, 0  ;;  %v618_v34 = vsel %vm533_vm14, %v617_v57, %v3401_v21  ;;  %v3555_v60 = vld [vmem:[%s3674_s3] sm:$0xff] }
 0x192   :  { %v610_v37 = vor.u32 4788187, %v609_v45  ;;  %v613_v8 = vcvt.s32.f32 %v606_v12  ;;  %vm1142_vm7 = vcmp.eq.s32.totalorder %v1140_v38, 0  ;;  %vm1145_vm8 = vcmp.eq.s32.totalorder %v1140_v38, 2 }
 0x193   :  { %v3505_v17 = vsel %vm934_vm5, %v937_v14, %v940_v5  ;;  %vm1245_vm9 = vcmp.lt.s32.totalorder %v3471_v7, 2  ;;  %vm832_vm10 = vcmp.eq.s32.totalorder %v830_v0, 0  ;;  %vm835_vm15 = vcmp.eq.s32.totalorder %v830_v0, 2 }
 0x194   :  { %v611_v4 = vand.u32 2147483647, %v610_v37  ;;  %v727_v29 = vand.u32 3, %v3145_v53  ;;  %vm417_vm1 = vweird.f32 %v2664_v27  ;;  %v1144_v26 = vsel %vm1142_vm7, %v3469_v19, %v318_v54 }
 0x195   :  { %v1147_v24 = vsel %vm1145_vm8, %v321_v33, %v3478_v40  ;;  %v834_v51 = vsel %vm832_vm10, %v3304_v35, %v833_v20  ;;  %v837_v21 = vsel %vm835_vm15, %v836_v13, %v3314_v32  ;;  %vm1249_vm2 = vcmp.eq.s32.totalorder %v3471_v7, 2 }
 0x196   :  { %v614_v6 = vmul.f32 %v613_v8, %v611_v4  ;;  %vm314_vm4 = vweird.f32 %v3735_v59  ;;  %v1347_v53 = vadd.s32 3, %v3476_v11  ;;  %v418_v52 = vand.u32 3, %v3437_v41  ;;  %v1884_v59 = vld [vmem:[%s3674_s3 + $0x10] sm:$0xff] }
 0x197   :  { %v3524_v2 = vsel %vm3482_vm0, 0, %v618_v34  ;;  %vm1141_vm5 = vcmp.lt.s32.totalorder %v1140_v38, 2  ;;  %vm831_vm7 = vcmp.lt.s32.totalorder %v830_v0, 2  ;;  %v315_v20 = vand.u32 3, %v3443_v22 }
 0x198   :  { %v615_v25 = vxor.u32 2147483648, %v614_v6  ;;  %v1148_v32 = vsel %vm1141_vm5, %v1144_v26, %v1147_v24  ;;  %v838_v13 = vsel %vm831_vm7, %v834_v51, %v837_v21  ;;  %vm729_vm8 = vcmp.eq.s32.totalorder %v727_v29, 0 }
 0x199   :  { %v731_v1 = vsel %vm729_vm8, %v3210_v15, %v730_v47  ;;  %vm732_vm10 = vcmp.eq.s32.totalorder %v727_v29, 2  ;;  %vm423_vm15 = vcmp.eq.s32.totalorder %v418_v52, 2  ;;  %vm317_vm5 = vcmp.eq.s32.totalorder %v315_v20, 0 }
 0x19a   :  { %v2590_v36 = vpop.eup %2589  ;;  %v616_v35 = vsel %vm533_vm14, %v615_v25, %v614_v6  ;;  %v734_v22 = vsel %vm732_vm10, %v733_v62, %v3224_v58  ;;  %vm420_vm14 = vcmp.eq.s32.totalorder %v418_v52, 0  ;;  %vm728_vm7 = vcmp.lt.s32.totalorder %v727_v29, 2 }
 0x19b   :  { %v2592_v43 = vpop.eup %2591  ;;  %v424_v31 = vxor.u32 2147483648, %v2590_v36  ;;  %v619_v41 = vsel %vm3482_vm0, %v3732_v55, %v616_v35  ;;  %vm320_vm0 = vcmp.eq.s32.totalorder %v315_v20, 2  ;;  %v319_v58 = vsel %vm317_vm5, %v3469_v19, %v318_v54  ;;  %v1878_v35 = vld [vmem:[%s3675_s2] sm:$0xff] }
 0x19c   :  { %v421_v23 = vxor.u32 2147483648, %v2592_v43  ;;  %2597 = vcosq.f32 %v619_v41  ;;  %v3540_v48 = vpop.eup %2593  ;;  %v322_v62 = vsel %vm320_vm0, %v321_v33, %v3478_v40  ;;  %v735_v56 = vsel %vm728_vm7, %v731_v1, %v734_v22 }
 0x19d   :  { %v1251_v46 = vsel %vm1249_vm2, %v424_v31, %v2592_v43  ;;  %2599 = vsinq.f32 %v619_v41  ;;  %v425_v16 = vsel %vm423_vm15, %v424_v31, %v2592_v43  ;;  %v3544_v39 = vpop.eup %2595  ;;  %vm419_vm2 = vcmp.lt.s32.totalorder %v418_v52, 2 }
 0x19e   :  { %v1248_v61 = vsel %vm1246_vm13, %v2590_v36, %v421_v23  ;;  %v422_v47 = vsel %vm420_vm14, %v2590_v36, %v421_v23  ;;  %vm1886_vm13 = vcmask 130048   ;;  %v1149_v10 = vsel %vm314_vm4, nan, %v1148_v32 }
 0x19f   :  { %v1252_v15 = vsel %vm1245_vm9, %v1248_v61, %v1251_v46  ;;  %v426_v18 = vsel %vm419_vm2, %v422_v47, %v425_v16  ;;  %vm316_vm9 = vcmp.lt.s32.totalorder %v315_v20, 2  ;;  %v1451_v19 = vadd.s32 3, %v3524_v2 }
 0x1a0   :  { %v1253_v9 = vsel %vm417_vm1, nan, %v1252_v15  ;;  %v839_v7 = vsel %vm829_vm3, nan, %v838_v13  ;;  %v323_v40 = vsel %vm316_vm9, %v319_v58, %v322_v62  ;;  %v1348_v50 = vand.u32 3, %v1347_v53 }
 0x1a1   :  { %1929 = vmatprep.subr.mxu0 %v1253_v9  ;;  %v736_v12 = vsel %vm726_vm6, nan, %v735_v56  ;;  %v524_v45 = vxor.u32 2147483648, %v3544_v39  ;;  %v527_v42 = vxor.u32 2147483648, %v3540_v48  ;;  %v427_v57 = vsel %vm417_vm1, nan, %v426_v18 }
 0x1a2   :  { %1930 = vmatpush1.msra.mxu0 %v1149_v10  ;;  %v3749_v38 = vmov 0.0   ;;  %v324_v49 = vsel %vm314_vm4, nan, %v323_v40  ;;  %v1452_v37 = vand.u32 3, %v1451_v19  ;;  %vm1350_vm3 = vcmp.eq.s32.totalorder %v1348_v50, 0 }
 0x1a3   :  { %2510 = vmatmul.mubr.msk.f32.vlgmr.msra.gmra.mxu0 %vm1886_vm13, %v3555_v60  ;;  %2117 = vmatprep.subr.mxu0 %v839_v7  ;;  %vm1353_vm6 = vcmp.eq.s32.totalorder %v1348_v50, 2  ;;  %v1352_v27 = vsel %vm1350_vm3, %v3540_v48, %v524_v45  ;;  %v624_v54 = vand.u32 3, %v3524_v2  ;;  %v521_v33 = vand.u32 3, %v3476_v11  ;;  %v1885_v11 = vld [vmem:[%s3674_s3 + $0x18] sm:$0xff] }
 0x1a4   :  { %2118 = vmatpush1.msra.mxu0 %v736_v12  ;;  %1969 = vmatprep.mubr.f32.mxu0 %v3749_v38  ;;  %v1355_v0 = vsel %vm1353_vm6, %v527_v42, %v3544_v39  ;;  %vm1453_vm1 = vcmp.lt.s32.totalorder %v1452_v37, 2  ;;  %vm1349_vm4 = vcmp.lt.s32.totalorder %v1348_v50, 2  ;;  %vm1454_vm8 = vcmp.eq.s32.totalorder %v1452_v37, 0 }
 0x1a5   :  { %2119 = vmatprep.subr.mxu0 %v427_v57  ;;  %vm1457_vm10 = vcmp.eq.s32.totalorder %v1452_v37, 2  ;;  %v1356_v34 = vsel %vm1349_vm4, %v1352_v27, %v1355_v0  ;;  %vm626_vm14 = vcmp.eq.s32.totalorder %v624_v54, 0  ;;  %vm629_vm15 = vcmp.eq.s32.totalorder %v624_v54, 2 }
 0x1a6   :  { %2120 = vmatpush1.msra.mxu0 %v324_v49  ;;  %vm523_vm5 = vcmp.eq.s32.totalorder %v521_v33, 0  ;;  %vm526_vm0 = vcmp.eq.s32.totalorder %v521_v33, 2  ;;  %vm623_vm7 = vweird.f32 %v3732_v55  ;;  %vm520_vm2 = vweird.f32 %v3743_v30  ;;  %v1880_v55 = vld [vmem:[%s3675_s2 + $0x10] sm:$0xff]  ;;  %v1881_v30 = vld [vmem:[%s3675_s2 + $0x18] sm:$0xff] }
 0x1a7   :  { %2511 = vmatmul.mubr.msk.f32.gmra.mxu0 %vm1886_vm13, %v3574_v44  ;;  %v525_v21 = vsel %vm523_vm5, %v3540_v48, %v524_v45  ;;  %v528_v25 = vsel %vm526_vm0, %v527_v42, %v3544_v39  ;;  %vm625_vm9 = vcmp.lt.s32.totalorder %v624_v54, 2  ;;  %v1357_v52 = vsel %vm520_vm2, nan, %v1356_v34 }
 0x1a8   :  { %1975 = vmatprep.mubr.f32.mxu0 %v3749_v38  ;;  %vm522_vm3 = vcmp.lt.s32.totalorder %v521_v33, 2  ;;  %v1045_v20 = vsel %vm1035_vm11, nan, %v3490_v28  ;;  %v942_v32 = vsel %vm932_vm12, nan, %v3505_v17  ;;  %vm2284_vm11 = vcmask 261120  }
 0x1a9   :  { %v2598_v14 = vpop.eup %2597  ;;  %v529_v36 = vsel %vm522_vm3, %v525_v21, %v528_v25 }
 0x1aa   :  { %v2600_v4 = vpop.eup %2599  ;;  %v630_v8 = vxor.u32 2147483648, %v2598_v14  ;;  %v530_v3 = vsel %vm520_vm2, nan, %v529_v36 }
 0x1ab   :  { %v627_v5 = vxor.u32 2147483648, %v2600_v4  ;;  %2512 = vmatmul.mubr.msk.f32.gmra.mxu0 %vm1886_vm13, %v1884_v59 }
 0x1ac   :  { %v1459_v6 = vsel %vm1457_vm10, %v630_v8, %v2600_v4  ;;  %1981 = vmatprep.mubr.f32.mxu0 %v3749_v38  ;;  %v631_v24 = vsel %vm629_vm15, %v630_v8, %v2600_v4 }
 0x1ad   :  { %v1456_v29 = vsel %vm1454_vm8, %v2598_v14, %v627_v5  ;;  %v628_v26 = vsel %vm626_vm14, %v2598_v14, %v627_v5 }
 0x1ae   :  { %v1460_v51 = vsel %vm1453_vm1, %v1456_v29, %v1459_v6  ;;  %v632_v2 = vsel %vm625_vm9, %v628_v26, %v631_v24  ;;  %v2267_v29 = vld [vmem:[%s3676_s4] sm:$0xff] }
 0x1af   :  { %v1461_v53 = vsel %vm623_vm7, nan, %v1460_v51  ;;  %2513 = vmatmul.mubr.msk.f32.gmra.mxu0 %vm1886_vm13, %v1885_v11  ;;  %v633_v13 = vsel %vm623_vm7, nan, %v632_v2 }
 0x1b0   :  { %2018 = vmatprep.subr.mxu1 %v1461_v53  ;;  %2153 = vmatprep.mubr.f32.mxu0 %v3749_v38 }
 0x1b1   :  { %2019 = vmatpush1.msra.mxu1 %v1357_v52 }
 0x1b2   :  { %2514 = vmatmul.mubr.msk.f32.vlgmr.msra.gmra.mxu1 %vm1886_vm13, %v3555_v60  ;;  %2206 = vmatprep.subr.mxu1 %v1045_v20 }
 0x1b3   :  { %2207 = vmatpush1.msra.mxu1 %v942_v32  ;;  %2058 = vmatprep.mubr.f32.mxu1 %v3749_v38 }
 0x1b4   :  { %2208 = vmatprep.subr.mxu1 %v633_v13  ;;  %2518 = vmatmul.mubr.msk.f32.vlgmr.msra.gmra.mxu0 %vm1886_vm13, %v1878_v35 }
 0x1b5   :  { %2209 = vmatpush1.msra.mxu1 %v530_v3  ;;  %2159 = vmatprep.mubr.f32.mxu0 %v3749_v38 }
 0x1b6   :  { %2515 = vmatmul.mubr.msk.f32.gmra.mxu1 %vm1886_vm13, %v3574_v44 }
 0x1b7   :  { %2064 = vmatprep.mubr.f32.mxu1 %v3749_v38 }
 0x1b8   :  { %2519 = vmatmul.mubr.msk.f32.gmra.mxu0 %vm1886_vm13, %v1879_v63 }
 0x1b9   :  { %2165 = vmatprep.mubr.f32.mxu0 %v3749_v38 }
 0x1ba   :  { %2516 = vmatmul.mubr.msk.f32.gmra.mxu1 %vm1886_vm13, %v1884_v59 }
 0x1bb   :  { %2070 = vmatprep.mubr.f32.mxu1 %v3749_v38 }
 0x1bc   :  { %2520 = vmatmul.mubr.msk.f32.gmra.mxu0 %vm1886_vm13, %v1880_v55 }
 0x1bd   :  { %2171 = vmatprep.mubr.f32.mxu0 %v3749_v38 }
 0x1be   :  { %2517 = vmatmul.mubr.msk.f32.gmra.mxu1 %vm1886_vm13, %v1885_v11 }
 0x1bf   :  { %2242 = vmatprep.mubr.f32.mxu1 %v3749_v38 }
 0x1c0   :  { %2521 = vmatmul.mubr.msk.f32.gmra.mxu0 %vm1886_vm13, %v1881_v30 }
 0x1c1   :  { %2352 = vmatprep.mubr.f32.mxu0 %v3749_v38 }
 0x1c2   :  { %2522 = vmatmul.mubr.msk.f32.vlgmr.msra.gmra.mxu1 %vm1886_vm13, %v1878_v35 }
 0x1c3   :  { %2248 = vmatprep.mubr.f32.mxu1 %v3749_v38 }
 0x1c6   :  { %2523 = vmatmul.mubr.msk.f32.gmra.mxu1 %vm1886_vm13, %v1879_v63 }
 0x1c7   :  { %2254 = vmatprep.mubr.f32.mxu1 %v3749_v38 }
 0x1ca   :  { %2524 = vmatmul.mubr.msk.f32.gmra.mxu1 %vm1886_vm13, %v1880_v55 }
 0x1cb   :  { %2260 = vmatprep.mubr.f32.mxu1 %v3749_v38 }
 0x1ce   :  { %2525 = vmatmul.mubr.msk.f32.gmra.mxu1 %vm1886_vm13, %v1881_v30 }
 0x1cf   :  { %2423 = vmatprep.mubr.f32.mxu1 %v3749_v38 }
 0x263   :  { %v1965_v28 = vpop.f32.mrf.mxu0 }
 0x265   :  { %v1967_v17 = vpop.f32.mrf.mxu0 }
 0x267   :  { %v1971_v43 = vpop.f32.mrf.mxu0 }
 0x269   :  { %v1973_v31 = vpop.f32.mrf.mxu0 }
 0x26b   :  { %v1977_v41 = vpop.f32.mrf.mxu0 }
 0x26d   :  { %v1979_v1 = vpop.f32.mrf.mxu0 }
 0x26f   :  { %v1983_v23 = vpop.f32.mrf.mxu0 }
 0x271   :  { %v1985_v22 = vpop.f32.mrf.mxu0 }
 0x272   :  { %v3652_v46 = vpop.f32.mrf.mxu1 }
 0x274   :  { %v2056_v48 = vpop.f32.mrf.mxu1  ;;  %v2155_v61 = vpop.f32.mrf.mxu0 }
 0x275   :  { %v2156_v33 = vadd.f32 %v2155_v61, %v1965_v28 }
 0x276   :  { %v2060_v47 = vpop.f32.mrf.mxu1  ;;  %v2157_v16 = vpop.f32.mrf.mxu0 }
 0x277   :  { %v2158_v0 = vadd.f32 %v2157_v16, %v1967_v17  ;;  %v2268_v6 = vmul.f32 %v2156_v33, %v2156_v33 }
 0x278   :  { %v2062_v39 = vpop.f32.mrf.mxu1  ;;  %v2161_v15 = vpop.f32.mrf.mxu0 }
 0x279   :  { %v2162_v49 = vadd.f32 %v2161_v15, %v1971_v43  ;;  %v2269_v34 = vmul.f32 %v2158_v0, %v2158_v0 }
 0x27a   :  { %v2066_v58 = vpop.f32.mrf.mxu1  ;;  %v2163_v62 = vpop.f32.mrf.mxu0 }
 0x27b   :  { %v2164_v38 = vadd.f32 %v2163_v62, %v1973_v31  ;;  %v2272_v8 = vmul.f32 %v2162_v49, %v2162_v49 }
 0x27c   :  { %v2068_v9 = vpop.f32.mrf.mxu1  ;;  %v2167_v60 = vpop.f32.mrf.mxu0 }
 0x27d   :  { %v2168_v57 = vadd.f32 %v2167_v60, %v1977_v41  ;;  %v2273_v4 = vmul.f32 %v2164_v38, %v2164_v38 }
 0x27e   :  { %v2072_v56 = vpop.f32.mrf.mxu1  ;;  %v2169_v10 = vpop.f32.mrf.mxu0 }
 0x27f   :  { %v2170_v12 = vadd.f32 %v2169_v10, %v1979_v1  ;;  %v2276_v14 = vmul.f32 %v2168_v57, %v2168_v57 }
 0x280   :  { %v2074_v18 = vpop.f32.mrf.mxu1  ;;  %v2173_v19 = vpop.f32.mrf.mxu0 }
 0x281   :  { %v2174_v40 = vadd.f32 %v2173_v19, %v1983_v23  ;;  %v2277_v54 = vmul.f32 %v2170_v12, %v2170_v12 }
 0x282   :  { %v2244_v7 = vpop.f32.mrf.mxu1  ;;  %v2175_v50 = vpop.f32.mrf.mxu0 }
 0x283   :  { %v2176_v45 = vadd.f32 %v2175_v50, %v1985_v22  ;;  %v2280_v27 = vmul.f32 %v2174_v40, %v2174_v40  ;;  %v2245_v13 = vadd.f32 %v2244_v7, %v3652_v46 }
 0x284   :  { %v2246_v42 = vpop.f32.mrf.mxu1 }
 0x285   :  { %v2281_v44 = vmul.f32 %v2176_v45, %v2176_v45  ;;  %v2247_v35 = vadd.f32 %v2246_v42, %v2056_v48  ;;  %v2270_v28 = vmul.f32 %v2245_v13, %v2245_v13 }
 0x286   :  { %v2250_v37 = vpop.f32.mrf.mxu1 }
 0x287   :  { %2312 = vmatprep.subr.mxu0 %v2281_v44  ;;  %v2251_v20 = vadd.f32 %v2250_v37, %v2060_v47  ;;  %v2271_v30 = vmul.f32 %v2247_v35, %v2247_v35 }
 0x288   :  { %v2252_v59 = vpop.f32.mrf.mxu1  ;;  %2313 = vmatpush1.msra.mxu0 %v2280_v27 }
 0x289   :  { %2314 = vmatprep.subr.mxu0 %v2277_v54  ;;  %v2253_v52 = vadd.f32 %v2252_v59, %v2062_v39  ;;  %v2274_v55 = vmul.f32 %v2251_v20, %v2251_v20 }
 0x28a   :  { %v2256_v5 = vpop.f32.mrf.mxu1  ;;  %2315 = vmatpush1.msra.mxu0 %v2276_v14 }
 0x28b   :  { %2316 = vmatprep.subr.mxu0 %v2273_v4  ;;  %v2257_v53 = vadd.f32 %v2256_v5, %v2066_v58  ;;  %v2275_v63 = vmul.f32 %v2253_v52, %v2253_v52 }
 0x28c   :  { %v2258_v11 = vpop.f32.mrf.mxu1  ;;  %2317 = vmatpush1.msra.mxu0 %v2272_v8 }
 0x28d   :  { %2318 = vmatprep.subr.mxu0 %v2269_v34  ;;  %v2259_v21 = vadd.f32 %v2258_v11, %v2068_v9  ;;  %v2278_v3 = vmul.f32 %v2257_v53, %v2257_v53 }
 0x28e   :  { %v2262_v26 = vpop.f32.mrf.mxu1  ;;  %2319 = vmatpush1.msra.mxu0 %v2268_v6 }
 0x28f   :  { %2526 = vmatmul.mubr.msk.f32.vlgmr.msra.gmra.mxu0 %vm2284_vm11, %v2267_v29  ;;  %v2263_v24 = vadd.f32 %v2262_v26, %v2072_v56  ;;  %v2279_v32 = vmul.f32 %v2259_v21, %v2259_v21 }
 0x290   :  { %v2264_v51 = vpop.f32.mrf.mxu1 }
 0x291   :  { %v2265_v25 = vadd.f32 %v2264_v51, %v2074_v18  ;;  %v2282_v36 = vmul.f32 %v2263_v24, %v2263_v24 }
 0x293   :  { %v2283_v2 = vmul.f32 %v2265_v25, %v2265_v25 }
 0x295   :  { %2383 = vmatprep.subr.mxu1 %v2283_v2 }
 0x296   :  { %2384 = vmatpush1.msra.mxu1 %v2282_v36 }
 0x297   :  { %2385 = vmatprep.subr.mxu1 %v2279_v32 }
 0x298   :  { %2386 = vmatpush1.msra.mxu1 %v2278_v3 }
 0x299   :  { %2387 = vmatprep.subr.mxu1 %v2275_v63 }
 0x29a   :  { %2388 = vmatpush1.msra.mxu1 %v2274_v55 }
 0x29b   :  { %2389 = vmatprep.subr.mxu1 %v2271_v30 }
 0x29c   :  { %2390 = vmatpush1.msra.mxu1 %v2270_v28 }
 0x29d   :  { %2527 = vmatmul.mubr.msk.f32.vlgmr.msra.gmra.mxu1 %vm2284_vm11, %v2267_v29 }
 0x34f   :  { %v2354_v17 = vpop.f32.mrf.mxu0 }
 0x350   :  { %2430 = vst [vmem:[%s3677_s5] sm:$0xff] %v2354_v17 }
 0x351   :  { %v2356_v43 = vpop.f32.mrf.mxu0 }
 0x352   :  { %2431 = vst [vmem:[%s3677_s5 + $0x8] sm:$0xff] %v2356_v43 }
 0x35d   :  { %v2425_v31 = vpop.f32.mrf.mxu1 }
 0x35e   :  { %2432 = vst [vmem:[%s3677_s5 + $0x10] sm:$0xff] %v2425_v31 }
 0x35f   :  { %v2427_v41 = vpop.f32.mrf.mxu1 }
 0x360   :  { %2433 = vst [vmem:[%s3677_s5 + $0x18] sm:$0xff] %v2427_v41 }

</bundles_post_ra>
